<compile_context>
chip_gen: v7x
topology: tpu7x:2x2x1
jax: 0.10.0
libtpu: 0.0.40
codegen_flags: <defaults>
</compile_context>

<pallas_src>
import functools
import math

import jax
import jax.numpy as jnp
from jax.experimental import pallas as pl
from jax.experimental.pallas import tpu as pltpu


# --------------------------------- kernel -----------------------------------

def _residual_mlp_kernel(
    x_ref,                      # (1, rows_pb, F)      original input dtype
    w_in_ref, b_in_ref,         # (F, 2H), (1, 2H)     [wr1(BN-folded) | w11(raw)]
    w12_ref, b12_ref,           # (H, H), (1, H)       BN11 folded on input axis, BN12 on output
    w21_ref, b21_ref,           # (H, H), (1, H)       raw
    w22_ref, b22_ref,           # (H, H), (1, H)       BN21 folded on input axis, BN22 on output
    wc_ref, bc_ref,             # (H, Cpad), (1, Cpad) classifier (lane padded)
    out_ref,                    # (1, bags_pb, Cpad)   f32
    *, nbt, hidden, compute_dtype,
):
    # Cast once per block, fused with the first matmul's LHS read (no wrapper-side
    # HBM cast pass; the per-block f32 input DMA hides under the MXU work).
    x = x_ref[0].astype(compute_dtype)                             # (rows, F)

    def matmul(a, w_ref, b_ref):
        # bf16 (or f32) MXU inputs, f32 accumulation, f32 bias add.
        return (jnp.dot(a, w_ref[...], preferred_element_type=jnp.float32)
                + b_ref[...])

    # --- ResidualMLPBlock(feature_depth, 512) ---
    # residual LBN (relu=False, BN folded) and block LBN#1 (relu=True, BN deferred
    # to w12's input axis) share the same LHS -> one (rows, F) @ (F, 2H) matmul.
    rh = matmul(x, w_in_ref, b_in_ref)                             # (rows, 2H) f32
    res = rh[:, :hidden]                                           # f32 residual branch
    h = jnp.maximum(rh[:, hidden:], 0.0).astype(compute_dtype)     # ReLU, bf16 feeds MXU
    h = matmul(h, w12_ref, b12_ref)                                # LBN#2 (+ folded BNs)
    h = jnp.maximum(h + res, 0.0)                                  # residual add in f32

    # --- ResidualMLPBlock(512) (identity residual) ---
    res2 = h.astype(compute_dtype)          # one bf16 copy feeds both matmul LHS and add
    h = jnp.maximum(matmul(res2, w21_ref, b21_ref), 0.0).astype(compute_dtype)
    h = matmul(h, w22_ref, b22_ref)
    h = jnp.maximum(h + res2.astype(jnp.float32), 0.0)             # (rows, H) f32

    # x.mean(1): rows are bag-major with nbt contiguous rows per bag.
    rows = h.shape[0]
    bags = rows // nbt
    if nbt == 1:
        pooled = h
    elif nbt % 8 == 0:
        # Sublane-aligned reshape -> cheap in-block sublane mean (no relayout).
        pooled = jnp.mean(h.reshape(bags, nbt, hidden), axis=1)
    else:
        # Sublane-unfriendly nbt: strided row accumulation avoids a relayout copy.
        acc = h[0::nbt, :]
        for t in range(1, nbt):
            acc = acc + h[t::nbt, :]
        pooled = acc * (1.0 / nbt)

    # Classifier on 128-lane-padded weights (sliced back to num_class outside).
    out_ref[0] = matmul(pooled.astype(compute_dtype), wc_ref, bc_ref)


# ------------------------------ sizing helpers -------------------------------

def _tpu_vmem_and_cores():
    """(per-core VMEM capacity bytes, TensorCores per chip); conservative fallback."""
    try:
        info = pltpu.get_tpu_info()
        vmem = int(getattr(info, "vmem_capacity_bytes", 64 * 1024 * 1024))
        cores = int(getattr(info, "num_cores",
                            getattr(info, "core_count",
                                    getattr(info, "num_tensorcores", 1))))
    except Exception:
        vmem, cores = 64 * 1024 * 1024, 1
    return max(vmem, 16 * 1024 * 1024), max(cores, 1)


def _choose_bags_per_block(bs, nbt, target_rows):
    base = max(1, min(bs, max(1, target_rows) // max(1, nbt)))
    # Prefer rows_pb = bags_pb * nbt aligned to 256 (MXU M on v6e/v7x), else at
    # least 8 (f32 sublanes); pad extra bags only if the overshoot is modest.
    for align in (256, 8):
        step = align // math.gcd(align, nbt)
        cand = -(-base // step) * step
        if cand <= 2 * base:
            return cand
    return base


# --------------------------------- wrapper -----------------------------------

@functools.partial(jax.jit, static_argnames=("compute_dtype", "target_rows"))
def residual_mlp_forward(x, params, *, compute_dtype=jnp.bfloat16, target_rows=2048):
    bs, nbt, feat = x.shape
    hidden = params["w12"].shape[0]
    num_class = params["wc"].shape[1]
    c_pad = max(128, ((num_class + 127) // 128) * 128)
    cd = compute_dtype

    # ---- fold eval-mode BatchNorm into the Linears (respecting ReLU order) ----
    def fold_nonrelu(w, b, s, t):
        # Linear -> Identity -> BN folds exactly into the Linear.
        return (w * s).astype(cd), (b * s + t).astype(jnp.float32)

    def fold_into_next(s_prev, t_prev, w, b, s, t):
        # Previous layer was Linear -> ReLU -> BN(s_prev, t_prev); its BN folds
        # into this Linear's input axis, and this layer's (relu=False) BN folds
        # into its output axis.
        w_f = w * s_prev.reshape(-1, 1) * s
        b_f = (jnp.dot(t_prev, w) + b) * s + t
        return w_f.astype(cd), b_f.astype(jnp.float32)

    wr1, br1 = fold_nonrelu(params["wr1"], params["br1"], params["sr1"], params["tr1"])
    w11 = params["w11"].astype(cd)
    b11 = params["b11"].astype(jnp.float32)
    w12, b12 = fold_into_next(params["s11"], params["t11"],
                              params["w12"], params["b12"], params["s12"], params["t12"])
    w21 = params["w21"].astype(cd)
    b21 = params["b21"].astype(jnp.float32)
    w22, b22 = fold_into_next(params["s21"], params["t21"],
                              params["w22"], params["b22"], params["s22"], params["t22"])

    w_in = jnp.concatenate([wr1, w11], axis=1)                     # (F, 2H)
    b_in = jnp.concatenate([br1, b11], axis=1)                     # (1, 2H)
    # TODO(synk): on v7x only, quantize the 512x512 weights (w12/w21/w22) to fp8
    # with f32 accumulation to halve resident weight VMEM.
    wc = (jnp.zeros((hidden, c_pad), jnp.float32)
          .at[:, :num_class].set(params["wc"].astype(jnp.float32)).astype(cd))
    bc = (jnp.zeros((1, c_pad), jnp.float32)
          .at[:, :num_class].set(params["bc"].astype(jnp.float32)))

    # ---- per-generation block sizing & VMEM budget ----
    vmem_cap, n_cores = _tpu_vmem_and_cores()
    budget = int(0.85 * vmem_cap)          # never claim the full 64 MiB on v7x

    cbytes = jnp.dtype(cd).itemsize
    xbytes = jnp.dtype(x.dtype).itemsize
    param_bytes = ((feat * 2 * hidden + 3 * hidden * hidden + hidden * c_pad) * cbytes
                   + (2 * hidden + 3 * hidden + c_pad) * 4)

    def block_vmem(bpb):
        rows = bpb * nbt
        return (2 * rows * feat * xbytes                 # double-buffered input block
                + 2 * bpb * c_pad * 4                    # double-buffered output block
                + 2 * param_bytes                        # resident params (default 2x buffered)
                + rows * hidden * (16 + 2 * cbytes))     # live intermediates (rh, res, h, ...)

    bags_pb = _choose_bags_per_block(bs, nbt, target_rows)
    while bags_pb > 1 and block_vmem(bags_pb) > int(0.6 * budget):
        bags_pb = max(1, bags_pb // 2)                   # fit rows_pb to the VMEM budget

    num_blocks = -(-bs // bags_pb)
    if n_cores >= 2 and num_blocks < 2 and bs >= 2:
        # Multi-TensorCore chip (v7x): make the "parallel" axis actually splittable.
        bags_pb = -(-bs // 2)
        num_blocks = -(-bs // bags_pb)

    rows_pb = bags_pb * nbt
    bs_pad = num_blocks * bags_pb

    # No wrapper-side dtype cast; pad only when bs is not divisible by bags_pb.
    x_in = x if bs_pad == bs else jnp.pad(x, ((0, bs_pad - bs), (0, 0), (0, 0)))
    x3 = x_in.reshape(num_blocks, rows_pb, feat)         # contiguous reshape: free

    vmem_limit = min(budget, max(32 * 1024 * 1024, int(1.5 * block_vmem(bags_pb))))

    kernel = functools.partial(
        _residual_mlp_kernel, nbt=nbt, hidden=hidden, compute_dtype=cd)

    const2d = lambda i: (0, 0)                           # weights stay VMEM-resident
    out3 = pl.pallas_call(
        kernel,
        grid=(num_blocks,),
        in_specs=[
            pl.BlockSpec((1, rows_pb, feat), lambda i: (i, 0, 0)),
            pl.BlockSpec((feat, 2 * hidden), const2d),
            pl.BlockSpec((1, 2 * hidden), const2d),
            pl.BlockSpec((hidden, hidden), const2d),
            pl.BlockSpec((1, hidden), const2d),
            pl.BlockSpec((hidden, hidden), const2d),
            pl.BlockSpec((1, hidden), const2d),
            pl.BlockSpec((hidden, hidden), const2d),
            pl.BlockSpec((1, hidden), const2d),
            pl.BlockSpec((hidden, c_pad), const2d),
            pl.BlockSpec((1, c_pad), const2d),
        ],
        out_specs=pl.BlockSpec((1, bags_pb, c_pad), lambda i: (i, 0, 0)),
        out_shape=jax.ShapeDtypeStruct((num_blocks, bags_pb, c_pad), jnp.float32),
        compiler_params=pltpu.CompilerParams(
            dimension_semantics=("parallel",),
            vmem_limit_bytes=vmem_limit,
        ),
    )(x3, w_in, b_in, w12, b12, w21, b21, w22, b22, wc, bc)

    return out3.reshape(bs_pad, c_pad)[:bs, :num_class]


# ----------------------- deterministic parameter init -----------------------

def _init_linear(key, in_f, out_f):
    kw, kb = jax.random.split(key)
    bound = 1.0 / math.sqrt(in_f)
    w = jax.random.uniform(kw, (in_f, out_f), jnp.float32, -bound, bound)
    b = jax.random.uniform(kb, (1, out_f), jnp.float32, -bound, bound)
    return w, b


def _init_bn_affine(key, feat, eps=1e-5):
    k1, k2, k3, k4 = jax.random.split(key, 4)
    gamma = 1.0 + 0.1 * jax.random.normal(k1, (1, feat), jnp.float32)
    beta = 0.1 * jax.random.normal(k2, (1, feat), jnp.float32)
    running_mean = 0.1 * jax.random.normal(k3, (1, feat), jnp.float32)
    running_var = 1.0 + 0.1 * jax.random.uniform(k4, (1, feat), jnp.float32)
    scale = gamma / jnp.sqrt(running_var + eps)
    shift = beta - running_mean * scale
    return scale, shift


def init_params(key, feature_depth, hidden, num_class):
    keys = jax.random.split(key, 11)
    p = {}
    p["wr1"], p["br1"] = _init_linear(keys[0], feature_depth, hidden)   # residual LBN
    p["sr1"], p["tr1"] = _init_bn_affine(keys[1], hidden)
    p["w11"], p["b11"] = _init_linear(keys[2], feature_depth, hidden)   # block1 LBN#1
    p["s11"], p["t11"] = _init_bn_affine(keys[3], hidden)
    p["w12"], p["b12"] = _init_linear(keys[4], hidden, hidden)          # block1 LBN#2
    p["s12"], p["t12"] = _init_bn_affine(keys[5], hidden)
    p["w21"], p["b21"] = _init_linear(keys[6], hidden, hidden)          # block2 LBN#1
    p["s21"], p["t21"] = _init_bn_affine(keys[7], hidden)
    p["w22"], p["b22"] = _init_linear(keys[8], hidden, hidden)          # block2 LBN#2
    p["s22"], p["t22"] = _init_bn_affine(keys[9], hidden)
    p["wc"], p["bc"] = _init_linear(keys[10], hidden, num_class)        # classifier
    return p


# ----------------------------- pure-JAX reference ----------------------------

def reference_forward(x, params):
    """Eval-mode ResidualMLP: LinearBatchNorm = Linear -> ReLU? -> Dropout(id) -> BN."""
    bs, nbt, feat = x.shape
    h0 = x.reshape(bs * nbt, feat)
    hi = jax.lax.Precision.HIGHEST

    def lbn(h, w, b, s, t, relu):
        y = jnp.dot(h, w, precision=hi) + b
        if relu:
            y = jnp.maximum(y, 0.0)
        return y * s + t

    res = lbn(h0, params["wr1"], params["br1"], params["sr1"], params["tr1"], False)
    h = lbn(h0, params["w11"], params["b11"], params["s11"], params["t11"], True)
    h = lbn(h, params["w12"], params["b12"], params["s12"], params["t12"], False)
    h = jnp.maximum(h + res, 0.0)
    res2 = h
    h = lbn(h, params["w21"], params["b21"], params["s21"], params["t21"], True)
    h = lbn(h, params["w22"], params["b22"], params["s22"], params["t22"], False)
    h = jnp.maximum(h + res2, 0.0)
    pooled = h.reshape(bs, nbt, -1).mean(axis=1)
    return jnp.dot(pooled, params["wc"], precision=hi) + params["bc"]


if __name__ == "__main__":
    bs, nbt = 4, 8                 # small batch of tile bags
    feature_depth = 256            # args.feature_depth (module default)
    hidden = 512                   # hard-coded in ResidualMLP
    num_class = 2                  # args.num_class (module default)

    key = jax.random.PRNGKey(0)
    kx, kp = jax.random.split(key)
    x = jax.random.normal(kx, (bs, nbt, feature_depth), jnp.float32)
    params = init_params(kp, feature_depth, hidden, num_class)

    ref = reference_forward(x, params)

    # f32 compute path with a small block size -> exercises a multi-step grid.
    out_f32 = jax.block_until_ready(
        residual_mlp_forward(x, params, compute_dtype=jnp.float32, target_rows=16))
    # bf16 MXU path with the default (large-block, per-generation) sizing.
    out_bf16 = jax.block_until_ready(
        residual_mlp_forward(x, params, compute_dtype=jnp.bfloat16))

    assert out_f32.shape == (bs, num_class)
    assert out_bf16.shape == (bs, num_class)
    assert jnp.allclose(out_f32, ref, atol=1e-2, rtol=1e-2), "f32 kernel mismatch"
    assert jnp.allclose(out_bf16, ref, atol=1e-1, rtol=1e-1), "bf16 kernel mismatch"
    print("KERNEL_OK")
</pallas_src>

<mosaic_0001>
module attributes {stable_mosaic.version = 11 : i64} {
  func.func @_residual_mlp_kernel(%arg0: i32, %arg1: memref<1x16x256xf32, #tpu.memory_space<vmem>>, %arg2: memref<256x1024xf32, #tpu.memory_space<vmem>>, %arg3: memref<1x1024xf32, #tpu.memory_space<vmem>>, %arg4: memref<512x512xf32, #tpu.memory_space<vmem>>, %arg5: memref<1x512xf32, #tpu.memory_space<vmem>>, %arg6: memref<512x512xf32, #tpu.memory_space<vmem>>, %arg7: memref<1x512xf32, #tpu.memory_space<vmem>>, %arg8: memref<512x512xf32, #tpu.memory_space<vmem>>, %arg9: memref<1x512xf32, #tpu.memory_space<vmem>>, %arg10: memref<512x128xf32, #tpu.memory_space<vmem>>, %arg11: memref<1x128xf32, #tpu.memory_space<vmem>>, %arg12: memref<1x2x128xf32, #tpu.memory_space<vmem>>) attributes {dimension_semantics = [#tpu.dimension_semantics<parallel>], iteration_bounds = array<i64: 2>, scalar_prefetch = 0 : i64, scratch_operands = 0 : i64, tpu.core_type = #tpu.core_type<tc>, window_params = [{transform_indices = @transform_0, window_bounds = array<i64: 1, 16, 256>}, {pipeline_mode = #tpu.pipeline_mode<synchronous>, transform_indices = @transform_1, window_bounds = array<i64: 256, 1024>}, {pipeline_mode = #tpu.pipeline_mode<synchronous>, transform_indices = @transform_2, window_bounds = array<i64: 1, 1024>}, {pipeline_mode = #tpu.pipeline_mode<synchronous>, transform_indices = @transform_3, window_bounds = array<i64: 512, 512>}, {pipeline_mode = #tpu.pipeline_mode<synchronous>, transform_indices = @transform_4, window_bounds = array<i64: 1, 512>}, {pipeline_mode = #tpu.pipeline_mode<synchronous>, transform_indices = @transform_5, window_bounds = array<i64: 512, 512>}, {pipeline_mode = #tpu.pipeline_mode<synchronous>, transform_indices = @transform_6, window_bounds = array<i64: 1, 512>}, {pipeline_mode = #tpu.pipeline_mode<synchronous>, transform_indices = @transform_7, window_bounds = array<i64: 512, 512>}, {pipeline_mode = #tpu.pipeline_mode<synchronous>, transform_indices = @transform_8, window_bounds = array<i64: 1, 512>}, {pipeline_mode = #tpu.pipeline_mode<synchronous>, transform_indices = @transform_9, window_bounds = array<i64: 512, 128>}, {pipeline_mode = #tpu.pipeline_mode<synchronous>, transform_indices = @transform_10, window_bounds = array<i64: 1, 128>}, {transform_indices = @transform_11, window_bounds = array<i64: 1, 2, 128>}]} {
    %c0 = arith.constant 0 : index
    %c0_0 = arith.constant 0 : index
    %c0_1 = arith.constant 0 : index
    %0 = vector.load %arg1[%c0, %c0_0, %c0_1] : memref<1x16x256xf32, #tpu.memory_space<vmem>>, vector<1x16x256xf32>
    %1 = vector.shape_cast %0 : vector<1x16x256xf32> to vector<16x256xf32>
    %c0_2 = arith.constant 0 : index
    %c0_3 = arith.constant 0 : index
    %2 = vector.load %arg2[%c0_2, %c0_3] : memref<256x1024xf32, #tpu.memory_space<vmem>>, vector<256x1024xf32>
    %cst = arith.constant dense<0.000000e+00> : vector<16x1024xf32>
    %3 = tpu.matmul %1, %2, %cst {dimension_numbers = #tpu.dot_dimension_numbers<[1], [0], [0], [1], [0, 0, 1, 1], [], []>} : vector<16x256xf32>, vector<256x1024xf32>, vector<16x1024xf32> -> vector<16x1024xf32>
    %c0_4 = arith.constant 0 : index
    %c0_5 = arith.constant 0 : index
    %4 = vector.load %arg3[%c0_4, %c0_5] : memref<1x1024xf32, #tpu.memory_space<vmem>>, vector<1x1024xf32>
    %5 = vector.broadcast %4 : vector<1x1024xf32> to vector<16x1024xf32>
    %6 = arith.addf %3, %5 : vector<16x1024xf32>
    %7 = vector.extract_strided_slice %6 {offsets = [0, 0], sizes = [16, 512], strides = [1, 1]} : vector<16x1024xf32> to vector<16x512xf32>
    %8 = vector.extract_strided_slice %6 {offsets = [0, 512], sizes = [16, 512], strides = [1, 1]} : vector<16x1024xf32> to vector<16x512xf32>
    %cst_6 = arith.constant 0.000000e+00 : f32
    %9 = vector.broadcast %cst_6 : f32 to vector<16x512xf32>
    %10 = arith.maximumf %8, %9 : vector<16x512xf32>
    %c0_7 = arith.constant 0 : index
    %c0_8 = arith.constant 0 : index
    %11 = vector.load %arg4[%c0_7, %c0_8] : memref<512x512xf32, #tpu.memory_space<vmem>>, vector<512x512xf32>
    %cst_9 = arith.constant dense<0.000000e+00> : vector<16x512xf32>
    %12 = tpu.matmul %10, %11, %cst_9 {dimension_numbers = #tpu.dot_dimension_numbers<[1], [0], [0], [1], [0, 0, 1, 1], [], []>} : vector<16x512xf32>, vector<512x512xf32>, vector<16x512xf32> -> vector<16x512xf32>
    %c0_10 = arith.constant 0 : index
    %c0_11 = arith.constant 0 : index
    %13 = vector.load %arg5[%c0_10, %c0_11] : memref<1x512xf32, #tpu.memory_space<vmem>>, vector<1x512xf32>
    %14 = vector.broadcast %13 : vector<1x512xf32> to vector<16x512xf32>
    %15 = arith.addf %12, %14 : vector<16x512xf32>
    %16 = arith.addf %15, %7 : vector<16x512xf32>
    %cst_12 = arith.constant 0.000000e+00 : f32
    %17 = vector.broadcast %cst_12 : f32 to vector<16x512xf32>
    %18 = arith.maximumf %16, %17 : vector<16x512xf32>
    %c0_13 = arith.constant 0 : index
    %c0_14 = arith.constant 0 : index
    %19 = vector.load %arg6[%c0_13, %c0_14] : memref<512x512xf32, #tpu.memory_space<vmem>>, vector<512x512xf32>
    %cst_15 = arith.constant dense<0.000000e+00> : vector<16x512xf32>
    %20 = tpu.matmul %18, %19, %cst_15 {dimension_numbers = #tpu.dot_dimension_numbers<[1], [0], [0], [1], [0, 0, 1, 1], [], []>} : vector<16x512xf32>, vector<512x512xf32>, vector<16x512xf32> -> vector<16x512xf32>
    %c0_16 = arith.constant 0 : index
    %c0_17 = arith.constant 0 : index
    %21 = vector.load %arg7[%c0_16, %c0_17] : memref<1x512xf32, #tpu.memory_space<vmem>>, vector<1x512xf32>
    %22 = vector.broadcast %21 : vector<1x512xf32> to vector<16x512xf32>
    %23 = arith.addf %20, %22 : vector<16x512xf32>
    %cst_18 = arith.constant 0.000000e+00 : f32
    %24 = vector.broadcast %cst_18 : f32 to vector<16x512xf32>
    %25 = arith.maximumf %23, %24 : vector<16x512xf32>
    %c0_19 = arith.constant 0 : index
    %c0_20 = arith.constant 0 : index
    %26 = vector.load %arg8[%c0_19, %c0_20] : memref<512x512xf32, #tpu.memory_space<vmem>>, vector<512x512xf32>
    %cst_21 = arith.constant dense<0.000000e+00> : vector<16x512xf32>
    %27 = tpu.matmul %25, %26, %cst_21 {dimension_numbers = #tpu.dot_dimension_numbers<[1], [0], [0], [1], [0, 0, 1, 1], [], []>} : vector<16x512xf32>, vector<512x512xf32>, vector<16x512xf32> -> vector<16x512xf32>
    %c0_22 = arith.constant 0 : index
    %c0_23 = arith.constant 0 : index
    %28 = vector.load %arg9[%c0_22, %c0_23] : memref<1x512xf32, #tpu.memory_space<vmem>>, vector<1x512xf32>
    %29 = vector.broadcast %28 : vector<1x512xf32> to vector<16x512xf32>
    %30 = arith.addf %27, %29 : vector<16x512xf32>
    %31 = arith.addf %30, %18 : vector<16x512xf32>
    %cst_24 = arith.constant 0.000000e+00 : f32
    %32 = vector.broadcast %cst_24 : f32 to vector<16x512xf32>
    %33 = arith.maximumf %31, %32 : vector<16x512xf32>
    %34 = vector.shape_cast %33 : vector<16x512xf32> to vector<2x8x512xf32>
    %cst_25 = arith.constant dense<0.000000e+00> : vector<2x512xf32>
    %35 = vector.multi_reduction <add>, %34, %cst_25 [1] : vector<2x8x512xf32> to vector<2x512xf32>
    %cst_26 = arith.constant 8.000000e+00 : f32
    %36 = vector.broadcast %cst_26 : f32 to vector<2x512xf32>
    %37 = arith.divf %35, %36 : vector<2x512xf32>
    %c0_27 = arith.constant 0 : index
    %c0_28 = arith.constant 0 : index
    %38 = vector.load %arg10[%c0_27, %c0_28] : memref<512x128xf32, #tpu.memory_space<vmem>>, vector<512x128xf32>
    %cst_29 = arith.constant dense<0.000000e+00> : vector<2x128xf32>
    %39 = tpu.matmul %37, %38, %cst_29 {dimension_numbers = #tpu.dot_dimension_numbers<[1], [0], [0], [1], [0, 0, 1, 1], [], []>} : vector<2x512xf32>, vector<512x128xf32>, vector<2x128xf32> -> vector<2x128xf32>
    %c0_30 = arith.constant 0 : index
    %c0_31 = arith.constant 0 : index
    %40 = vector.load %arg11[%c0_30, %c0_31] : memref<1x128xf32, #tpu.memory_space<vmem>>, vector<1x128xf32>
    %41 = vector.broadcast %40 : vector<1x128xf32> to vector<2x128xf32>
    %42 = arith.addf %39, %41 : vector<2x128xf32>
    %c0_32 = arith.constant 0 : index
    %c0_33 = arith.constant 0 : index
    %c0_34 = arith.constant 0 : index
    %43 = vector.load %arg12[%c0_32, %c0_33, %c0_34] : memref<1x2x128xf32, #tpu.memory_space<vmem>>, vector<1x2x128xf32>
    %44 = vector.shape_cast %43 : vector<1x2x128xf32> to vector<2x128xf32>
    %45 = vector.shape_cast %42 : vector<2x128xf32> to vector<1x2x128xf32>
    tpu.vector_store %arg12[%c0_32, %c0_33, %c0_34], %45 {strides = array<i32>} : memref<1x2x128xf32, #tpu.memory_space<vmem>>, vector<1x2x128xf32>,
    return
  }
  func.func @transform_0(%arg0: i32) -> (i32, i32, i32) {
    %c0_i32 = arith.constant 0 : i32
    %c0_i32_0 = arith.constant 0 : i32
    %c0_i32_1 = arith.constant 0 : i32
    return %arg0, %c0_i32, %c0_i32_0 : i32, i32, i32
  }
  func.func @transform_1(%arg0: i32) -> (i32, i32) {
    %c0_i32 = arith.constant 0 : i32
    %c0_i32_0 = arith.constant 0 : i32
    %c0_i32_1 = arith.constant 0 : i32
    return %c0_i32, %c0_i32_0 : i32, i32
  }
  func.func @transform_2(%arg0: i32) -> (i32, i32) {
    %c0_i32 = arith.constant 0 : i32
    %c0_i32_0 = arith.constant 0 : i32
    %c0_i32_1 = arith.constant 0 : i32
    return %c0_i32, %c0_i32_0 : i32, i32
  }
  func.func @transform_3(%arg0: i32) -> (i32, i32) {
    %c0_i32 = arith.constant 0 : i32
    %c0_i32_0 = arith.constant 0 : i32
    %c0_i32_1 = arith.constant 0 : i32
    return %c0_i32, %c0_i32_0 : i32, i32
  }
  func.func @transform_4(%arg0: i32) -> (i32, i32) {
    %c0_i32 = arith.constant 0 : i32
    %c0_i32_0 = arith.constant 0 : i32
    %c0_i32_1 = arith.constant 0 : i32
    return %c0_i32, %c0_i32_0 : i32, i32
  }
  func.func @transform_5(%arg0: i32) -> (i32, i32) {
    %c0_i32 = arith.constant 0 : i32
    %c0_i32_0 = arith.constant 0 : i32
    %c0_i32_1 = arith.constant 0 : i32
    return %c0_i32, %c0_i32_0 : i32, i32
  }
  func.func @transform_6(%arg0: i32) -> (i32, i32) {
    %c0_i32 = arith.constant 0 : i32
    %c0_i32_0 = arith.constant 0 : i32
    %c0_i32_1 = arith.constant 0 : i32
    return %c0_i32, %c0_i32_0 : i32, i32
  }
  func.func @transform_7(%arg0: i32) -> (i32, i32) {
    %c0_i32 = arith.constant 0 : i32
    %c0_i32_0 = arith.constant 0 : i32
    %c0_i32_1 = arith.constant 0 : i32
    return %c0_i32, %c0_i32_0 : i32, i32
  }
  func.func @transform_8(%arg0: i32) -> (i32, i32) {
    %c0_i32 = arith.constant 0 : i32
    %c0_i32_0 = arith.constant 0 : i32
    %c0_i32_1 = arith.constant 0 : i32
    return %c0_i32, %c0_i32_0 : i32, i32
  }
  func.func @transform_9(%arg0: i32) -> (i32, i32) {
    %c0_i32 = arith.constant 0 : i32
    %c0_i32_0 = arith.constant 0 : i32
    %c0_i32_1 = arith.constant 0 : i32
    return %c0_i32, %c0_i32_0 : i32, i32
  }
  func.func @transform_10(%arg0: i32) -> (i32, i32) {
    %c0_i32 = arith.constant 0 : i32
    %c0_i32_0 = arith.constant 0 : i32
    %c0_i32_1 = arith.constant 0 : i32
    return %c0_i32, %c0_i32_0 : i32, i32
  }
  func.func @transform_11(%arg0: i32) -> (i32, i32, i32) {
    %c0_i32 = arith.constant 0 : i32
    %c0_i32_0 = arith.constant 0 : i32
    %c0_i32_1 = arith.constant 0 : i32
    return %arg0, %c0_i32, %c0_i32_0 : i32, i32, i32
  }
}

</mosaic_0001>

<bundles_post_ra>
// kernel: residual_mlp_forward.1
= control target key start
LH: loop header
LB: loop body
LE: loop exit
PB: predicated region body
PF: predicated region fallthrough
CT: control target
= control target key end

     0   :  { %s4451_s17 = smov 0   ;;  %s7925_s0 = inlined_call_operand.vmem [shape: f32[2,16,256], index: 0, kind: input, shape index: {}]   ;;  %s7926_s1 = inlined_call_operand.vmem [shape: f32[256,1024], index: 1, kind: input, shape index: {}]   ;;  %s7927_s2 = inlined_call_operand.vmem [shape: f32[1,1024], index: 2, kind: input, shape index: {}]   ;;  %s7928_s3 = inlined_call_operand.vmem [shape: f32[512,512], index: 3, kind: input, shape index: {}]   ;;  %s7929_s4 = inlined_call_operand.vmem [shape: f32[1,512], index: 4, kind: input, shape index: {}]   ;;  %s7930_s5 = inlined_call_operand.vmem [shape: f32[512,512], index: 5, kind: input, shape index: {}]   ;;  %s7931_s6 = inlined_call_operand.vmem [shape: f32[1,512], index: 6, kind: input, shape index: {}]   ;;  %s7932_s7 = inlined_call_operand.vmem [shape: f32[512,512], index: 7, kind: input, shape index: {}]   ;;  %s7933_s8 = inlined_call_operand.vmem [shape: f32[1,512], index: 8, kind: input, shape index: {}]   ;;  %s7934_s9 = inlined_call_operand.vmem [shape: f32[512,128], index: 9, kind: input, shape index: {}]   ;;  %s7935_s10 = inlined_call_operand.vmem [shape: f32[1,128], index: 10, kind: input, shape index: {}]   ;;  %s7936_s11 = inlined_call_operand.vmem [shape: f32[2,2,128], index: 11, kind: output, shape index: {}]  }
   0x1 LB: > { %s3140_s18 = sadd.s32 4294967295, %s4389_s17   ;;  %p3144_p0 = scmp.ge.s32.totalorder %s4389_s17, 1  ;;  %s4389_s17 = sphi %s4451_s17, %s21_s17  }
   0x2   : > { %p337_p1 = scmp.lt.s32.totalorder %s4389_s17, 3 }
   0x4   : > { %p338_p2 = pnand %p3144_p0, %p337_p1 }
   0x5   : > { %v390_v0 = vld [vmem:[%s7926_s1 + $0x8] sm:$0xff] (!%p338_p2)  ;;  %v389_v2 = vld [vmem:[%s7926_s1] sm:$0xff] (!%p338_p2)  ;;  %p376_p3 = scmp.lt.s32.totalorder (!%p338_p2), %s3140_s18, 1  ;;  %v392_v43 = vld [vmem:[%s7926_s1 + $0x18] sm:$0xff] (!%p338_p2)  ;;  %vm2937_vm0 = vcmask (!%p338_p2), 1041409  }
   0x6   : > { %341 = sbr.rel (%p338_p2) target bundleno = 1442 (0x5a2), region = 64  ;;  %v398_v1 = vld [vmem:[%s7926_s1 + $0x48] sm:$0xff] (!%p338_p2)  ;;  %v397_v4 = vld [vmem:[%s7926_s1 + $0x40] sm:$0xff] (!%p338_p2)  ;;  %v400_v44 = vld [vmem:[%s7926_s1 + $0x58] sm:$0xff] (!%p338_p2) }
   0x7   : > { %v3222_v3 = vpack.c.bf16 (!%p338_p2), %v398_v1, %v390_v0  ;;  %v406_v5 = vld [vmem:[%s7926_s1 + $0x88] sm:$0xff] (!%p338_p2)  ;;  %v3224_v7 = vpack.c.bf16 (!%p338_p2), %v397_v4, %v389_v2  ;;  %v405_v9 = vld [vmem:[%s7926_s1 + $0x80] sm:$0xff] (!%p338_p2)  ;;  %v3286_v45 = vpack.c.bf16 (!%p338_p2), %v400_v44, %v392_v43  ;;  %v391_v46 = vld [vmem:[%s7926_s1 + $0x10] sm:$0xff] (!%p338_p2) }
   0x8   : > { %v414_v6 = vld [vmem:[%s7926_s1 + $0xc8] sm:$0xff] (!%p338_p2)  ;;  %v413_v10 = vld [vmem:[%s7926_s1 + $0xc0] sm:$0xff] (!%p338_p2)  ;;  %v399_v47 = vld [vmem:[%s7926_s1 + $0x50] sm:$0xff] (!%p338_p2) }
   0x9   : > { %v3226_v8 = vpack.c.bf16 (!%p338_p2), %v414_v6, %v406_v5  ;;  %v422_v11 = vld [vmem:[%s7926_s1 + $0x108] sm:$0xff] (!%p338_p2)  ;;  %3223 = vmatprep.subr.bf16.mxu0 (!%p338_p2), %v3222_v3  ;;  %v3228_v13 = vpack.c.bf16 (!%p338_p2), %v413_v10, %v405_v9  ;;  %v421_v15 = vld [vmem:[%s7926_s1 + $0x100] sm:$0xff] (!%p338_p2)  ;;  %v3288_v49 = vpack.c.bf16 (!%p338_p2), %v399_v47, %v391_v46  ;;  %3287 = vmatprep.subr.bf16.mxu1 (!%p338_p2), %v3286_v45  ;;  %v408_v53 = vld [vmem:[%s7926_s1 + $0x98] sm:$0xff] (!%p338_p2) }
   0xa   : > { %v430_v12 = vld [vmem:[%s7926_s1 + $0x148] sm:$0xff] (!%p338_p2)  ;;  %3225 = vmatpush1.bf16.msra.mxu0 (!%p338_p2), %v3224_v7  ;;  %v429_v16 = vld [vmem:[%s7926_s1 + $0x140] sm:$0xff] (!%p338_p2)  ;;  %v416_v55 = vld [vmem:[%s7926_s1 + $0xd8] sm:$0xff] (!%p338_p2) }
   0xb   : > { %3227 = vmatprep.subr.bf16.mxu0 (!%p338_p2), %v3226_v8  ;;  %v3230_v14 = vpack.c.bf16 (!%p338_p2), %v430_v12, %v422_v11  ;;  %v438_v17 = vld [vmem:[%s7926_s1 + $0x188] sm:$0xff] (!%p338_p2)  ;;  %v3232_v19 = vpack.c.bf16 (!%p338_p2), %v429_v16, %v421_v15  ;;  %v437_v21 = vld [vmem:[%s7926_s1 + $0x180] sm:$0xff] (!%p338_p2)  ;;  %3289 = vmatpush1.bf16.msra.mxu1 (!%p338_p2), %v3288_v49  ;;  %v407_v56 = vld [vmem:[%s7926_s1 + $0x90] sm:$0xff] (!%p338_p2)  ;;  %v3290_v60 = vpack.c.bf16 (!%p338_p2), %v416_v55, %v408_v53 }
   0xc   : > { %v446_v18 = vld [vmem:[%s7926_s1 + $0x1c8] sm:$0xff] (!%p338_p2)  ;;  %v445_v22 = vld [vmem:[%s7926_s1 + $0x1c0] sm:$0xff] (!%p338_p2)  ;;  %v415_v57 = vld [vmem:[%s7926_s1 + $0xd0] sm:$0xff] (!%p338_p2) }
   0xd   : > { %v3234_v20 = vpack.c.bf16 %v446_v18, %v438_v17  ;;  %v454_v23 = vld [vmem:[%s7926_s1 + $0x208] sm:$0xff]  ;;  %v3236_v25 = vpack.c.bf16 %v445_v22, %v437_v21  ;;  %s7938_s18 = smov (!%p376_p3, %s3140_s18), 1  ;;  %v453_v27 = vld [vmem:[%s7926_s1 + $0x200] sm:$0xff]  ;;  %v3292_v61 = vpack.c.bf16 %v415_v57, %v407_v56  ;;  %v424_v62 = vld [vmem:[%s7926_s1 + $0x118] sm:$0xff]  ;;  %3291 = vmatprep.subr.bf16.mxu1 %v3290_v60 }
   0xe   : > { %3229 = vmatpush1.bf16.msra.mxu0 %v3228_v13  ;;  %v462_v24 = vld [vmem:[%s7926_s1 + $0x248] sm:$0xff]  ;;  %v461_v28 = vld [vmem:[%s7926_s1 + $0x240] sm:$0xff]  ;;  %s3151_s29 = sshll.u32 %s7938_s18, 5  ;;  %v432_v63 = vld [vmem:[%s7926_s1 + $0x158] sm:$0xff]  ;;  %s3147_s12 = sshll.u32 %s7938_s18, 1 }
   0xf   : > { %3231 = vmatprep.subr.bf16.mxu0 %v3230_v14  ;;  %v3238_v26 = vpack.c.bf16 %v462_v24, %v454_v23  ;;  %v470_v29 = vld [vmem:[%s7926_s1 + $0x288] sm:$0xff]  ;;  %v3240_v31 = vpack.c.bf16 %v461_v28, %v453_v27  ;;  %v469_v33 = vld [vmem:[%s7926_s1 + $0x280] sm:$0xff]  ;;  %s4547_s23 = scalar_lea.vmem %s7925_s0, %s3151_s29  ;;  %v3294_v2 = vpack.c.bf16 %v432_v63, %v424_v62  ;;  %v423_v3 = vld [vmem:[%s7926_s1 + $0x110] sm:$0xff]  ;;  %3293 = vmatpush1.bf16.msra.mxu1 %v3292_v61  ;;  %s384_s14 = scalar_lea.vmem %s7936_s11, %s3147_s12 }
  0x10   : > { %v478_v30 = vld [vmem:[%s7926_s1 + $0x2c8] sm:$0xff]  ;;  %v477_v34 = vld [vmem:[%s7926_s1 + $0x2c0] sm:$0xff]  ;;  %v431_v4 = vld [vmem:[%s7926_s1 + $0x150] sm:$0xff] }
  0x11   : > { %v3242_v32 = vpack.c.bf16 %v478_v30, %v470_v29  ;;  %v486_v35 = vld [vmem:[%s7926_s1 + $0x308] sm:$0xff]  ;;  %v3244_v37 = vpack.c.bf16 %v477_v34, %v469_v33  ;;  %v485_v38 = vld [vmem:[%s7926_s1 + $0x300] sm:$0xff]  ;;  %v3296_v9 = vpack.c.bf16 %v431_v4, %v423_v3  ;;  %3295 = vmatprep.subr.bf16.mxu1 %v3294_v2  ;;  %v440_v10 = vld [vmem:[%s7926_s1 + $0x198] sm:$0xff] }
  0x12   : > { %3233 = vmatpush1.bf16.msra.mxu0 %v3232_v19  ;;  %v494_v36 = vld [vmem:[%s7926_s1 + $0x348] sm:$0xff]  ;;  %v493_v39 = vld [vmem:[%s7926_s1 + $0x340] sm:$0xff]  ;;  %v448_v11 = vld [vmem:[%s7926_s1 + $0x1d8] sm:$0xff] }
  0x13   : > { %3235 = vmatprep.subr.bf16.mxu0 %v3234_v20  ;;  %v502_v40 = vld [vmem:[%s7926_s1 + $0x388] sm:$0xff]  ;;  %v3246_v41 = vpack.c.bf16 %v494_v36, %v486_v35  ;;  %v3248_v50 = vpack.c.bf16 %v493_v39, %v485_v38  ;;  %v501_v51 = vld [vmem:[%s7926_s1 + $0x380] sm:$0xff]  ;;  %v439_v12 = vld [vmem:[%s7926_s1 + $0x190] sm:$0xff]  ;;  %v3298_v13 = vpack.c.bf16 %v448_v11, %v440_v10  ;;  %3297 = vmatpush1.bf16.msra.mxu1 %v3296_v9 }
  0x14   : > { %v510_v42 = vld [vmem:[%s7926_s1 + $0x3c8] sm:$0xff]  ;;  %v509_v52 = vld [vmem:[%s7926_s1 + $0x3c0] sm:$0xff]  ;;  %v447_v14 = vld [vmem:[%s7926_s1 + $0x1d0] sm:$0xff] }
  0x15   : > { %v4574_v48 = vld [vmem:[%s4547_s23 + $0x8] sm:$0xff]  ;;  %v3250_v54 = vpack.c.bf16 %v510_v42, %v502_v40  ;;  %v3252_v0 = vpack.c.bf16 %v509_v52, %v501_v51  ;;  %v517_v1 = vld [vmem:[%s7926_s1 + $0x400] sm:$0xff]  ;;  %v456_v17 = vld [vmem:[%s7926_s1 + $0x218] sm:$0xff]  ;;  %v3300_v21 = vpack.c.bf16 %v447_v14, %v439_v12  ;;  %3299 = vmatprep.subr.bf16.mxu1 %v3298_v13 }
  0x16   : > { %3237 = vmatpush1.bf16.msra.mxu0 %v3236_v25  ;;  %751 = vmatprep.mubr.f32.mxu0 %v4574_v48  ;;  %v518_v58 = vld [vmem:[%s7926_s1 + $0x408] sm:$0xff]  ;;  %v525_v6 = vld [vmem:[%s7926_s1 + $0x440] sm:$0xff]  ;;  %v464_v22 = vld [vmem:[%s7926_s1 + $0x258] sm:$0xff] }
  0x17   : > { %3239 = vmatprep.subr.bf16.mxu0 %v3238_v26  ;;  %828 = vmatprep.mubr.f32.mxu1 %v4574_v48  ;;  %v526_v59 = vld [vmem:[%s7926_s1 + $0x448] sm:$0xff]  ;;  %v3256_v15 = vpack.c.bf16 %v525_v6, %v517_v1  ;;  %v533_v16 = vld [vmem:[%s7926_s1 + $0x480] sm:$0xff]  ;;  %v3302_v24 = vpack.c.bf16 %v464_v22, %v456_v17  ;;  %v455_v25 = vld [vmem:[%s7926_s1 + $0x210] sm:$0xff] }
  0x18   : > { %v3254_v5 = vpack.c.bf16 %v526_v59, %v518_v58  ;;  %v534_v7 = vld [vmem:[%s7926_s1 + $0x488] sm:$0xff]  ;;  %v541_v19 = vld [vmem:[%s7926_s1 + $0x4c0] sm:$0xff]  ;;  %v463_v26 = vld [vmem:[%s7926_s1 + $0x250] sm:$0xff]  ;;  %3301 = vmatpush1.bf16.msra.mxu1 %v3300_v21 }
  0x19   : > { %v542_v8 = vld [vmem:[%s7926_s1 + $0x4c8] sm:$0xff]  ;;  %v472_v27 = vld [vmem:[%s7926_s1 + $0x298] sm:$0xff]  ;;  %v3260_v29 = vpack.c.bf16 %v541_v19, %v533_v16  ;;  %v3304_v34 = vpack.c.bf16 %v463_v26, %v455_v25  ;;  %3303 = vmatprep.subr.bf16.mxu1 %v3302_v24  ;;  %v479_v38 = vld [vmem:[%s7926_s1 + $0x2d0] sm:$0xff] }
  0x1a   : > { %3241 = vmatpush1.bf16.msra.mxu0 %v3240_v31  ;;  %v3258_v18 = vpack.c.bf16 %v542_v8, %v534_v7  ;;  %v550_v20 = vld [vmem:[%s7926_s1 + $0x508] sm:$0xff]  ;;  %v480_v28 = vld [vmem:[%s7926_s1 + $0x2d8] sm:$0xff]  ;;  %v549_v31 = vld [vmem:[%s7926_s1 + $0x500] sm:$0xff] }
  0x1b   : > { %3243 = vmatprep.subr.bf16.mxu0 %v3242_v32  ;;  %v558_v23 = vld [vmem:[%s7926_s1 + $0x548] sm:$0xff]  ;;  %v557_v32 = vld [vmem:[%s7926_s1 + $0x540] sm:$0xff]  ;;  %v3306_v36 = vpack.c.bf16 %v480_v28, %v472_v27  ;;  %v488_v39 = vld [vmem:[%s7926_s1 + $0x318] sm:$0xff] }
  0x1c   : > { %v3262_v30 = vpack.c.bf16 %v558_v23, %v550_v20  ;;  %v566_v33 = vld [vmem:[%s7926_s1 + $0x588] sm:$0xff]  ;;  %v496_v40 = vld [vmem:[%s7926_s1 + $0x358] sm:$0xff]  ;;  %v565_v43 = vld [vmem:[%s7926_s1 + $0x580] sm:$0xff]  ;;  %3305 = vmatpush1.bf16.msra.mxu1 %v3304_v34 }
  0x1d   : > { %v574_v35 = vld [vmem:[%s7926_s1 + $0x5c8] sm:$0xff]  ;;  %v573_v44 = vld [vmem:[%s7926_s1 + $0x5c0] sm:$0xff]  ;;  %3307 = vmatprep.subr.bf16.mxu1 %v3306_v36  ;;  %v3310_v49 = vpack.c.bf16 %v496_v40, %v488_v39  ;;  %v495_v51 = vld [vmem:[%s7926_s1 + $0x350] sm:$0xff] }
  0x1e   : > { %3245 = vmatpush1.bf16.msra.mxu0 %v3244_v37  ;;  %v471_v37 = vld [vmem:[%s7926_s1 + $0x290] sm:$0xff]  ;;  %v3266_v42 = vpack.c.bf16 %v574_v35, %v566_v33  ;;  %v582_v45 = vld [vmem:[%s7926_s1 + $0x608] sm:$0xff]  ;;  %v504_v52 = vld [vmem:[%s7926_s1 + $0x398] sm:$0xff] }
  0x1f   : > { %3247 = vmatprep.subr.bf16.mxu0 %v3246_v41  ;;  %v3264_v41 = vpack.c.bf16 %v557_v32, %v549_v31  ;;  %v3308_v46 = vpack.c.bf16 %v479_v38, %v471_v37  ;;  %v590_v47 = vld [vmem:[%s7926_s1 + $0x648] sm:$0xff]  ;;  %v512_v53 = vld [vmem:[%s7926_s1 + $0x3d8] sm:$0xff]  ;;  %v581_v56 = vld [vmem:[%s7926_s1 + $0x600] sm:$0xff] }
  0x20   : > { %v3270_v55 = vpack.c.bf16 %v590_v47, %v582_v45  ;;  %v589_v57 = vld [vmem:[%s7926_s1 + $0x640] sm:$0xff]  ;;  %v598_v58 = vld [vmem:[%s7926_s1 + $0x688] sm:$0xff]  ;;  %v3314_v61 = vpack.c.bf16 %v512_v53, %v504_v52  ;;  %v503_v62 = vld [vmem:[%s7926_s1 + $0x390] sm:$0xff] }
  0x21   : > { %3309 = vmatpush1.bf16.msra.mxu1 %v3308_v46  ;;  %v606_v60 = vld [vmem:[%s7926_s1 + $0x6c8] sm:$0xff]  ;;  %v511_v63 = vld [vmem:[%s7926_s1 + $0x3d0] sm:$0xff]  ;;  %v528_v1 = vld [vmem:[%s7926_s1 + $0x458] sm:$0xff]  ;;  %v3272_v2 = vpack.c.bf16 %v589_v57, %v581_v56 }
  0x22   : > { %3249 = vmatpush1.bf16.msra.mxu0 %v3248_v50  ;;  %v487_v50 = vld [vmem:[%s7926_s1 + $0x310] sm:$0xff]  ;;  %3311 = vmatprep.subr.bf16.mxu1 %v3310_v49  ;;  %v3274_v3 = vpack.c.bf16 %v606_v60, %v598_v58  ;;  %v597_v4 = vld [vmem:[%s7926_s1 + $0x680] sm:$0xff]  ;;  %v614_v6 = vld [vmem:[%s7926_s1 + $0x708] sm:$0xff]  ;;  %v3316_v7 = vpack.c.bf16 %v511_v63, %v503_v62 }
  0x23   : > { %3251 = vmatprep.subr.bf16.mxu0 %v3250_v54  ;;  %v3268_v54 = vpack.c.bf16 %v573_v44, %v565_v43  ;;  %v3312_v59 = vpack.c.bf16 %v495_v51, %v487_v50  ;;  %v622_v8 = vld [vmem:[%s7926_s1 + $0x748] sm:$0xff]  ;;  %v519_v10 = vld [vmem:[%s7926_s1 + $0x410] sm:$0xff]  ;;  %v536_v12 = vld [vmem:[%s7926_s1 + $0x498] sm:$0xff] }
  0x24   : > { %v527_v11 = vld [vmem:[%s7926_s1 + $0x450] sm:$0xff]  ;;  %v544_v13 = vld [vmem:[%s7926_s1 + $0x4d8] sm:$0xff]  ;;  %v613_v16 = vld [vmem:[%s7926_s1 + $0x700] sm:$0xff] }
  0x25   : > { %3313 = vmatpush1.bf16.msra.mxu1 %v3312_v59  ;;  %v621_v17 = vld [vmem:[%s7926_s1 + $0x740] sm:$0xff]  ;;  %v3320_v19 = vpack.c.bf16 %v527_v11, %v519_v10  ;;  %v638_v20 = vld [vmem:[%s7926_s1 + $0x7c8] sm:$0xff]  ;;  %v3322_v21 = vpack.c.bf16 %v544_v13, %v536_v12  ;;  %v535_v22 = vld [vmem:[%s7926_s1 + $0x490] sm:$0xff] }
  0x26   : > { %3253 = vmatpush1.bf16.msra.mxu0 %v3252_v0  ;;  %v520_v0 = vld [vmem:[%s7926_s1 + $0x418] sm:$0xff]  ;;  %3315 = vmatprep.subr.bf16.mxu1 %v3314_v61  ;;  %v543_v23 = vld [vmem:[%s7926_s1 + $0x4d0] sm:$0xff]  ;;  %v3280_v26 = vpack.c.bf16 %v621_v17, %v613_v16  ;;  %v629_v28 = vld [vmem:[%s7926_s1 + $0x780] sm:$0xff] }
  0x27   : > { %3255 = vmatprep.subr.bf16.mxu0 %v3254_v5  ;;  %v605_v5 = vld [vmem:[%s7926_s1 + $0x6c0] sm:$0xff]  ;;  %v3318_v9 = vpack.c.bf16 %v528_v1, %v520_v0  ;;  %v552_v24 = vld [vmem:[%s7926_s1 + $0x518] sm:$0xff]  ;;  %v3324_v31 = vpack.c.bf16 %v543_v23, %v535_v22  ;;  %v402_v32 = vld [vmem:[%s7926_s1 + $0x68] sm:$0xff] }
  0x28   : > { %v3276_v14 = vpack.c.bf16 %v605_v5, %v597_v4  ;;  %v560_v25 = vld [vmem:[%s7926_s1 + $0x558] sm:$0xff]  ;;  %v551_v34 = vld [vmem:[%s7926_s1 + $0x510] sm:$0xff]  ;;  %v393_v40 = vld [vmem:[%s7926_s1 + $0x20] sm:$0xff] }
  0x29   : > { %3317 = vmatpush1.bf16.msra.mxu1 %v3316_v7  ;;  %v3326_v33 = vpack.c.bf16 %v560_v25, %v552_v24  ;;  %v559_v35 = vld [vmem:[%s7926_s1 + $0x550] sm:$0xff]  ;;  %v568_v36 = vld [vmem:[%s7926_s1 + $0x598] sm:$0xff]  ;;  %v418_v44 = vld [vmem:[%s7926_s1 + $0xe8] sm:$0xff] }
  0x2a   : > { %3257 = vmatpush1.bf16.msra.mxu0 %v3256_v15  ;;  %v3278_v15 = vpack.c.bf16 %v622_v8, %v614_v6  ;;  %3319 = vmatprep.subr.bf16.mxu1 %v3318_v9  ;;  %v576_v37 = vld [vmem:[%s7926_s1 + $0x5d8] sm:$0xff]  ;;  %v3328_v43 = vpack.c.bf16 %v559_v35, %v551_v34  ;;  %v567_v46 = vld [vmem:[%s7926_s1 + $0x590] sm:$0xff]  ;;  %v4837_v51 = vld [vmem:[%s4547_s23] sm:$0xff] }
  0x2b   : > { %3259 = vmatprep.subr.bf16.mxu0 %v3258_v18  ;;  %v630_v18 = vld [vmem:[%s7926_s1 + $0x788] sm:$0xff]  ;;  %v3330_v45 = vpack.c.bf16 %v576_v37, %v568_v36  ;;  %v575_v47 = vld [vmem:[%s7926_s1 + $0x5d0] sm:$0xff]  ;;  %v584_v49 = vld [vmem:[%s7926_s1 + $0x618] sm:$0xff] }
  0x2c   : > { %v3282_v27 = vpack.c.bf16 %v638_v20, %v630_v18  ;;  %v592_v50 = vld [vmem:[%s7926_s1 + $0x658] sm:$0xff]  ;;  %v409_v53 = vld [vmem:[%s7926_s1 + $0xa0] sm:$0xff]  ;;  %v426_v56 = vld [vmem:[%s7926_s1 + $0x128] sm:$0xff]  ;;  %v3332_v57 = vpack.c.bf16 %v575_v47, %v567_v46 }
  0x2d   : > { %3321 = vmatpush1.bf16.msra.mxu1 %v3320_v19  ;;  %v4849_v58 = vld [vmem:[%s4547_s23 + $0x18] sm:$0xff]  ;;  %v434_v59 = vld [vmem:[%s7926_s1 + $0x168] sm:$0xff]  ;;  %v3334_v60 = vpack.c.bf16 %v592_v50, %v584_v49  ;;  %v583_v61 = vld [vmem:[%s7926_s1 + $0x610] sm:$0xff] }
  0x2e   : > { %3261 = vmatpush1.bf16.msra.mxu0 %v3260_v29  ;;  %v637_v29 = vld [vmem:[%s7926_s1 + $0x7c0] sm:$0xff]  ;;  %3323 = vmatprep.subr.bf16.mxu1 %v3322_v21  ;;  %v591_v62 = vld [vmem:[%s7926_s1 + $0x650] sm:$0xff]  ;;  %v600_v63 = vld [vmem:[%s7926_s1 + $0x698] sm:$0xff] }
  0x2f   : > { %3263 = vmatprep.subr.bf16.mxu0 %v3262_v30  ;;  %v394_v30 = vld [vmem:[%s7926_s1 + $0x28] sm:$0xff]  ;;  %v3284_v38 = vpack.c.bf16 %v637_v29, %v629_v28  ;;  %v608_v0 = vld [vmem:[%s7926_s1 + $0x6d8] sm:$0xff]  ;;  %v425_v4 = vld [vmem:[%s7926_s1 + $0x120] sm:$0xff]  ;;  %v3336_v7 = vpack.c.bf16 %v591_v62, %v583_v61 }
  0x30   : > { %v3350_v39 = vpack.c.bf16 %v402_v32, %v394_v30  ;;  %v433_v5 = vld [vmem:[%s7926_s1 + $0x160] sm:$0xff]  ;;  %v442_v6 = vld [vmem:[%s7926_s1 + $0x1a8] sm:$0xff]  ;;  %v3338_v9 = vpack.c.bf16 %v608_v0, %v600_v63  ;;  %v599_v10 = vld [vmem:[%s7926_s1 + $0x690] sm:$0xff] }
  0x31   : > { %3325 = vmatpush1.bf16.msra.mxu1 %v3324_v31  ;;  %v450_v8 = vld [vmem:[%s7926_s1 + $0x1e8] sm:$0xff]  ;;  %v607_v11 = vld [vmem:[%s7926_s1 + $0x6d0] sm:$0xff]  ;;  %v616_v12 = vld [vmem:[%s7926_s1 + $0x718] sm:$0xff] }
  0x32   : > { %3265 = vmatpush1.bf16.msra.mxu0 %v3264_v41  ;;  %v401_v41 = vld [vmem:[%s7926_s1 + $0x60] sm:$0xff]  ;;  %3327 = vmatprep.subr.bf16.mxu1 %v3326_v33  ;;  %v624_v13 = vld [vmem:[%s7926_s1 + $0x758] sm:$0xff]  ;;  %v458_v18 = vld [vmem:[%s7926_s1 + $0x228] sm:$0xff]  ;;  %v3340_v19 = vpack.c.bf16 %v607_v11, %v599_v10 }
  0x33   : > { %3267 = vmatprep.subr.bf16.mxu0 %v3266_v42  ;;  %v410_v42 = vld [vmem:[%s7926_s1 + $0xa8] sm:$0xff]  ;;  %v3352_v52 = vpack.c.bf16 %v401_v41, %v393_v40  ;;  %v441_v16 = vld [vmem:[%s7926_s1 + $0x1a0] sm:$0xff]  ;;  %v3342_v21 = vpack.c.bf16 %v624_v13, %v616_v12  ;;  %v615_v22 = vld [vmem:[%s7926_s1 + $0x710] sm:$0xff] }
  0x34   : > { %v449_v17 = vld [vmem:[%s7926_s1 + $0x1e0] sm:$0xff]  ;;  %v466_v20 = vld [vmem:[%s7926_s1 + $0x268] sm:$0xff]  ;;  %v623_v23 = vld [vmem:[%s7926_s1 + $0x750] sm:$0xff] }
  0x35   : > { %3329 = vmatpush1.bf16.msra.mxu1 %v3328_v43  ;;  %v632_v24 = vld [vmem:[%s7926_s1 + $0x798] sm:$0xff]  ;;  %v457_v28 = vld [vmem:[%s7926_s1 + $0x220] sm:$0xff]  ;;  %v474_v30 = vld [vmem:[%s7926_s1 + $0x2a8] sm:$0xff]  ;;  %v3344_v31 = vpack.c.bf16 %v623_v23, %v615_v22 }
  0x36   : > { %3269 = vmatpush1.bf16.msra.mxu0 %v3268_v54  ;;  %v3354_v54 = vpack.c.bf16 %v418_v44, %v410_v42  ;;  %3331 = vmatprep.subr.bf16.mxu1 %v3330_v45  ;;  %v640_v25 = vld [vmem:[%s7926_s1 + $0x7d8] sm:$0xff]  ;;  %v465_v29 = vld [vmem:[%s7926_s1 + $0x260] sm:$0xff]  ;;  %v482_v32 = vld [vmem:[%s7926_s1 + $0x2e8] sm:$0xff] }
  0x37   : > { %3271 = vmatprep.subr.bf16.mxu0 %v3270_v55  ;;  %v417_v55 = vld [vmem:[%s7926_s1 + $0xe0] sm:$0xff]  ;;  %v3346_v33 = vpack.c.bf16 %v640_v25, %v632_v24  ;;  %v631_v34 = vld [vmem:[%s7926_s1 + $0x790] sm:$0xff]  ;;  %v396_v36 = vld [vmem:[%s7926_s1 + $0x38] sm:$0xff] }
  0x38   : > { %v3356_v1 = vpack.c.bf16 %v417_v55, %v409_v53  ;;  %v639_v35 = vld [vmem:[%s7926_s1 + $0x7d0] sm:$0xff]  ;;  %v404_v37 = vld [vmem:[%s7926_s1 + $0x78] sm:$0xff]  ;;  %v473_v40 = vld [vmem:[%s7926_s1 + $0x2a0] sm:$0xff] }
  0x39   : > { %3333 = vmatpush1.bf16.msra.mxu1 %v3332_v57  ;;  %v481_v41 = vld [vmem:[%s7926_s1 + $0x2e0] sm:$0xff]  ;;  %v490_v42 = vld [vmem:[%s7926_s1 + $0x328] sm:$0xff]  ;;  %v3348_v43 = vpack.c.bf16 %v639_v35, %v631_v34  ;;  %v3414_v45 = vpack.c.bf16 %v404_v37, %v396_v36  ;;  %v395_v46 = vld [vmem:[%s7926_s1 + $0x30] sm:$0xff] }
  0x3a   : > { %3273 = vmatpush1.bf16.msra.mxu0 %v3272_v2  ;;  %v4869_v2 = vld [vmem:[%s4547_s23 + $0x10] sm:$0xff]  ;;  %3335 = vmatprep.subr.bf16.mxu1 %v3334_v60  ;;  %v498_v44 = vld [vmem:[%s7926_s1 + $0x368] sm:$0xff]  ;;  %v412_v49 = vld [vmem:[%s7926_s1 + $0xb8] sm:$0xff] }
  0x3b   : > { %3275 = vmatprep.subr.bf16.mxu0 %v3274_v3  ;;  %v3358_v3 = vpack.c.bf16 %v434_v59, %v426_v56  ;;  %v403_v47 = vld [vmem:[%s7926_s1 + $0x70] sm:$0xff]  ;;  %v420_v50 = vld [vmem:[%s7926_s1 + $0xf8] sm:$0xff]  ;;  %v3374_v53 = vpack.c.bf16 %v498_v44, %v490_v42  ;;  %v497_v55 = vld [vmem:[%s7926_s1 + $0x360] sm:$0xff] }
  0x3c   : > { %v506_v56 = vld [vmem:[%s7926_s1 + $0x3a8] sm:$0xff]  ;;  %v3416_v57 = vpack.c.bf16 %v403_v47, %v395_v46  ;;  %v3418_v60 = vpack.c.bf16 %v420_v50, %v412_v49  ;;  %v411_v61 = vld [vmem:[%s7926_s1 + $0xb0] sm:$0xff]  ;;  %v428_v63 = vld [vmem:[%s7926_s1 + $0x138] sm:$0xff] }
  0x3d   : > { %3337 = vmatpush1.bf16.msra.mxu1 %v3336_v7  ;;  %v514_v59 = vld [vmem:[%s7926_s1 + $0x3e8] sm:$0xff]  ;;  %v419_v62 = vld [vmem:[%s7926_s1 + $0xf0] sm:$0xff]  ;;  %v436_v0 = vld [vmem:[%s7926_s1 + $0x178] sm:$0xff] }
  0x3e   : > { %3277 = vmatpush1.bf16.msra.mxu0 %v3276_v14  ;;  %v3360_v14 = vpack.c.bf16 %v433_v5, %v425_v4  ;;  %3339 = vmatprep.subr.bf16.mxu1 %v3338_v9  ;;  %v505_v4 = vld [vmem:[%s7926_s1 + $0x3a0] sm:$0xff]  ;;  %v3420_v7 = vpack.c.bf16 %v419_v62, %v411_v61  ;;  %v3422_v9 = vpack.c.bf16 %v436_v0, %v428_v63  ;;  %v427_v10 = vld [vmem:[%s7926_s1 + $0x130] sm:$0xff]  ;;  %v444_v12 = vld [vmem:[%s7926_s1 + $0x1b8] sm:$0xff] }
  0x3f   : > { %3279 = vmatprep.subr.bf16.mxu0 %v3278_v15  ;;  %v3362_v15 = vpack.c.bf16 %v450_v8, %v442_v6  ;;  %v513_v5 = vld [vmem:[%s7926_s1 + $0x3e0] sm:$0xff]  ;;  %v522_v6 = vld [vmem:[%s7926_s1 + $0x428] sm:$0xff]  ;;  %v435_v11 = vld [vmem:[%s7926_s1 + $0x170] sm:$0xff] }
  0x40   : > { %v530_v8 = vld [vmem:[%s7926_s1 + $0x468] sm:$0xff]  ;;  %v452_v13 = vld [vmem:[%s7926_s1 + $0x1f8] sm:$0xff]  ;;  %v443_v22 = vld [vmem:[%s7926_s1 + $0x1b0] sm:$0xff] }
  0x41   : > { %3341 = vmatpush1.bf16.msra.mxu1 %v3340_v19  ;;  %v3424_v19 = vpack.c.bf16 %v435_v11, %v427_v10  ;;  %v451_v23 = vld [vmem:[%s7926_s1 + $0x1f0] sm:$0xff]  ;;  %v460_v24 = vld [vmem:[%s7926_s1 + $0x238] sm:$0xff] }
  0x42   : > { %3281 = vmatpush1.bf16.msra.mxu0 %v3280_v26  ;;  %v3364_v26 = vpack.c.bf16 %v449_v17, %v441_v16  ;;  %3343 = vmatprep.subr.bf16.mxu1 %v3342_v21  ;;  %v521_v16 = vld [vmem:[%s7926_s1 + $0x420] sm:$0xff]  ;;  %v3426_v21 = vpack.c.bf16 %v452_v13, %v444_v12  ;;  %v468_v25 = vld [vmem:[%s7926_s1 + $0x278] sm:$0xff]  ;;  %v467_v34 = vld [vmem:[%s7926_s1 + $0x270] sm:$0xff] }
  0x43   : > { %3283 = vmatprep.subr.bf16.mxu0 %v3282_v27  ;;  %v3366_v27 = vpack.c.bf16 %v466_v20, %v458_v18  ;;  %v529_v17 = vld [vmem:[%s7926_s1 + $0x460] sm:$0xff]  ;;  %v538_v18 = vld [vmem:[%s7926_s1 + $0x4a8] sm:$0xff]  ;;  %v476_v35 = vld [vmem:[%s7926_s1 + $0x2b8] sm:$0xff] }
  0x44   : > { %v546_v20 = vld [vmem:[%s7926_s1 + $0x4e8] sm:$0xff]  ;;  %v484_v36 = vld [vmem:[%s7926_s1 + $0x2f8] sm:$0xff]  ;;  %v483_v46 = vld [vmem:[%s7926_s1 + $0x2f0] sm:$0xff] }
  0x45   : > { %3345 = vmatpush1.bf16.msra.mxu1 %v3344_v31  ;;  %v562_v31 = vld [vmem:[%s7926_s1 + $0x568] sm:$0xff]  ;;  %v3434_v44 = vpack.c.bf16 %v484_v36, %v476_v35  ;;  %v492_v47 = vld [vmem:[%s7926_s1 + $0x338] sm:$0xff]  ;;  %v499_v61 = vld [vmem:[%s7926_s1 + $0x370] sm:$0xff] }
  0x46   : > { %3285 = vmatpush1.bf16.msra.mxu0 %v3284_v38  ;;  %v3368_v38 = vpack.c.bf16 %v465_v29, %v457_v28  ;;  %3347 = vmatprep.subr.bf16.mxu1 %v3346_v33  ;;  %v537_v28 = vld [vmem:[%s7926_s1 + $0x4a0] sm:$0xff]  ;;  %v554_v29 = vld [vmem:[%s7926_s1 + $0x528] sm:$0xff]  ;;  %v459_v33 = vld [vmem:[%s7926_s1 + $0x230] sm:$0xff] }
  0x47   : > { %3351 = vmatprep.subr.bf16.mxu0 %v3350_v39  ;;  %v3370_v39 = vpack.c.bf16 %v482_v32, %v474_v30  ;;  %v3428_v30 = vpack.c.bf16 %v451_v23, %v443_v22  ;;  %v3430_v32 = vpack.c.bf16 %v468_v25, %v460_v24  ;;  %v3432_v42 = vpack.c.bf16 %v467_v34, %v459_v33  ;;  %v500_v49 = vld [vmem:[%s7926_s1 + $0x378] sm:$0xff]  ;;  %v515_v10 = vld [vmem:[%s7926_s1 + $0x3f0] sm:$0xff] }
  0x48   : > { %v508_v62 = vld [vmem:[%s7926_s1 + $0x3b8] sm:$0xff]  ;;  %v531_v22 = vld [vmem:[%s7926_s1 + $0x470] sm:$0xff] }
  0x49   : > { %752 = vmatmul.mubr.f32.vlgmr.msra.gmra.mrb[0].mxu0 %v4837_v51  ;;  %3349 = vmatpush1.bf16.msra.mxu1 %v3348_v43  ;;  %v578_v43 = vld [vmem:[%s7926_s1 + $0x5e8] sm:$0xff]  ;;  %v516_v63 = vld [vmem:[%s7926_s1 + $0x3f8] sm:$0xff]  ;;  %v547_v33 = vld [vmem:[%s7926_s1 + $0x4f0] sm:$0xff] }
  0x4a   : > { %3353 = vmatpush1.bf16.msra.mxu0 %v3352_v52  ;;  %757 = vmatprep.mubr.f32.mxu0 %v4849_v58  ;;  %v3372_v52 = vpack.c.bf16 %v481_v41, %v473_v40  ;;  %v561_v40 = vld [vmem:[%s7926_s1 + $0x560] sm:$0xff]  ;;  %v570_v41 = vld [vmem:[%s7926_s1 + $0x5a8] sm:$0xff]  ;;  %v524_v11 = vld [vmem:[%s7926_s1 + $0x438] sm:$0xff] }
  0x4b   : > { %3355 = vmatprep.subr.bf16.mxu0 %v3354_v54  ;;  %v489_v54 = vld [vmem:[%s7926_s1 + $0x320] sm:$0xff]  ;;  %3415 = vmatprep.subr.bf16.mxu1 %v3414_v45  ;;  %v475_v45 = vld [vmem:[%s7926_s1 + $0x2b0] sm:$0xff]  ;;  %v532_v12 = vld [vmem:[%s7926_s1 + $0x478] sm:$0xff] }
  0x4c   : > { %829 = vmatmul.mubr.f32.vlgmr.msra.gmra.mrb[0].mxu1 %v4837_v51  ;;  %v540_v23 = vld [vmem:[%s7926_s1 + $0x4b8] sm:$0xff] }
  0x4d   : > { %758 = vmatmul.mubr.f32.gmra.mrb[2].mxu0 %v4869_v2  ;;  %3417 = vmatpush1.bf16.msra.mxu1 %v3416_v57  ;;  %v594_v57 = vld [vmem:[%s7926_s1 + $0x668] sm:$0xff]  ;;  %v548_v24 = vld [vmem:[%s7926_s1 + $0x4f8] sm:$0xff] }
  0x4e   : > { %3357 = vmatpush1.bf16.msra.mxu0 %v3356_v1  ;;  %905 = vmatprep.mubr.f32.mxu0 %v4574_v48  ;;  %v3376_v1 = vpack.c.bf16 %v497_v55, %v489_v54  ;;  %v577_v54 = vld [vmem:[%s7926_s1 + $0x5e0] sm:$0xff]  ;;  %v586_v55 = vld [vmem:[%s7926_s1 + $0x628] sm:$0xff]  ;;  %v556_v34 = vld [vmem:[%s7926_s1 + $0x538] sm:$0xff] }
  0x4f   : > { %3359 = vmatprep.subr.bf16.mxu0 %v3358_v3  ;;  %v3378_v3 = vpack.c.bf16 %v514_v59, %v506_v56  ;;  %3419 = vmatprep.subr.bf16.mxu1 %v3418_v60  ;;  %v3436_v56 = vpack.c.bf16 %v483_v46, %v475_v45  ;;  %v3438_v59 = vpack.c.bf16 %v500_v49, %v492_v47  ;;  %v491_v60 = vld [vmem:[%s7926_s1 + $0x330] sm:$0xff]  ;;  %v564_v35 = vld [vmem:[%s7926_s1 + $0x578] sm:$0xff]  ;;  %v1008_v45 = vld [vmem:[%s7928_s3 + $0x28] sm:$0xff] }
  0x50   : > { %834 = vmatprep.mubr.f32.mxu1 %v4849_v58  ;;  %v572_v46 = vld [vmem:[%s7926_s1 + $0x5b8] sm:$0xff] }
  0x51   : > { %835 = vmatmul.mubr.f32.gmra.mrb[2].mxu1 %v4869_v2  ;;  %v580_v47 = vld [vmem:[%s7926_s1 + $0x5f8] sm:$0xff] }
  0x52   : > { %3361 = vmatpush1.bf16.msra.mxu0 %v3360_v14  ;;  %v3380_v14 = vpack.c.bf16 %v513_v5, %v505_v4  ;;  %3421 = vmatpush1.bf16.msra.mxu1 %v3420_v7  ;;  %v593_v4 = vld [vmem:[%s7926_s1 + $0x660] sm:$0xff]  ;;  %v602_v5 = vld [vmem:[%s7926_s1 + $0x6a8] sm:$0xff] }
  0x53   : > { %3363 = vmatprep.subr.bf16.mxu0 %v3362_v15  ;;  %v3382_v15 = vpack.c.bf16 %v530_v8, %v522_v6  ;;  %3423 = vmatprep.subr.bf16.mxu1 %v3422_v9  ;;  %v3440_v6 = vpack.c.bf16 %v499_v61, %v491_v60  ;;  %v610_v7 = vld [vmem:[%s7926_s1 + $0x6e8] sm:$0xff]  ;;  %v3442_v8 = vpack.c.bf16 %v516_v63, %v508_v62  ;;  %v507_v9 = vld [vmem:[%s7926_s1 + $0x3b0] sm:$0xff]  ;;  %v588_v61 = vld [vmem:[%s7926_s1 + $0x638] sm:$0xff] }
  0x54   : > { %982 = vmatprep.mubr.f32.mxu1 %v4574_v48  ;;  %v545_v48 = vld [vmem:[%s7926_s1 + $0x4e0] sm:$0xff]  ;;  %v1016_v60 = vld [vmem:[%s7928_s3 + $0x68] sm:$0xff]  ;;  %v596_v62 = vld [vmem:[%s7926_s1 + $0x678] sm:$0xff] }
  0x55   : > { %v3388_v37 = vpack.c.bf16 %v545_v48, %v537_v28  ;;  %v625_v28 = vld [vmem:[%s7926_s1 + $0x760] sm:$0xff]  ;;  %v634_v48 = vld [vmem:[%s7926_s1 + $0x7a8] sm:$0xff] }
  0x56   : > { %3365 = vmatpush1.bf16.msra.mxu0 %v3364_v26  ;;  %v3384_v26 = vpack.c.bf16 %v529_v17, %v521_v16  ;;  %3425 = vmatpush1.bf16.msra.mxu1 %v3424_v19  ;;  %v609_v16 = vld [vmem:[%s7926_s1 + $0x6e0] sm:$0xff]  ;;  %v618_v17 = vld [vmem:[%s7926_s1 + $0x728] sm:$0xff] }
  0x57   : > { %3367 = vmatprep.subr.bf16.mxu0 %v3366_v27  ;;  %v3386_v27 = vpack.c.bf16 %v546_v20, %v538_v18  ;;  %3427 = vmatprep.subr.bf16.mxu1 %v3426_v21  ;;  %v3444_v18 = vpack.c.bf16 %v515_v10, %v507_v9  ;;  %v626_v19 = vld [vmem:[%s7926_s1 + $0x768] sm:$0xff]  ;;  %v3446_v20 = vpack.c.bf16 %v532_v12, %v524_v11  ;;  %v523_v21 = vld [vmem:[%s7926_s1 + $0x430] sm:$0xff]  ;;  %v604_v10 = vld [vmem:[%s7926_s1 + $0x6b8] sm:$0xff] }
  0x58   : > { %v1024_v9 = vld [vmem:[%s7928_s3 + $0xa8] sm:$0xff]  ;;  %v612_v11 = vld [vmem:[%s7926_s1 + $0x6f8] sm:$0xff] }
  0x5a   : > { %3369 = vmatpush1.bf16.msra.mxu0 %v3368_v38  ;;  %v3390_v38 = vpack.c.bf16 %v562_v31, %v554_v29  ;;  %3429 = vmatpush1.bf16.msra.mxu1 %v3428_v30  ;;  %v3448_v29 = vpack.c.bf16 %v531_v22, %v523_v21  ;;  %v642_v30 = vld [vmem:[%s7926_s1 + $0x7e8] sm:$0xff]  ;;  %v3450_v31 = vpack.c.bf16 %v548_v24, %v540_v23  ;;  %v620_v22 = vld [vmem:[%s7926_s1 + $0x738] sm:$0xff] }
  0x5b   : > { %3371 = vmatprep.subr.bf16.mxu0 %v3370_v39  ;;  %v553_v39 = vld [vmem:[%s7926_s1 + $0x520] sm:$0xff]  ;;  %3431 = vmatprep.subr.bf16.mxu1 %v3430_v32  ;;  %v539_v32 = vld [vmem:[%s7926_s1 + $0x4b0] sm:$0xff]  ;;  %v1032_v21 = vld [vmem:[%s7928_s3 + $0xe8] sm:$0xff] }
  0x5c   : > { %v3392_v50 = vpack.c.bf16 %v561_v40, %v553_v39  ;;  %v641_v39 = vld [vmem:[%s7926_s1 + $0x7e0] sm:$0xff]  ;;  %v3452_v40 = vpack.c.bf16 %v547_v33, %v539_v32  ;;  %v628_v23 = vld [vmem:[%s7926_s1 + $0x778] sm:$0xff]  ;;  %v1040_v32 = vld [vmem:[%s7928_s3 + $0x128] sm:$0xff] }
  0x5d   : > { %v636_v33 = vld [vmem:[%s7926_s1 + $0x7b8] sm:$0xff] }
  0x5e   : > { %3373 = vmatpush1.bf16.msra.mxu0 %v3372_v52  ;;  %v3394_v52 = vpack.c.bf16 %v578_v43, %v570_v41  ;;  %3433 = vmatpush1.bf16.msra.mxu1 %v3432_v42  ;;  %v555_v41 = vld [vmem:[%s7926_s1 + $0x530] sm:$0xff]  ;;  %v3454_v42 = vpack.c.bf16 %v564_v35, %v556_v34  ;;  %v644_v34 = vld [vmem:[%s7926_s1 + $0x7f8] sm:$0xff] }
  0x5f   : > { %3375 = vmatprep.subr.bf16.mxu0 %v3374_v53  ;;  %v569_v53 = vld [vmem:[%s7926_s1 + $0x5a0] sm:$0xff]  ;;  %3435 = vmatprep.subr.bf16.mxu1 %v3434_v44  ;;  %v563_v43 = vld [vmem:[%s7926_s1 + $0x570] sm:$0xff]  ;;  %v1004_v44 = vld [vmem:[%s7928_s3 + $0x8] sm:$0xff] }
  0x60   : > { %v3396_v0 = vpack.c.bf16 %v577_v54, %v569_v53  ;;  %v3478_v53 = vpack.c.bf16 %v1008_v45, %v1004_v44  ;;  %v1003_v54 = vld [vmem:[%s7928_s3] sm:$0xff]  ;;  %v1048_v44 = vld [vmem:[%s7928_s3 + $0x168] sm:$0xff]  ;;  %v1006_v45 = vld [vmem:[%s7928_s3 + $0x18] sm:$0xff] }
  0x62   : > { %3377 = vmatpush1.bf16.msra.mxu0 %v3376_v1  ;;  %v3398_v1 = vpack.c.bf16 %v594_v57, %v586_v55  ;;  %3437 = vmatpush1.bf16.msra.mxu1 %v3436_v56  ;;  %v1007_v55 = vld [vmem:[%s7928_s3 + $0x20] sm:$0xff]  ;;  %v3458_v56 = vpack.c.bf16 %v580_v47, %v572_v46  ;;  %v579_v57 = vld [vmem:[%s7926_s1 + $0x5f0] sm:$0xff]  ;;  %v1010_v46 = vld [vmem:[%s7928_s3 + $0x38] sm:$0xff] }
  0x63   : > { %3379 = vmatprep.subr.bf16.mxu0 %v3378_v3  ;;  %v585_v3 = vld [vmem:[%s7926_s1 + $0x620] sm:$0xff]  ;;  %3439 = vmatprep.subr.bf16.mxu1 %v3438_v59  ;;  %v1012_v59 = vld [vmem:[%s7928_s3 + $0x48] sm:$0xff]  ;;  %v3480_v63 = vpack.c.bf16 %v1007_v55, %v1003_v54  ;;  %v3606_v54 = vpack.c.bf16 %v1010_v46, %v1006_v45  ;;  %v1005_v55 = vld [vmem:[%s7928_s3 + $0x10] sm:$0xff] }
  0x64   : > { %v3400_v13 = vpack.c.bf16 %v593_v4, %v585_v3  ;;  %v3482_v3 = vpack.c.bf16 %v1016_v60, %v1012_v59  ;;  %v1011_v4 = vld [vmem:[%s7928_s3 + $0x40] sm:$0xff]  ;;  %v1018_v59 = vld [vmem:[%s7928_s3 + $0x78] sm:$0xff]  ;;  %v1052_v60 = vld [vmem:[%s7928_s3 + $0x188] sm:$0xff] }
  0x65   : > { %v1045_v45 = vld [vmem:[%s7928_s3 + $0x150] sm:$0xff] }
  0x66   : > { %3381 = vmatpush1.bf16.msra.mxu0 %v3380_v14  ;;  %v3402_v14 = vpack.c.bf16 %v610_v7, %v602_v5  ;;  %3441 = vmatpush1.bf16.msra.mxu1 %v3440_v6  ;;  %v1015_v5 = vld [vmem:[%s7928_s3 + $0x60] sm:$0xff]  ;;  %v3462_v6 = vpack.c.bf16 %v596_v62, %v588_v61  ;;  %v595_v7 = vld [vmem:[%s7926_s1 + $0x670] sm:$0xff]  ;;  %v1056_v61 = vld [vmem:[%s7928_s3 + $0x1a8] sm:$0xff] }
  0x67   : > { %3383 = vmatprep.subr.bf16.mxu0 %v3382_v15  ;;  %v601_v15 = vld [vmem:[%s7926_s1 + $0x6a0] sm:$0xff]  ;;  %3443 = vmatprep.subr.bf16.mxu1 %v3442_v8  ;;  %v1020_v8 = vld [vmem:[%s7928_s3 + $0x88] sm:$0xff]  ;;  %v3484_v12 = vpack.c.bf16 %v1015_v5, %v1011_v4  ;;  %v1017_v5 = vld [vmem:[%s7928_s3 + $0x70] sm:$0xff] }
  0x68   : > { %v3404_v25 = vpack.c.bf16 %v609_v16, %v601_v15  ;;  %v3486_v15 = vpack.c.bf16 %v1024_v9, %v1020_v8  ;;  %v1019_v16 = vld [vmem:[%s7928_s3 + $0x80] sm:$0xff]  ;;  %v1064_v8 = vld [vmem:[%s7928_s3 + $0x1e8] sm:$0xff]  ;;  %v1022_v9 = vld [vmem:[%s7928_s3 + $0x98] sm:$0xff] }
  0x6a   : > { %3385 = vmatpush1.bf16.msra.mxu0 %v3384_v26  ;;  %v3406_v26 = vpack.c.bf16 %v626_v19, %v618_v17  ;;  %3445 = vmatpush1.bf16.msra.mxu1 %v3444_v18  ;;  %v1023_v17 = vld [vmem:[%s7928_s3 + $0xa0] sm:$0xff]  ;;  %v3466_v18 = vpack.c.bf16 %v612_v11, %v604_v10  ;;  %v611_v19 = vld [vmem:[%s7926_s1 + $0x6f0] sm:$0xff]  ;;  %v1026_v10 = vld [vmem:[%s7928_s3 + $0xb8] sm:$0xff] }
  0x6b   : > { %3387 = vmatprep.subr.bf16.mxu0 %v3386_v27  ;;  %v617_v27 = vld [vmem:[%s7926_s1 + $0x720] sm:$0xff]  ;;  %3447 = vmatprep.subr.bf16.mxu1 %v3446_v20  ;;  %v1028_v20 = vld [vmem:[%s7928_s3 + $0xc8] sm:$0xff]  ;;  %v3488_v24 = vpack.c.bf16 %v1023_v17, %v1019_v16 }
  0x6c   : > { %v3408_v36 = vpack.c.bf16 %v625_v28, %v617_v27  ;;  %v3490_v27 = vpack.c.bf16 %v1032_v21, %v1028_v20  ;;  %v1027_v28 = vld [vmem:[%s7928_s3 + $0xc0] sm:$0xff]  ;;  %v1068_v17 = vld [vmem:[%s7928_s3 + $0x208] sm:$0xff]  ;;  %v1034_v20 = vld [vmem:[%s7928_s3 + $0xf8] sm:$0xff] }
  0x6d   : > { %v1063_v16 = vld [vmem:[%s7928_s3 + $0x1e0] sm:$0xff] }
  0x6e   : > { %3389 = vmatpush1.bf16.msra.mxu0 %v3388_v37  ;;  %v3410_v37 = vpack.c.bf16 %v642_v30, %v634_v48  ;;  %3449 = vmatpush1.bf16.msra.mxu1 %v3448_v29  ;;  %v1031_v48 = vld [vmem:[%s7928_s3 + $0xe0] sm:$0xff]  ;;  %v3470_v29 = vpack.c.bf16 %v628_v23, %v620_v22  ;;  %v627_v30 = vld [vmem:[%s7926_s1 + $0x770] sm:$0xff] }
  0x6f   : > { %3391 = vmatprep.subr.bf16.mxu0 %v3390_v38  ;;  %v633_v38 = vld [vmem:[%s7926_s1 + $0x7a0] sm:$0xff]  ;;  %3451 = vmatprep.subr.bf16.mxu1 %v3450_v31  ;;  %v1036_v31 = vld [vmem:[%s7928_s3 + $0x108] sm:$0xff]  ;;  %v3492_v35 = vpack.c.bf16 %v1031_v48, %v1027_v28  ;;  %v1029_v23 = vld [vmem:[%s7928_s3 + $0xd0] sm:$0xff] }
  0x70   : > { %v3412_v49 = vpack.c.bf16 %v641_v39, %v633_v38  ;;  %v3494_v38 = vpack.c.bf16 %v1040_v32, %v1036_v31  ;;  %v1035_v39 = vld [vmem:[%s7928_s3 + $0x100] sm:$0xff]  ;;  %v1076_v28 = vld [vmem:[%s7928_s3 + $0x248] sm:$0xff] }
  0x71   : > { %v1080_v48 = vld [vmem:[%s7928_s3 + $0x268] sm:$0xff] }
  0x72   : > { %3393 = vmatpush1.bf16.msra.mxu0 %v3392_v50  ;;  %3453 = vmatpush1.bf16.msra.mxu1 %v3452_v40  ;;  %v3456_v50 = vpack.c.bf16 %v563_v43, %v555_v41  ;;  %v1039_v40 = vld [vmem:[%s7928_s3 + $0x120] sm:$0xff]  ;;  %v3474_v41 = vpack.c.bf16 %v644_v34, %v636_v33  ;;  %v1044_v43 = vld [vmem:[%s7928_s3 + $0x148] sm:$0xff]  ;;  %v1037_v33 = vld [vmem:[%s7928_s3 + $0x110] sm:$0xff]  ;;  %v3514_v34 = vpack.c.bf16 %v1080_v48, %v1076_v28 }
  0x73   : > { %3395 = vmatprep.subr.bf16.mxu0 %v3394_v52  ;;  %v571_v52 = vld [vmem:[%s7926_s1 + $0x5b0] sm:$0xff]  ;;  %3455 = vmatprep.subr.bf16.mxu1 %v3454_v42  ;;  %v3496_v47 = vpack.c.bf16 %v1039_v40, %v1035_v39  ;;  %v1084_v39 = vld [vmem:[%s7928_s3 + $0x288] sm:$0xff] }
  0x74   : > { %v643_v42 = vld [vmem:[%s7926_s1 + $0x7f0] sm:$0xff]  ;;  %v1088_v40 = vld [vmem:[%s7928_s3 + $0x2a8] sm:$0xff] }
  0x75   : > { %v3518_v46 = vpack.c.bf16 %v1088_v40, %v1084_v39  ;;  %v1085_v40 = vld [vmem:[%s7928_s3 + $0x290] sm:$0xff] }
  0x76   : > { %3397 = vmatpush1.bf16.msra.mxu0 %v3396_v0  ;;  %3457 = vmatpush1.bf16.msra.mxu1 %v3456_v50  ;;  %v3460_v0 = vpack.c.bf16 %v579_v57, %v571_v52  ;;  %v3498_v50 = vpack.c.bf16 %v1048_v44, %v1044_v43  ;;  %v1043_v52 = vld [vmem:[%s7928_s3 + $0x140] sm:$0xff]  ;;  %v1014_v57 = vld [vmem:[%s7928_s3 + $0x58] sm:$0xff] }
  0x77   : > { %3399 = vmatprep.subr.bf16.mxu0 %v3398_v1  ;;  %v587_v1 = vld [vmem:[%s7926_s1 + $0x630] sm:$0xff]  ;;  %3459 = vmatprep.subr.bf16.mxu1 %v3458_v56  ;;  %v3610_v4 = vpack.c.bf16 %v1018_v59, %v1014_v57 }
  0x78   : > { %v1009_v56 = vld [vmem:[%s7928_s3 + $0x30] sm:$0xff] }
  0x7a   : > { %3401 = vmatpush1.bf16.msra.mxu0 %v3400_v13  ;;  %3461 = vmatpush1.bf16.msra.mxu1 %v3460_v0  ;;  %v3464_v13 = vpack.c.bf16 %v595_v7, %v587_v1  ;;  %v1013_v0 = vld [vmem:[%s7928_s3 + $0x50] sm:$0xff]  ;;  %v1051_v1 = vld [vmem:[%s7928_s3 + $0x180] sm:$0xff]  ;;  %v1060_v7 = vld [vmem:[%s7928_s3 + $0x1c8] sm:$0xff] }
  0x7b   : > { %3403 = vmatprep.subr.bf16.mxu0 %v3402_v14  ;;  %v603_v14 = vld [vmem:[%s7926_s1 + $0x6b0] sm:$0xff]  ;;  %3463 = vmatprep.subr.bf16.mxu1 %v3462_v6  ;;  %v3502_v6 = vpack.c.bf16 %v1056_v61, %v1052_v60 }
  0x7c   : > { %v1053_v60 = vld [vmem:[%s7928_s3 + $0x190] sm:$0xff] }
  0x7e   : > { %3405 = vmatpush1.bf16.msra.mxu0 %v3404_v25  ;;  %3465 = vmatpush1.bf16.msra.mxu1 %v3464_v13  ;;  %v3468_v25 = vpack.c.bf16 %v611_v19, %v603_v14  ;;  %v1021_v13 = vld [vmem:[%s7928_s3 + $0x90] sm:$0xff]  ;;  %v3506_v14 = vpack.c.bf16 %v1064_v8, %v1060_v7  ;;  %v1030_v19 = vld [vmem:[%s7928_s3 + $0xd8] sm:$0xff] }
  0x7f   : > { %3407 = vmatprep.subr.bf16.mxu0 %v3406_v26  ;;  %v619_v26 = vld [vmem:[%s7926_s1 + $0x730] sm:$0xff]  ;;  %3467 = vmatprep.subr.bf16.mxu1 %v3466_v18  ;;  %v1072_v18 = vld [vmem:[%s7928_s3 + $0x228] sm:$0xff] }
  0x82   : > { %3409 = vmatpush1.bf16.msra.mxu0 %v3408_v36  ;;  %3469 = vmatpush1.bf16.msra.mxu1 %v3468_v25  ;;  %v3472_v36 = vpack.c.bf16 %v627_v30, %v619_v26  ;;  %v1067_v25 = vld [vmem:[%s7928_s3 + $0x200] sm:$0xff]  ;;  %v1042_v30 = vld [vmem:[%s7928_s3 + $0x138] sm:$0xff] }
  0x83   : > { %3411 = vmatprep.subr.bf16.mxu0 %v3410_v37  ;;  %v635_v37 = vld [vmem:[%s7926_s1 + $0x7b0] sm:$0xff]  ;;  %3471 = vmatprep.subr.bf16.mxu1 %v3470_v29  ;;  %v1071_v26 = vld [vmem:[%s7928_s3 + $0x220] sm:$0xff]  ;;  %v1038_v29 = vld [vmem:[%s7928_s3 + $0x118] sm:$0xff] }
  0x84   : > { %v3512_v31 = vpack.c.bf16 %v1071_v26, %v1067_v25  ;;  %v1116_v25 = vld [vmem:[%s7928_s3 + $0x388] sm:$0xff] }
  0x85   : > { %v1120_v26 = vld [vmem:[%s7928_s3 + $0x3a8] sm:$0xff] }
  0x86   : > { %3413 = vmatpush1.bf16.msra.mxu0 %v3412_v49  ;;  %3473 = vmatpush1.bf16.msra.mxu1 %v3472_v36  ;;  %v3476_v49 = vpack.c.bf16 %v643_v42, %v635_v37  ;;  %v1079_v36 = vld [vmem:[%s7928_s3 + $0x260] sm:$0xff]  ;;  %v3622_v37 = vpack.c.bf16 %v1042_v30, %v1038_v29  ;;  %v1050_v42 = vld [vmem:[%s7928_s3 + $0x178] sm:$0xff]  ;;  %v3534_v29 = vpack.c.bf16 %v1120_v26, %v1116_v25 }
  0x87   : > { %3479 = vmatprep.subr.bf16.mxu0 %v3478_v53  ;;  %v1047_v53 = vld [vmem:[%s7928_s3 + $0x160] sm:$0xff]  ;;  %3475 = vmatprep.subr.bf16.mxu1 %v3474_v41  ;;  %v1046_v41 = vld [vmem:[%s7928_s3 + $0x158] sm:$0xff] }
  0x88   : > { %v3500_v62 = vpack.c.bf16 %v1047_v53, %v1043_v52  ;;  %v1049_v52 = vld [vmem:[%s7928_s3 + $0x170] sm:$0xff]  ;;  %v1092_v53 = vld [vmem:[%s7928_s3 + $0x2c8] sm:$0xff]  ;;  %v1115_v30 = vld [vmem:[%s7928_s3 + $0x380] sm:$0xff] }
  0x89   : > { %906 = vmatmul.mubr.f32.vlgmr.msra.gmra.mrb[4].mxu0 %v4837_v51  ;;  %v3628_v59 = vpack.c.bf16 %v1049_v52, %v1045_v45  ;;  %v5669_v26 = vld [vmem:[%s7927_s2] sm:$0xff] }
  0x8a   : > { %911 = vmatprep.mubr.f32.mxu0 %v4849_v58  ;;  %3481 = vmatpush1.bf16.msra.mxu0 %v3480_v63  ;;  %v3608_v63 = vpack.c.bf16 %v1009_v56, %v1005_v55  ;;  %v1054_v55 = vld [vmem:[%s7928_s3 + $0x198] sm:$0xff] }
  0x8b   : > { %3483 = vmatprep.subr.bf16.mxu0 %v3482_v3  ;;  %3477 = vmatpush1.bf16.msra.mxu1 %v3476_v49  ;;  %v1055_v3 = vld [vmem:[%s7928_s3 + $0x1a0] sm:$0xff]  ;;  %v1058_v56 = vld [vmem:[%s7928_s3 + $0x1b8] sm:$0xff] }
  0x8c   : > { %3607 = vmatprep.subr.bf16.mxu1 %v3606_v54  ;;  %v3504_v11 = vpack.c.bf16 %v1055_v3, %v1051_v1  ;;  %v1087_v49 = vld [vmem:[%s7928_s3 + $0x2a0] sm:$0xff]  ;;  %v1096_v54 = vld [vmem:[%s7928_s3 + $0x2e8] sm:$0xff]  ;;  %v1057_v1 = vld [vmem:[%s7928_s3 + $0x1b0] sm:$0xff] }
  0x8d   : > { %912 = vmatmul.mubr.f32.gmra.mrb[6].mxu0 %v4869_v2  ;;  %v3522_v61 = vpack.c.bf16 %v1096_v54, %v1092_v53  ;;  %v1100_v3 = vld [vmem:[%s7928_s3 + $0x308] sm:$0xff]  ;;  %v3632_v8 = vpack.c.bf16 %v1057_v1, %v1053_v60  ;;  %v1101_v54 = vld [vmem:[%s7928_s3 + $0x310] sm:$0xff] }
  0x8e   : > { %3485 = vmatpush1.bf16.msra.mxu0 %v3484_v12  ;;  %983 = vmatmul.mubr.f32.vlgmr.msra.gmra.mrb[4].mxu1 %v4837_v51  ;;  %v3612_v12 = vpack.c.bf16 %v1017_v5, %v1013_v0  ;;  %v3614_v51 = vpack.c.bf16 %v1026_v10, %v1022_v9  ;;  %v3630_v0 = vpack.c.bf16 %v1058_v56, %v1054_v55  ;;  %v1062_v5 = vld [vmem:[%s7928_s3 + $0x1d8] sm:$0xff]  ;;  %v1061_v9 = vld [vmem:[%s7928_s3 + $0x1d0] sm:$0xff] }
  0x8f   : > { %3487 = vmatprep.subr.bf16.mxu0 %v3486_v15  ;;  %988 = vmatprep.mubr.f32.mxu1 %v4849_v58  ;;  %v1059_v15 = vld [vmem:[%s7928_s3 + $0x1c0] sm:$0xff]  ;;  %v1025_v58 = vld [vmem:[%s7928_s3 + $0xb0] sm:$0xff]  ;;  %v1110_v56 = vld [vmem:[%s7928_s3 + $0x358] sm:$0xff] }
  0x90   : > { %3609 = vmatpush1.bf16.msra.mxu1 %v3608_v63  ;;  %v3508_v21 = vpack.c.bf16 %v1063_v16, %v1059_v15  ;;  %v3616_v22 = vpack.c.bf16 %v1025_v58, %v1021_v13  ;;  %v1095_v63 = vld [vmem:[%s7928_s3 + $0x2e0] sm:$0xff]  ;;  %v1108_v15 = vld [vmem:[%s7928_s3 + $0x348] sm:$0xff]  ;;  %v1074_v58 = vld [vmem:[%s7928_s3 + $0x238] sm:$0xff] }
  0x91   : > { %3611 = vmatprep.subr.bf16.mxu1 %v3610_v4  ;;  %v1104_v4 = vld [vmem:[%s7928_s3 + $0x328] sm:$0xff]  ;;  %v1105_v55 = vld [vmem:[%s7928_s3 + $0x330] sm:$0xff] }
  0x92   : > { %3489 = vmatpush1.bf16.msra.mxu0 %v3488_v24  ;;  %989 = vmatmul.mubr.f32.gmra.mrb[6].mxu1 %v4869_v2  ;;  %v3510_v24 = vpack.c.bf16 %v1072_v18, %v1068_v17  ;;  %v3618_v2 = vpack.c.bf16 %v1034_v20, %v1030_v19  ;;  %v3526_v10 = vpack.c.bf16 %v1104_v4, %v1100_v3  ;;  %v1112_v16 = vld [vmem:[%s7928_s3 + $0x368] sm:$0xff]  ;;  %v1069_v19 = vld [vmem:[%s7928_s3 + $0x210] sm:$0xff] }
  0x93   : > { %3491 = vmatprep.subr.bf16.mxu0 %v3490_v27  ;;  %v1033_v27 = vld [vmem:[%s7928_s3 + $0xf0] sm:$0xff]  ;;  %v3530_v20 = vpack.c.bf16 %v1112_v16, %v1108_v15 }
  0x94   : > { %3613 = vmatpush1.bf16.msra.mxu1 %v3612_v12  ;;  %v3620_v32 = vpack.c.bf16 %v1033_v27, %v1029_v23  ;;  %v1103_v12 = vld [vmem:[%s7928_s3 + $0x320] sm:$0xff]  ;;  %v1082_v27 = vld [vmem:[%s7928_s3 + $0x278] sm:$0xff]  ;;  %v1117_v4 = vld [vmem:[%s7928_s3 + $0x390] sm:$0xff] }
  0x95   : > { %3615 = vmatprep.subr.bf16.mxu1 %v3614_v51  ;;  %v1070_v51 = vld [vmem:[%s7928_s3 + $0x218] sm:$0xff]  ;;  %v1125_v16 = vld [vmem:[%s7928_s3 + $0x3d0] sm:$0xff] }
  0x96   : > { %3493 = vmatpush1.bf16.msra.mxu0 %v3492_v35  ;;  %v1075_v35 = vld [vmem:[%s7928_s3 + $0x240] sm:$0xff]  ;;  %v3638_v23 = vpack.c.bf16 %v1074_v58, %v1070_v51  ;;  %v1129_v51 = vld [vmem:[%s7928_s3 + $0x3f0] sm:$0xff] }
  0x97   : > { %3495 = vmatprep.subr.bf16.mxu0 %v3494_v38  ;;  %v1041_v38 = vld [vmem:[%s7928_s3 + $0x130] sm:$0xff]  ;;  %v3516_v43 = vpack.c.bf16 %v1079_v36, %v1075_v35  ;;  %v1086_v35 = vld [vmem:[%s7928_s3 + $0x298] sm:$0xff]  ;;  %v3668_v58 = vpack.c.bf16 %v1129_v51, %v1125_v16 }
  0x98   : > { %3617 = vmatpush1.bf16.msra.mxu1 %v3616_v22  ;;  %v3624_v44 = vpack.c.bf16 %v1041_v38, %v1037_v33  ;;  %v1111_v22 = vld [vmem:[%s7928_s3 + $0x360] sm:$0xff]  ;;  %v1077_v33 = vld [vmem:[%s7928_s3 + $0x250] sm:$0xff]  ;;  %v1090_v36 = vld [vmem:[%s7928_s3 + $0x2b8] sm:$0xff] }
  0x99   : > { %3619 = vmatprep.subr.bf16.mxu1 %v3618_v2  ;;  %v1078_v2 = vld [vmem:[%s7928_s3 + $0x258] sm:$0xff]  ;;  %v3646_v39 = vpack.c.bf16 %v1090_v36, %v1086_v35  ;;  %v1140_v35 = vld [vmem:[%s7928_s3 + $0x448] sm:$0xff] }
  0x9a   : > { %3497 = vmatpush1.bf16.msra.mxu0 %v3496_v47  ;;  %v1083_v47 = vld [vmem:[%s7928_s3 + $0x280] sm:$0xff] }
  0x9b   : > { %3499 = vmatprep.subr.bf16.mxu0 %v3498_v50  ;;  %v3626_v50 = vpack.c.bf16 %v1050_v42, %v1046_v41  ;;  %v3520_v57 = vpack.c.bf16 %v1087_v49, %v1083_v47  ;;  %v1089_v41 = vld [vmem:[%s7928_s3 + $0x2b0] sm:$0xff]  ;;  %v1094_v42 = vld [vmem:[%s7928_s3 + $0x2d8] sm:$0xff] }
  0x9c   : > { %3621 = vmatpush1.bf16.msra.mxu1 %v3620_v32  ;;  %v3642_v32 = vpack.c.bf16 %v1082_v27, %v1078_v2  ;;  %v1097_v47 = vld [vmem:[%s7928_s3 + $0x2f0] sm:$0xff]  ;;  %v1102_v49 = vld [vmem:[%s7928_s3 + $0x318] sm:$0xff] }
  0x9d   : > { %3623 = vmatprep.subr.bf16.mxu1 %v3622_v37 }
  0x9e   : > { %3501 = vmatpush1.bf16.msra.mxu0 %v3500_v62  ;;  %v1091_v62 = vld [vmem:[%s7928_s3 + $0x2c0] sm:$0xff] }
  0x9f   : > { %3503 = vmatprep.subr.bf16.mxu0 %v3502_v6  ;;  %v1066_v6 = vld [vmem:[%s7928_s3 + $0x1f8] sm:$0xff]  ;;  %v3524_v7 = vpack.c.bf16 %v1095_v63, %v1091_v62  ;;  %v1113_v62 = vld [vmem:[%s7928_s3 + $0x370] sm:$0xff] }
  0xa0   : > { %3625 = vmatpush1.bf16.msra.mxu1 %v3624_v44  ;;  %v3634_v13 = vpack.c.bf16 %v1066_v6, %v1062_v5  ;;  %v3648_v44 = vpack.c.bf16 %v1089_v41, %v1085_v40  ;;  %v1118_v63 = vld [vmem:[%s7928_s3 + $0x398] sm:$0xff]  ;;  %v1121_v5 = vld [vmem:[%s7928_s3 + $0x3b0] sm:$0xff] }
  0xa1   : > { %3627 = vmatprep.subr.bf16.mxu1 %v3626_v50  ;;  %v1106_v50 = vld [vmem:[%s7928_s3 + $0x338] sm:$0xff]  ;;  %v3664_v6 = vpack.c.bf16 %v1121_v5, %v1117_v4 }
  0xa2   : > { %3505 = vmatpush1.bf16.msra.mxu0 %v3504_v11  ;;  %v1099_v11 = vld [vmem:[%s7928_s3 + $0x300] sm:$0xff]  ;;  %v3654_v53 = vpack.c.bf16 %v1106_v50, %v1102_v49  ;;  %v1141_v50 = vld [vmem:[%s7928_s3 + $0x450] sm:$0xff] }
  0xa3   : > { %3507 = vmatprep.subr.bf16.mxu0 %v3506_v14  ;;  %v1065_v14 = vld [vmem:[%s7928_s3 + $0x1f0] sm:$0xff]  ;;  %v3528_v17 = vpack.c.bf16 %v1103_v12, %v1099_v11  ;;  %v1130_v11 = vld [vmem:[%s7928_s3 + $0x3f8] sm:$0xff]  ;;  %v1123_v12 = vld [vmem:[%s7928_s3 + $0x3c0] sm:$0xff] }
  0xa4   : > { %3629 = vmatpush1.bf16.msra.mxu1 %v3628_v59  ;;  %v3636_v18 = vpack.c.bf16 %v1065_v14, %v1061_v9  ;;  %v3656_v59 = vpack.c.bf16 %v1105_v55, %v1101_v54  ;;  %v1126_v9 = vld [vmem:[%s7928_s3 + $0x3d8] sm:$0xff] }
  0xa5   : > { %3631 = vmatprep.subr.bf16.mxu1 %v3630_v0  ;;  %v1122_v0 = vld [vmem:[%s7928_s3 + $0x3b8] sm:$0xff]  ;;  %v3666_v14 = vpack.c.bf16 %v1130_v11, %v1126_v9  ;;  %v1160_v9 = vld [vmem:[%s7928_s3 + $0x4e8] sm:$0xff] }
  0xa6   : > { %3509 = vmatpush1.bf16.msra.mxu0 %v3508_v21  ;;  %v1107_v21 = vld [vmem:[%s7928_s3 + $0x340] sm:$0xff]  ;;  %v3662_v3 = vpack.c.bf16 %v1122_v0, %v1118_v63  ;;  %v1162_v11 = vld [vmem:[%s7928_s3 + $0x4f8] sm:$0xff] }
  0xa7   : > { %3511 = vmatprep.subr.bf16.mxu0 %v3510_v24  ;;  %v1073_v24 = vld [vmem:[%s7928_s3 + $0x230] sm:$0xff]  ;;  %v3532_v28 = vpack.c.bf16 %v1111_v22, %v1107_v21  ;;  %v1138_v21 = vld [vmem:[%s7928_s3 + $0x438] sm:$0xff]  ;;  %v1147_v0 = vld [vmem:[%s7928_s3 + $0x480] sm:$0xff] }
  0xa8   : > { %3633 = vmatpush1.bf16.msra.mxu1 %v3632_v8  ;;  %v3640_v48 = vpack.c.bf16 %v1073_v24, %v1069_v19  ;;  %v1128_v8 = vld [vmem:[%s7928_s3 + $0x3e8] sm:$0xff]  ;;  %v1134_v19 = vld [vmem:[%s7928_s3 + $0x418] sm:$0xff] }
  0xa9   : > { %3635 = vmatprep.subr.bf16.mxu1 %v3634_v13  ;;  %v1127_v13 = vld [vmem:[%s7928_s3 + $0x3e0] sm:$0xff]  ;;  %v3670_v22 = vpack.c.bf16 %v1138_v21, %v1134_v19  ;;  %v1168_v19 = vld [vmem:[%s7928_s3 + $0x528] sm:$0xff]  ;;  %v1170_v21 = vld [vmem:[%s7928_s3 + $0x538] sm:$0xff] }
  0xaa   : > { %3513 = vmatpush1.bf16.msra.mxu0 %v3512_v31  ;;  %v1119_v31 = vld [vmem:[%s7928_s3 + $0x3a0] sm:$0xff]  ;;  %v3540_v15 = vpack.c.bf16 %v1127_v13, %v1123_v12 }
  0xab   : > { %3515 = vmatprep.subr.bf16.mxu0 %v3514_v34  ;;  %v1081_v34 = vld [vmem:[%s7928_s3 + $0x270] sm:$0xff]  ;;  %v3536_v37 = vpack.c.bf16 %v1119_v31, %v1115_v30  ;;  %v1135_v30 = vld [vmem:[%s7928_s3 + $0x420] sm:$0xff] }
  0xac   : > { %3637 = vmatpush1.bf16.msra.mxu1 %v3636_v18  ;;  %v3644_v38 = vpack.c.bf16 %v1081_v34, %v1077_v33  ;;  %v1136_v18 = vld [vmem:[%s7928_s3 + $0x428] sm:$0xff]  ;;  %v1133_v33 = vld [vmem:[%s7928_s3 + $0x410] sm:$0xff] }
  0xad   : > { %3639 = vmatprep.subr.bf16.mxu1 %v3638_v23  ;;  %v647_v23 = vlaneseq  ;;  %v1137_v34 = vld [vmem:[%s7928_s3 + $0x430] sm:$0xff] }
  0xae   : > { %3517 = vmatpush1.bf16.msra.mxu0 %v3516_v43  ;;  %v1098_v43 = vld [vmem:[%s7928_s3 + $0x2f8] sm:$0xff] }
  0xaf   : > { %3519 = vmatprep.subr.bf16.mxu0 %v3518_v46  ;;  %v3650_v45 = vpack.c.bf16 %v1098_v43, %v1094_v42  ;;  %v1093_v46 = vld [vmem:[%s7928_s3 + $0x2d0] sm:$0xff]  ;;  %v5663_v24 = vshrl.u32 %v647_v23, 7  ;;  %v3672_v42 = vpack.c.bf16 %v1137_v34, %v1133_v33  ;;  %v1139_v43 = vld [vmem:[%s7928_s3 + $0x440] sm:$0xff]  ;;  %v1174_v33 = vld [vmem:[%s7928_s3 + $0x558] sm:$0xff] }
  0xb0   : > { %3641 = vmatpush1.bf16.msra.mxu1 %v3640_v48  ;;  %v3652_v52 = vpack.c.bf16 %v1097_v47, %v1093_v46  ;;  %v1178_v34 = vld [vmem:[%s7928_s3 + $0x578] sm:$0xff] }
  0xb1   : > { %3643 = vmatprep.subr.bf16.mxu1 %v3642_v32  ;;  %v665_v25 = vsub.s32 4, %v5663_v24  ;;  %v669_v2 = vsub.s32 5, %v5663_v24 }
  0xb2   : > { %3521 = vmatpush1.bf16.msra.mxu0 %v3520_v57  ;;  %v1114_v57 = vld [vmem:[%s7928_s3 + $0x378] sm:$0xff] }
  0xb3   : > { %3523 = vmatprep.subr.bf16.mxu0 %v3522_v61  ;;  %v3658_v60 = vpack.c.bf16 %v1114_v57, %v1110_v56  ;;  %v1109_v61 = vld [vmem:[%s7928_s3 + $0x350] sm:$0xff]  ;;  %v666_v27 = vrot.slane %v5669_v26, %v665_v25  ;;  %v1152_v56 = vld [vmem:[%s7928_s3 + $0x4a8] sm:$0xff]  ;;  %v1150_v57 = vld [vmem:[%s7928_s3 + $0x498] sm:$0xff] }
  0xb4   : > { %3645 = vmatpush1.bf16.msra.mxu1 %v3644_v38  ;;  %v3660_v1 = vpack.c.bf16 %v1113_v62, %v1109_v61  ;;  %v1142_v38 = vld [vmem:[%s7928_s3 + $0x458] sm:$0xff] }
  0xb5   : > { %3647 = vmatprep.subr.bf16.mxu1 %v3646_v39  ;;  %v1146_v39 = vld [vmem:[%s7928_s3 + $0x478] sm:$0xff] }
  0xb6   : > { %3525 = vmatpush1.bf16.msra.mxu0 %v3524_v7  ;;  %v1124_v7 = vld [vmem:[%s7928_s3 + $0x3c8] sm:$0xff]  ;;  %v3674_v49 = vpack.c.bf16 %v1146_v39, %v1142_v38  ;;  %v1171_v38 = vld [vmem:[%s7928_s3 + $0x540] sm:$0xff] }
  0xb7   : > { %3527 = vmatprep.subr.bf16.mxu0 %v3526_v10  ;;  %v3538_v10 = vpack.c.bf16 %v1128_v8, %v1124_v7  ;;  %v1153_v7 = vld [vmem:[%s7928_s3 + $0x4b0] sm:$0xff]  ;;  %v1156_v8 = vld [vmem:[%s7928_s3 + $0x4c8] sm:$0xff]  ;;  %v1175_v39 = vld [vmem:[%s7928_s3 + $0x560] sm:$0xff] }
  0xb8   : > { %3649 = vmatpush1.bf16.msra.mxu1 %v3648_v44  ;;  %v1143_v44 = vld [vmem:[%s7928_s3 + $0x460] sm:$0xff]  ;;  %v3554_v16 = vpack.c.bf16 %v1160_v9, %v1156_v8 }
  0xb9   : > { %3651 = vmatprep.subr.bf16.mxu1 %v3650_v45  ;;  %v3548_v62 = vpack.c.bf16 %v1143_v44, %v1139_v43  ;;  %v1177_v43 = vld [vmem:[%s7928_s3 + $0x570] sm:$0xff]  ;;  %v1180_v44 = vld [vmem:[%s7928_s3 + $0x588] sm:$0xff]  ;;  %v1187_v8 = vld [vmem:[%s7928_s3 + $0x5c0] sm:$0xff] }
  0xba   : > { %3529 = vmatpush1.bf16.msra.mxu0 %v3528_v17  ;;  %v1132_v17 = vld [vmem:[%s7928_s3 + $0x408] sm:$0xff]  ;;  %v1191_v9 = vld [vmem:[%s7928_s3 + $0x5e0] sm:$0xff] }
  0xbb   : > { %3531 = vmatprep.subr.bf16.mxu0 %v3530_v20  ;;  %v3542_v20 = vpack.c.bf16 %v1136_v18, %v1132_v17  ;;  %v1161_v17 = vld [vmem:[%s7928_s3 + $0x4f0] sm:$0xff]  ;;  %v1164_v18 = vld [vmem:[%s7928_s3 + $0x508] sm:$0xff] }
  0xbc   : > { %3653 = vmatpush1.bf16.msra.mxu1 %v3652_v52  ;;  %v1145_v52 = vld [vmem:[%s7928_s3 + $0x470] sm:$0xff] }
  0xbd   : > { %3655 = vmatprep.subr.bf16.mxu1 %v3654_v53  ;;  %v1148_v53 = vld [vmem:[%s7928_s3 + $0x488] sm:$0xff]  ;;  %v3676_v63 = vpack.c.bf16 %v1145_v52, %v1141_v50 }
  0xbe   : > { %3533 = vmatpush1.bf16.msra.mxu0 %v3532_v28  ;;  %v670_v28 = vrot.slane %v5669_v26, %v669_v2  ;;  %v3550_v4 = vpack.c.bf16 %v1152_v56, %v1148_v53  ;;  %v1163_v2 = vld [vmem:[%s7928_s3 + $0x500] sm:$0xff]  ;;  %v3564_v53 = vpack.c.bf16 %v1175_v39, %v1171_v38  ;;  %v1216_v38 = vld [vmem:[%s7928_s3 + $0x6a8] sm:$0xff]  ;;  %v1214_v39 = vld [vmem:[%s7928_s3 + $0x698] sm:$0xff] }
  0xbf   : > { %3535 = vmatprep.subr.bf16.mxu0 %v3534_v29  ;;  %v1131_v29 = vld [vmem:[%s7928_s3 + $0x400] sm:$0xff] }
  0xc0   : > { %3657 = vmatpush1.bf16.msra.mxu1 %v3656_v59  ;;  %v3544_v41 = vpack.c.bf16 %v1135_v30, %v1131_v29  ;;  %v1154_v59 = vld [vmem:[%s7928_s3 + $0x4b8] sm:$0xff]  ;;  %v1165_v29 = vld [vmem:[%s7928_s3 + $0x510] sm:$0xff]  ;;  %v1183_v56 = vld [vmem:[%s7928_s3 + $0x5a0] sm:$0xff] }
  0xc1   : > { %3659 = vmatprep.subr.bf16.mxu1 %v3658_v60  ;;  %v3678_v5 = vpack.c.bf16 %v1154_v59, %v1150_v57  ;;  %v1169_v30 = vld [vmem:[%s7928_s3 + $0x530] sm:$0xff] }
  0xc2   : > { %3537 = vmatpush1.bf16.msra.mxu0 %v3536_v37  ;;  %v1144_v37 = vld [vmem:[%s7928_s3 + $0x468] sm:$0xff] }
  0xc3   : > { %3539 = vmatprep.subr.bf16.mxu0 %v3538_v10  ;;  %v3546_v47 = vpack.c.bf16 %v1144_v37, %v1140_v35  ;;  %v1158_v10 = vld [vmem:[%s7928_s3 + $0x4d8] sm:$0xff]  ;;  %v3688_v37 = vpack.c.bf16 %v1169_v30, %v1165_v29  ;;  %v1203_v30 = vld [vmem:[%s7928_s3 + $0x640] sm:$0xff] }
  0xc4   : > { %3661 = vmatpush1.bf16.msra.mxu1 %v3660_v1  ;;  %v1151_v1 = vld [vmem:[%s7928_s3 + $0x4a0] sm:$0xff]  ;;  %v3682_v51 = vpack.c.bf16 %v1162_v11, %v1158_v10 }
  0xc5   : > { %3663 = vmatprep.subr.bf16.mxu1 %v3662_v3  ;;  %v3552_v12 = vpack.c.bf16 %v1151_v1, %v1147_v0  ;;  %v1192_v1 = vld [vmem:[%s7928_s3 + $0x5e8] sm:$0xff] }
  0xc6   : > { %3541 = vmatpush1.bf16.msra.mxu0 %v3540_v15  ;;  %v1159_v15 = vld [vmem:[%s7928_s3 + $0x4e0] sm:$0xff] }
  0xc7   : > { %3543 = vmatprep.subr.bf16.mxu0 %v3542_v20  ;;  %v1166_v20 = vld [vmem:[%s7928_s3 + $0x518] sm:$0xff] }
  0xc8   : > { %3665 = vmatpush1.bf16.msra.mxu1 %v3664_v6  ;;  %v1149_v6 = vld [vmem:[%s7928_s3 + $0x490] sm:$0xff] }
  0xc9   : > { %3667 = vmatprep.subr.bf16.mxu1 %v3666_v14  ;;  %v3680_v13 = vpack.c.bf16 %v1153_v7, %v1149_v6  ;;  %v1155_v14 = vld [vmem:[%s7928_s3 + $0x4c0] sm:$0xff] }
  0xca   : > { %v3556_v23 = vpack.c.bf16 %v1159_v15, %v1155_v14  ;;  %v1196_v14 = vld [vmem:[%s7928_s3 + $0x608] sm:$0xff] }
  0xcb   : > { %v1200_v15 = vld [vmem:[%s7928_s3 + $0x628] sm:$0xff] }
  0xcc   : > { %3669 = vmatpush1.bf16.msra.mxu1 %v3668_v58  ;;  %v1157_v58 = vld [vmem:[%s7928_s3 + $0x4d0] sm:$0xff] }
  0xcd   : > { %3671 = vmatprep.subr.bf16.mxu1 %v3670_v22  ;;  %v677_v22 = vsub.s32 7, %v5663_v24  ;;  %v3684_v25 = vpack.c.bf16 %v1161_v17, %v1157_v58  ;;  %v3572_v58 = vpack.c.bf16 %v1191_v9, %v1187_v8 }
  0xcf   : > { %v5796_v35 = vrot.slane %v5669_v26, %v677_v22  ;;  %v1197_v22 = vld [vmem:[%s7928_s3 + $0x610] sm:$0xff] }
 0x15c   : > { %v907_v48 = vpop.f32.mrb[4].mxu0 }
 0x15d   : > { %v908_v31 = vadd.f32 %v907_v48, %v666_v27  ;;  %v909_v32 = vpop.f32.mrb[5].mxu0  ;;  %v3686_v48 = vpack.c.bf16 %v1170_v21, %v1166_v20  ;;  %v3574_v20 = vpack.c.bf16 %v1200_v15, %v1196_v14  ;;  %v1229_v14 = vld [vmem:[%s7928_s3 + $0x710] sm:$0xff] }
 0x15e   : > { %v910_v36 = vadd.f32 %v909_v32, %v670_v28  ;;  %v1176_v32 = vld [vmem:[%s7928_s3 + $0x568] sm:$0xff]  ;;  %v1233_v15 = vld [vmem:[%s7928_s3 + $0x730] sm:$0xff] }
 0x15f   : > { %v995_v46 = vmax.f32 %v908_v31, 0.0  ;;  %v1172_v31 = vld [vmem:[%s7928_s3 + $0x548] sm:$0xff] }
 0x160   : > { %v996_v40 = vmax.f32 %v910_v36, 0.0  ;;  %v913_v45 = vpop.f32.mrb[6].mxu0 }
 0x161   : > { %v914_v54 = vadd.f32 %v913_v45, %v666_v27  ;;  %v915_v55 = vpop.f32.mrb[7].mxu0  ;;  %v1167_v27 = vld [vmem:[%s7928_s3 + $0x520] sm:$0xff]  ;;  %v5813_v45 = vpop.f32.mrb[4].mxu1 }
 0x162   : > { %1345 = vmatprep.mubr.f32.mxu0 %v996_v40  ;;  %1499 = vmatprep.mubr.f32.mxu1 %v996_v40  ;;  %v916_v60 = vadd.f32 %v915_v55, %v670_v28  ;;  %v3558_v28 = vpack.c.bf16 %v1168_v19, %v1164_v18  ;;  %v3560_v36 = vpack.c.bf16 %v1167_v27, %v1163_v2  ;;  %v986_v50 = vpop.f32.mrb[5].mxu1  ;;  %v1179_v55 = vld [vmem:[%s7928_s3 + $0x580] sm:$0xff]  ;;  %v1208_v2 = vld [vmem:[%s7928_s3 + $0x668] sm:$0xff]  ;;  %v1206_v27 = vld [vmem:[%s7928_s3 + $0x658] sm:$0xff] }
 0x163   : > { %1346 = vmatmul.mubr.f32.vlgmr.msra.gmra.mrb[0].mxu0 %v995_v46  ;;  %1500 = vmatmul.mubr.f32.vlgmr.msra.gmra.mrb[0].mxu1 %v995_v46  ;;  %v999_v61 = vmax.f32 %v914_v54, 0.0  ;;  %v3562_v40 = vpack.c.bf16 %v1176_v32, %v1172_v31  ;;  %v1184_v46 = vld [vmem:[%s7928_s3 + $0x5a8] sm:$0xff]  ;;  %v987_v52 = vadd.f32 %v986_v50, %v5796_v35  ;;  %v3568_v6 = vpack.c.bf16 %v1183_v56, %v1179_v55  ;;  %v1195_v18 = vld [vmem:[%s7928_s3 + $0x600] sm:$0xff]  ;;  %v1217_v50 = vld [vmem:[%s7928_s3 + $0x6b0] sm:$0xff] }
 0x164   : > { %3545 = vmatpush1.bf16.msra.mxu0 %v3544_v41  ;;  %3673 = vmatpush1.bf16.msra.mxu1 %v3672_v42  ;;  %v1000_v3 = vmax.f32 %v916_v60, 0.0  ;;  %v3690_v41 = vpack.c.bf16 %v1178_v34, %v1174_v33  ;;  %v1173_v42 = vld [vmem:[%s7928_s3 + $0x550] sm:$0xff]  ;;  %v3566_v57 = vpack.c.bf16 %v1184_v46, %v1180_v44  ;;  %v1199_v19 = vld [vmem:[%s7928_s3 + $0x620] sm:$0xff]  ;;  %v1226_v55 = vld [vmem:[%s7928_s3 + $0x6f8] sm:$0xff] }
 0x165   : > { %3547 = vmatprep.subr.bf16.mxu0 %v3546_v47  ;;  %3675 = vmatprep.subr.bf16.mxu1 %v3674_v49  ;;  %v1182_v47 = vld [vmem:[%s7928_s3 + $0x598] sm:$0xff]  ;;  %v3692_v54 = vpack.c.bf16 %v1177_v43, %v1173_v42  ;;  %v1181_v60 = vld [vmem:[%s7928_s3 + $0x590] sm:$0xff]  ;;  %v5840_v0 = vpop.f32.mrb[6].mxu1  ;;  %v1207_v31 = vld [vmem:[%s7928_s3 + $0x660] sm:$0xff] }
 0x166   : > { %1351 = vmatprep.mubr.f32.mxu0 %v1000_v3  ;;  %1505 = vmatprep.mubr.f32.mxu1 %v1000_v3  ;;  %v1186_v49 = vld [vmem:[%s7928_s3 + $0x5b8] sm:$0xff]  ;;  %v1205_v34 = vld [vmem:[%s7928_s3 + $0x650] sm:$0xff]  ;;  %v1211_v43 = vld [vmem:[%s7928_s3 + $0x680] sm:$0xff] }
 0x167   : > { %1352 = vmatmul.mubr.f32.gmra.mrb[2].mxu0 %v999_v61  ;;  %1506 = vmatmul.mubr.f32.gmra.mrb[2].mxu1 %v999_v61  ;;  %v3694_v59 = vpack.c.bf16 %v1186_v49, %v1182_v47  ;;  %v1185_v61 = vld [vmem:[%s7928_s3 + $0x5b0] sm:$0xff]  ;;  %v1190_v3 = vld [vmem:[%s7928_s3 + $0x5d8] sm:$0xff]  ;;  %v1215_v44 = vld [vmem:[%s7928_s3 + $0x6a0] sm:$0xff] }
 0x168   : > { %3549 = vmatpush1.bf16.msra.mxu0 %v3548_v62  ;;  %3677 = vmatpush1.bf16.msra.mxu1 %v3676_v63  ;;  %v1188_v62 = vld [vmem:[%s7928_s3 + $0x5c8] sm:$0xff]  ;;  %v998_v63 = vmax.f32 %v987_v52, 0.0  ;;  %v3696_v7 = vpack.c.bf16 %v1185_v61, %v1181_v60  ;;  %v1213_v49 = vld [vmem:[%s7928_s3 + $0x690] sm:$0xff]  ;;  %v3584_v56 = vpack.c.bf16 %v1215_v44, %v1211_v43  ;;  %v1223_v60 = vld [vmem:[%s7928_s3 + $0x6e0] sm:$0xff] }
 0x169   : > { %3551 = vmatprep.subr.bf16.mxu0 %v3550_v4  ;;  %3679 = vmatprep.subr.bf16.mxu1 %v3678_v5  ;;  %v1194_v4 = vld [vmem:[%s7928_s3 + $0x5f8] sm:$0xff]  ;;  %v5851_v5 = vpop.f32.mrb[7].mxu1  ;;  %v3570_v10 = vpack.c.bf16 %v1192_v1, %v1188_v62  ;;  %v1220_v52 = vld [vmem:[%s7928_s3 + $0x6c8] sm:$0xff]  ;;  %v1225_v1 = vld [vmem:[%s7928_s3 + $0x6f0] sm:$0xff] }
 0x16a   : > { %1422 = vmatprep.mubr.f32.mxu0 %v998_v63  ;;  %1576 = vmatprep.mubr.f32.mxu1 %v998_v63  ;;  %v3698_v11 = vpack.c.bf16 %v1194_v4, %v1190_v3  ;;  %v1221_v63 = vld [vmem:[%s7928_s3 + $0x6d0] sm:$0xff]  ;;  %v1228_v3 = vld [vmem:[%s7928_s3 + $0x708] sm:$0xff]  ;;  %v1258_v43 = vld [vmem:[%s7928_s3 + $0x7f8] sm:$0xff] }
 0x16b   : > { %v1232_v4 = vld [vmem:[%s7928_s3 + $0x728] sm:$0xff]  ;;  %v3716_v9 = vpack.c.bf16 %v1225_v1, %v1221_v63 }
 0x16c   : > { %3553 = vmatpush1.bf16.msra.mxu0 %v3552_v12  ;;  %3681 = vmatpush1.bf16.msra.mxu1 %v3680_v13  ;;  %v1189_v12 = vld [vmem:[%s7928_s3 + $0x5d0] sm:$0xff] }
 0x16d   : > { %3555 = vmatprep.subr.bf16.mxu0 %v3554_v16  ;;  %3683 = vmatprep.subr.bf16.mxu1 %v3682_v51  ;;  %v1193_v13 = vld [vmem:[%s7928_s3 + $0x5f0] sm:$0xff]  ;;  %v1198_v16 = vld [vmem:[%s7928_s3 + $0x618] sm:$0xff] }
 0x16e   : > { %v1202_v51 = vld [vmem:[%s7928_s3 + $0x638] sm:$0xff]  ;;  %v3700_v17 = vpack.c.bf16 %v1193_v13, %v1189_v12  ;;  %v3590_v12 = vpack.c.bf16 %v1232_v4, %v1228_v3  ;;  %v1605_v4 = vld [vmem:[%s7930_s5] sm:$0xff] }
 0x16f   : > { %v3702_v21 = vpack.c.bf16 %v1202_v51, %v1198_v16  ;;  %v1236_v16 = vld [vmem:[%s7928_s3 + $0x748] sm:$0xff] }
 0x170   : > { %3557 = vmatpush1.bf16.msra.mxu0 %v3556_v23  ;;  %3685 = vmatpush1.bf16.msra.mxu1 %v3684_v25  ;;  %v1201_v23 = vld [vmem:[%s7928_s3 + $0x630] sm:$0xff]  ;;  %v1204_v25 = vld [vmem:[%s7928_s3 + $0x648] sm:$0xff] }
 0x171   : > { %3559 = vmatprep.subr.bf16.mxu0 %v3558_v28  ;;  %3687 = vmatprep.subr.bf16.mxu1 %v3686_v48  ;;  %v1210_v28 = vld [vmem:[%s7928_s3 + $0x678] sm:$0xff]  ;;  %v3576_v48 = vpack.c.bf16 %v1199_v19, %v1195_v18  ;;  %v3704_v29 = vpack.c.bf16 %v1201_v23, %v1197_v22  ;;  %v3578_v32 = vpack.c.bf16 %v1208_v2, %v1204_v25  ;;  %v1240_v51 = vld [vmem:[%s7928_s3 + $0x768] sm:$0xff]  ;;  %v1237_v25 = vld [vmem:[%s7928_s3 + $0x750] sm:$0xff] }
 0x172   : > { %v3706_v33 = vpack.c.bf16 %v1210_v28, %v1206_v27  ;;  %v3720_v19 = vpack.c.bf16 %v1233_v15, %v1229_v14  ;;  %v3594_v22 = vpack.c.bf16 %v1240_v51, %v1236_v16  ;;  %v1241_v2 = vld [vmem:[%s7928_s3 + $0x770] sm:$0xff]  ;;  %v1244_v27 = vld [vmem:[%s7928_s3 + $0x788] sm:$0xff]  ;;  %v1613_v14 = vld [vmem:[%s7930_s5 + $0x40] sm:$0xff] }
 0x173   : > { %v1248_v28 = vld [vmem:[%s7928_s3 + $0x7a8] sm:$0xff]  ;;  %v1617_v15 = vld [vmem:[%s7930_s5 + $0x60] sm:$0xff] }
 0x174   : > { %3561 = vmatpush1.bf16.msra.mxu0 %v3560_v36  ;;  %3689 = vmatpush1.bf16.msra.mxu1 %v3688_v37  ;;  %v1209_v36 = vld [vmem:[%s7928_s3 + $0x670] sm:$0xff]  ;;  %v1212_v37 = vld [vmem:[%s7928_s3 + $0x688] sm:$0xff] }
 0x175   : > { %3563 = vmatprep.subr.bf16.mxu0 %v3562_v40  ;;  %3691 = vmatprep.subr.bf16.mxu1 %v3690_v41  ;;  %v1218_v40 = vld [vmem:[%s7928_s3 + $0x6b8] sm:$0xff]  ;;  %v3580_v41 = vpack.c.bf16 %v1207_v31, %v1203_v30  ;;  %v3708_v42 = vpack.c.bf16 %v1209_v36, %v1205_v34  ;;  %v3582_v46 = vpack.c.bf16 %v1216_v38, %v1212_v37  ;;  %v673_v34 = vsub.s32 6, %v5663_v24  ;;  %v1245_v38 = vld [vmem:[%s7928_s3 + $0x790] sm:$0xff] }
 0x176   : > { %v3710_v47 = vpack.c.bf16 %v1218_v40, %v1214_v39  ;;  %v3724_v31 = vpack.c.bf16 %v1241_v2, %v1237_v25  ;;  %v3598_v36 = vpack.c.bf16 %v1248_v28, %v1244_v27  ;;  %v1249_v39 = vld [vmem:[%s7928_s3 + $0x7b0] sm:$0xff]  ;;  %v1252_v40 = vld [vmem:[%s7928_s3 + $0x7c8] sm:$0xff]  ;;  %v1621_v2 = vld [vmem:[%s7930_s5 + $0x80] sm:$0xff] }
 0x177   : > { %v1625_v27 = vld [vmem:[%s7930_s5 + $0xa0] sm:$0xff] }
 0x178   : > { %3565 = vmatpush1.bf16.msra.mxu0 %v3564_v53  ;;  %3693 = vmatpush1.bf16.msra.mxu1 %v3692_v54  ;;  %v1224_v53 = vld [vmem:[%s7928_s3 + $0x6e8] sm:$0xff]  ;;  %v1222_v54 = vld [vmem:[%s7928_s3 + $0x6d8] sm:$0xff] }
 0x179   : > { %3567 = vmatprep.subr.bf16.mxu0 %v3566_v57  ;;  %3695 = vmatprep.subr.bf16.mxu1 %v3694_v59  ;;  %v3712_v57 = vpack.c.bf16 %v1217_v50, %v1213_v49  ;;  %v1219_v59 = vld [vmem:[%s7928_s3 + $0x6c0] sm:$0xff]  ;;  %v3586_v61 = vpack.c.bf16 %v1224_v53, %v1220_v52  ;;  %v3714_v62 = vpack.c.bf16 %v1226_v55, %v1222_v54  ;;  %v1253_v54 = vld [vmem:[%s7928_s3 + $0x7d0] sm:$0xff] }
 0x17a   : > { %v3588_v8 = vpack.c.bf16 %v1223_v60, %v1219_v59  ;;  %v1255_v49 = vld [vmem:[%s7928_s3 + $0x7e0] sm:$0xff]  ;;  %v674_v50 = vrot.slane %v5669_v26, %v673_v34  ;;  %v1257_v55 = vld [vmem:[%s7928_s3 + $0x7f0] sm:$0xff]  ;;  %v1610_v26 = vld [vmem:[%s7930_s5 + $0x28] sm:$0xff] }
 0x17b   : > { %v1612_v59 = vld [vmem:[%s7930_s5 + $0x38] sm:$0xff] }
 0x17c   : > { %3569 = vmatpush1.bf16.msra.mxu0 %v3568_v6  ;;  %3697 = vmatpush1.bf16.msra.mxu1 %v3696_v7  ;;  %v1230_v6 = vld [vmem:[%s7928_s3 + $0x718] sm:$0xff]  ;;  %v985_v63 = vadd.f32 %v5813_v45, %v674_v50  ;;  %v1614_v45 = vld [vmem:[%s7930_s5 + $0x48] sm:$0xff] }
 0x17d   : > { %3571 = vmatprep.subr.bf16.mxu0 %v3570_v10  ;;  %3699 = vmatprep.subr.bf16.mxu1 %v3698_v11  ;;  %v1234_v7 = vld [vmem:[%s7928_s3 + $0x738] sm:$0xff]  ;;  %v1227_v10 = vld [vmem:[%s7928_s3 + $0x700] sm:$0xff] }
 0x17e   : > { %v1231_v11 = vld [vmem:[%s7928_s3 + $0x720] sm:$0xff]  ;;  %v3718_v13 = vpack.c.bf16 %v1234_v7, %v1230_v6  ;;  %v1607_v7 = vld [vmem:[%s7930_s5 + $0x10] sm:$0xff]  ;;  %v1636_v34 = vld [vmem:[%s7930_s5 + $0xf8] sm:$0xff] }
 0x17f   : > { %v3592_v18 = vpack.c.bf16 %v1231_v11, %v1227_v10  ;;  %v1609_v6 = vld [vmem:[%s7930_s5 + $0x20] sm:$0xff]  ;;  %v1620_v10 = vld [vmem:[%s7930_s5 + $0x78] sm:$0xff] }
 0x180   : > { %3573 = vmatpush1.bf16.msra.mxu0 %v3572_v58  ;;  %3701 = vmatpush1.bf16.msra.mxu1 %v3700_v17  ;;  %v1238_v58 = vld [vmem:[%s7928_s3 + $0x758] sm:$0xff] }
 0x181   : > { %3575 = vmatprep.subr.bf16.mxu0 %v3574_v20  ;;  %3703 = vmatprep.subr.bf16.mxu1 %v3702_v21  ;;  %v1242_v17 = vld [vmem:[%s7928_s3 + $0x778] sm:$0xff]  ;;  %v1235_v20 = vld [vmem:[%s7928_s3 + $0x740] sm:$0xff] }
 0x182   : > { %v1239_v21 = vld [vmem:[%s7928_s3 + $0x760] sm:$0xff]  ;;  %v3722_v23 = vpack.c.bf16 %v1242_v17, %v1238_v58  ;;  %v1615_v58 = vld [vmem:[%s7930_s5 + $0x50] sm:$0xff] }
 0x183   : > { %v3596_v30 = vpack.c.bf16 %v1239_v21, %v1235_v20  ;;  %v1619_v17 = vld [vmem:[%s7930_s5 + $0x70] sm:$0xff]  ;;  %v1626_v20 = vld [vmem:[%s7930_s5 + $0xa8] sm:$0xff]  ;;  %v1624_v21 = vld [vmem:[%s7930_s5 + $0x98] sm:$0xff] }
 0x184   : > { %3577 = vmatpush1.bf16.msra.mxu0 %v3576_v48  ;;  %3705 = vmatpush1.bf16.msra.mxu1 %v3704_v29  ;;  %v1246_v48 = vld [vmem:[%s7928_s3 + $0x798] sm:$0xff]  ;;  %v3868_v25 = vpack.c.bf16 %v1619_v17, %v1615_v58  ;;  %v1662_v58 = vld [vmem:[%s7930_s5 + $0x1c8] sm:$0xff] }
 0x185   : > { %3579 = vmatprep.subr.bf16.mxu0 %v3578_v32  ;;  %3707 = vmatprep.subr.bf16.mxu1 %v3706_v33  ;;  %v1250_v29 = vld [vmem:[%s7928_s3 + $0x7b8] sm:$0xff]  ;;  %v1243_v32 = vld [vmem:[%s7928_s3 + $0x780] sm:$0xff]  ;;  %v1666_v17 = vld [vmem:[%s7930_s5 + $0x1e8] sm:$0xff] }
 0x186   : > { %v1247_v33 = vld [vmem:[%s7928_s3 + $0x7a0] sm:$0xff]  ;;  %v3726_v37 = vpack.c.bf16 %v1250_v29, %v1246_v48  ;;  %v1623_v29 = vld [vmem:[%s7930_s5 + $0x90] sm:$0xff] }
 0x187   : > { %v3600_v44 = vpack.c.bf16 %v1247_v33, %v1243_v32  ;;  %v1634_v32 = vld [vmem:[%s7930_s5 + $0xe8] sm:$0xff]  ;;  %v1632_v33 = vld [vmem:[%s7930_s5 + $0xd8] sm:$0xff] }
 0x188   : > { %3581 = vmatpush1.bf16.msra.mxu0 %v3580_v41  ;;  %3709 = vmatpush1.bf16.msra.mxu1 %v3708_v42  ;;  %v1256_v41 = vld [vmem:[%s7928_s3 + $0x7e8] sm:$0xff]  ;;  %v1254_v42 = vld [vmem:[%s7928_s3 + $0x7d8] sm:$0xff] }
 0x189   : > { %3583 = vmatprep.subr.bf16.mxu0 %v3582_v46  ;;  %3711 = vmatprep.subr.bf16.mxu1 %v3710_v47  ;;  %v3728_v46 = vpack.c.bf16 %v1249_v39, %v1245_v38  ;;  %v1251_v47 = vld [vmem:[%s7928_s3 + $0x7c0] sm:$0xff]  ;;  %v3602_v52 = vpack.c.bf16 %v1256_v41, %v1252_v40  ;;  %v3730_v53 = vpack.c.bf16 %v1258_v43, %v1254_v42  ;;  %v1631_v42 = vld [vmem:[%s7930_s5 + $0xd0] sm:$0xff] }
 0x18a   : > { %v3604_v60 = vpack.c.bf16 %v1255_v49, %v1251_v47  ;;  %v1629_v38 = vld [vmem:[%s7930_s5 + $0xc0] sm:$0xff]  ;;  %v3874_v41 = vpack.c.bf16 %v1636_v34, %v1632_v33  ;;  %v1635_v43 = vld [vmem:[%s7930_s5 + $0xf0] sm:$0xff]  ;;  %v1640_v47 = vld [vmem:[%s7930_s5 + $0x118] sm:$0xff] }
 0x18b   : > { %v1633_v39 = vld [vmem:[%s7930_s5 + $0xe0] sm:$0xff]  ;;  %v1644_v49 = vld [vmem:[%s7930_s5 + $0x138] sm:$0xff] }
 0x18c   : > { %3585 = vmatpush1.bf16.msra.mxu0 %v3584_v56  ;;  %3713 = vmatpush1.bf16.msra.mxu1 %v3712_v57  ;;  %v1606_v56 = vld [vmem:[%s7930_s5 + $0x8] sm:$0xff]  ;;  %v1608_v57 = vld [vmem:[%s7930_s5 + $0x18] sm:$0xff]  ;;  %v1669_v34 = vld [vmem:[%s7930_s5 + $0x200] sm:$0xff] }
 0x18d   : > { %3587 = vmatprep.subr.bf16.mxu0 %v3586_v61  ;;  %3715 = vmatprep.subr.bf16.mxu1 %v3714_v62  ;;  %v3732_v61 = vpack.c.bf16 %v1257_v55, %v1253_v54  ;;  %v993_v62 = vadd.f32 %v5851_v5, %v5796_v35  ;;  %v3734_v1 = vpack.c.bf16 %v1610_v26, %v1606_v56  ;;  %v1611_v35 = vld [vmem:[%s7930_s5 + $0x30] sm:$0xff]  ;;  %v1641_v54 = vld [vmem:[%s7930_s5 + $0x120] sm:$0xff] }
 0x18e   : > { %v3862_v3 = vpack.c.bf16 %v1612_v59, %v1608_v57  ;;  %v991_v5 = vadd.f32 %v5840_v0, %v674_v50  ;;  %v3864_v0 = vpack.c.bf16 %v1611_v35, %v1607_v7  ;;  %v3748_v50 = vpack.c.bf16 %v1633_v39, %v1629_v38  ;;  %v1639_v26 = vld [vmem:[%s7930_s5 + $0x110] sm:$0xff]  ;;  %v1646_v59 = vld [vmem:[%s7930_s5 + $0x148] sm:$0xff] }
 0x18f   : > { %v1002_v11 = vmax.f32 %v993_v62, 0.0  ;;  %v3878_v56 = vpack.c.bf16 %v1644_v49, %v1640_v47  ;;  %v1643_v57 = vld [vmem:[%s7930_s5 + $0x130] sm:$0xff]  ;;  %v1652_v62 = vld [vmem:[%s7930_s5 + $0x178] sm:$0xff]  ;;  %v1677_v49 = vld [vmem:[%s7930_s5 + $0x240] sm:$0xff] }
 0x190   : > { %3589 = vmatpush1.bf16.msra.mxu0 %v3588_v8  ;;  %3717 = vmatpush1.bf16.msra.mxu1 %v3716_v9  ;;  %v1618_v8 = vld [vmem:[%s7930_s5 + $0x68] sm:$0xff]  ;;  %v1616_v9 = vld [vmem:[%s7930_s5 + $0x58] sm:$0xff]  ;;  %v1647_v35 = vld [vmem:[%s7930_s5 + $0x150] sm:$0xff] }
 0x191   : > { %3591 = vmatprep.subr.bf16.mxu0 %v3590_v12  ;;  %3719 = vmatprep.subr.bf16.mxu1 %v3718_v13  ;;  %v997_v12 = vmax.f32 %v985_v63, 0.0  ;;  %v3736_v13 = vpack.c.bf16 %v1609_v6, %v1605_v4  ;;  %v3738_v16 = vpack.c.bf16 %v1618_v8, %v1614_v45  ;;  %v3866_v51 = vpack.c.bf16 %v1620_v10, %v1616_v9  ;;  %v1649_v4 = vld [vmem:[%s7930_s5 + $0x160] sm:$0xff]  ;;  %v1651_v45 = vld [vmem:[%s7930_s5 + $0x170] sm:$0xff]  ;;  %v1658_v8 = vld [vmem:[%s7930_s5 + $0x1a8] sm:$0xff] }
 0x192   : > { %v1656_v9 = vld [vmem:[%s7930_s5 + $0x198] sm:$0xff]  ;;  %v1671_v39 = vld [vmem:[%s7930_s5 + $0x210] sm:$0xff] }
 0x193   : > { %v1660_v10 = vld [vmem:[%s7930_s5 + $0x1b8] sm:$0xff] }
 0x194   : > { %3593 = vmatpush1.bf16.msra.mxu0 %v3592_v18  ;;  %3721 = vmatpush1.bf16.msra.mxu1 %v3720_v19  ;;  %v1622_v18 = vld [vmem:[%s7930_s5 + $0x88] sm:$0xff]  ;;  %v1001_v19 = vmax.f32 %v991_v5, 0.0 }
 0x195   : > { %3595 = vmatprep.subr.bf16.mxu0 %v3594_v22  ;;  %3723 = vmatprep.subr.bf16.mxu1 %v3722_v23  ;;  %v1628_v22 = vld [vmem:[%s7930_s5 + $0xb8] sm:$0xff]  ;;  %v3740_v23 = vpack.c.bf16 %v1617_v15, %v1613_v14  ;;  %v3742_v28 = vpack.c.bf16 %v1626_v20, %v1622_v18  ;;  %v1654_v5 = vld [vmem:[%s7930_s5 + $0x188] sm:$0xff]  ;;  %v3886_v15 = vpack.c.bf16 %v1660_v10, %v1656_v9  ;;  %v1693_v10 = vld [vmem:[%s7930_s5 + $0x2c0] sm:$0xff] }
 0x196   : > { %v3870_v48 = vpack.c.bf16 %v1628_v22, %v1624_v21  ;;  %v3758_v14 = vpack.c.bf16 %v1658_v8, %v1654_v5  ;;  %v1664_v18 = vld [vmem:[%s7930_s5 + $0x1d8] sm:$0xff]  ;;  %v1661_v22 = vld [vmem:[%s7930_s5 + $0x1c0] sm:$0xff] }
 0x197   : > { %v1700_v5 = vld [vmem:[%s7930_s5 + $0x2f8] sm:$0xff] }
 0x198   : > { %3597 = vmatpush1.bf16.msra.mxu0 %v3596_v30  ;;  %3725 = vmatpush1.bf16.msra.mxu1 %v3724_v31  ;;  %v1627_v30 = vld [vmem:[%s7930_s5 + $0xb0] sm:$0xff]  ;;  %v1630_v31 = vld [vmem:[%s7930_s5 + $0xc8] sm:$0xff] }
 0x199   : > { %3599 = vmatprep.subr.bf16.mxu0 %v3598_v36  ;;  %3727 = vmatprep.subr.bf16.mxu1 %v3726_v37  ;;  %v3744_v36 = vpack.c.bf16 %v1625_v27, %v1621_v2  ;;  %v3872_v37 = vpack.c.bf16 %v1627_v30, %v1623_v29  ;;  %v3746_v40 = vpack.c.bf16 %v1634_v32, %v1630_v31  ;;  %v1663_v27 = vld [vmem:[%s7930_s5 + $0x1d0] sm:$0xff]  ;;  %v1674_v29 = vld [vmem:[%s7930_s5 + $0x228] sm:$0xff]  ;;  %v1672_v30 = vld [vmem:[%s7930_s5 + $0x218] sm:$0xff] }
 0x19a   : > { %v1676_v31 = vld [vmem:[%s7930_s5 + $0x238] sm:$0xff] }
 0x19b   : > { %v3894_v38 = vpack.c.bf16 %v1676_v31, %v1672_v30  ;;  %v1709_v31 = vld [vmem:[%s7930_s5 + $0x340] sm:$0xff] }
 0x19c   : > { %3601 = vmatpush1.bf16.msra.mxu0 %v3600_v44  ;;  %3729 = vmatpush1.bf16.msra.mxu1 %v3728_v46  ;;  %v1638_v44 = vld [vmem:[%s7930_s5 + $0x108] sm:$0xff] }
 0x19d   : > { %3603 = vmatprep.subr.bf16.mxu0 %v3602_v52  ;;  %3731 = vmatprep.subr.bf16.mxu1 %v3730_v53  ;;  %v1642_v46 = vld [vmem:[%s7930_s5 + $0x128] sm:$0xff]  ;;  %v3876_v52 = vpack.c.bf16 %v1635_v43, %v1631_v42  ;;  %v1637_v53 = vld [vmem:[%s7930_s5 + $0x100] sm:$0xff]  ;;  %v1680_v43 = vld [vmem:[%s7930_s5 + $0x258] sm:$0xff] }
 0x19e   : > { %v3750_v55 = vpack.c.bf16 %v1642_v46, %v1638_v44  ;;  %v3752_v63 = vpack.c.bf16 %v1641_v54, %v1637_v53  ;;  %v1682_v42 = vld [vmem:[%s7930_s5 + $0x268] sm:$0xff]  ;;  %v1684_v44 = vld [vmem:[%s7930_s5 + $0x278] sm:$0xff]  ;;  %v1679_v54 = vld [vmem:[%s7930_s5 + $0x250] sm:$0xff] }
 0x19f   : > { %v3898_v53 = vpack.c.bf16 %v1684_v44, %v1680_v43  ;;  %v1717_v44 = vld [vmem:[%s7930_s5 + $0x380] sm:$0xff] }
 0x1a0   : > { %3605 = vmatpush1.bf16.msra.mxu0 %v3604_v60  ;;  %3733 = vmatpush1.bf16.msra.mxu1 %v3732_v61  ;;  %v1650_v60 = vld [vmem:[%s7930_s5 + $0x168] sm:$0xff]  ;;  %v1648_v61 = vld [vmem:[%s7930_s5 + $0x158] sm:$0xff] }
 0x1a1   : > { %3735 = vmatprep.subr.bf16.mxu0 %v3734_v1  ;;  %3863 = vmatprep.subr.bf16.mxu1 %v3862_v3  ;;  %v3880_v1 = vpack.c.bf16 %v1643_v57, %v1639_v26  ;;  %v1645_v3 = vld [vmem:[%s7930_s5 + $0x140] sm:$0xff]  ;;  %v3754_v6 = vpack.c.bf16 %v1650_v60, %v1646_v59  ;;  %v3882_v7 = vpack.c.bf16 %v1652_v62, %v1648_v61  ;;  %v1690_v26 = vld [vmem:[%s7930_s5 + $0x2a8] sm:$0xff]  ;;  %v1688_v57 = vld [vmem:[%s7930_s5 + $0x298] sm:$0xff] }
 0x1a2   : > { %v1692_v59 = vld [vmem:[%s7930_s5 + $0x2b8] sm:$0xff]  ;;  %v1685_v62 = vld [vmem:[%s7930_s5 + $0x280] sm:$0xff] }
 0x1a3   : > { %1423 = vmatmul.mubr.f32.vlgmr.msra.gmra.mrb[0].mxu0 %v997_v12  ;;  %1577 = vmatmul.mubr.f32.vlgmr.msra.gmra.mrb[0].mxu1 %v997_v12  ;;  %v3884_v12 = vpack.c.bf16 %v1651_v45, %v1647_v35  ;;  %v1698_v35 = vld [vmem:[%s7930_s5 + $0x2e8] sm:$0xff]  ;;  %v1696_v45 = vld [vmem:[%s7930_s5 + $0x2d8] sm:$0xff] }
 0x1a4   : > { %1428 = vmatprep.mubr.f32.mxu0 %v1002_v11  ;;  %1582 = vmatprep.mubr.f32.mxu1 %v1002_v11  ;;  %v3756_v11 = vpack.c.bf16 %v1649_v4, %v1645_v3  ;;  %v3902_v3 = vpack.c.bf16 %v1692_v59, %v1688_v57  ;;  %v1687_v4 = vld [vmem:[%s7930_s5 + $0x290] sm:$0xff]  ;;  %v1732_v59 = vld [vmem:[%s7930_s5 + $0x3f8] sm:$0xff] }
 0x1a5   : > { %3737 = vmatpush1.bf16.msra.mxu0 %v3736_v13  ;;  %3865 = vmatpush1.bf16.msra.mxu1 %v3864_v0  ;;  %v1653_v13 = vld [vmem:[%s7930_s5 + $0x180] sm:$0xff] }
 0x1a6   : > { %3739 = vmatprep.subr.bf16.mxu0 %v3738_v16  ;;  %3867 = vmatprep.subr.bf16.mxu1 %v3866_v51  ;;  %v1657_v0 = vld [vmem:[%s7930_s5 + $0x1a0] sm:$0xff]  ;;  %v1655_v16 = vld [vmem:[%s7930_s5 + $0x190] sm:$0xff] }
 0x1a7   : > { %1429 = vmatmul.mubr.f32.gmra.mrb[2].mxu0 %v1001_v19  ;;  %1583 = vmatmul.mubr.f32.gmra.mrb[2].mxu1 %v1001_v19  ;;  %v1659_v51 = vld [vmem:[%s7930_s5 + $0x1b0] sm:$0xff]  ;;  %v1668_v19 = vld [vmem:[%s7930_s5 + $0x1f8] sm:$0xff]  ;;  %v3760_v20 = vpack.c.bf16 %v1657_v0, %v1653_v13  ;;  %v3906_v13 = vpack.c.bf16 %v1700_v5, %v1696_v45 }
 0x1a8   : > { %v3888_v21 = vpack.c.bf16 %v1659_v51, %v1655_v16  ;;  %v3890_v2 = vpack.c.bf16 %v1668_v19, %v1664_v18  ;;  %v1695_v0 = vld [vmem:[%s7930_s5 + $0x2d0] sm:$0xff]  ;;  %v1706_v16 = vld [vmem:[%s7930_s5 + $0x328] sm:$0xff]  ;;  %v1704_v51 = vld [vmem:[%s7930_s5 + $0x318] sm:$0xff] }
 0x1a9   : > { %3741 = vmatpush1.bf16.msra.mxu0 %v3740_v23  ;;  %3869 = vmatpush1.bf16.msra.mxu1 %v3868_v25  ;;  %v1665_v23 = vld [vmem:[%s7930_s5 + $0x1e0] sm:$0xff]  ;;  %v3762_v25 = vpack.c.bf16 %v1666_v17, %v1662_v58  ;;  %v1708_v58 = vld [vmem:[%s7930_s5 + $0x338] sm:$0xff] }
 0x1aa   : > { %3743 = vmatprep.subr.bf16.mxu0 %v3742_v28  ;;  %3871 = vmatprep.subr.bf16.mxu1 %v3870_v48  ;;  %v1667_v28 = vld [vmem:[%s7930_s5 + $0x1f0] sm:$0xff]  ;;  %v1670_v48 = vld [vmem:[%s7930_s5 + $0x208] sm:$0xff]  ;;  %v3764_v32 = vpack.c.bf16 %v1665_v23, %v1661_v22  ;;  %v1701_v19 = vld [vmem:[%s7930_s5 + $0x300] sm:$0xff]  ;;  %v3910_v22 = vpack.c.bf16 %v1708_v58, %v1704_v51 }
 0x1ab   : > { %v3892_v33 = vpack.c.bf16 %v1667_v28, %v1663_v27  ;;  %v1703_v23 = vld [vmem:[%s7930_s5 + $0x310] sm:$0xff]  ;;  %v1714_v27 = vld [vmem:[%s7930_s5 + $0x368] sm:$0xff]  ;;  %v1712_v28 = vld [vmem:[%s7930_s5 + $0x358] sm:$0xff] }
 0x1ac   : > { %v1740_v5 = vld [vmem:[%s7930_s5 + $0x438] sm:$0xff] }
 0x1ad   : > { %3745 = vmatpush1.bf16.msra.mxu0 %v3744_v36  ;;  %3873 = vmatpush1.bf16.msra.mxu1 %v3872_v37  ;;  %v1673_v36 = vld [vmem:[%s7930_s5 + $0x220] sm:$0xff]  ;;  %v3766_v37 = vpack.c.bf16 %v1674_v29, %v1670_v48  ;;  %v1716_v48 = vld [vmem:[%s7930_s5 + $0x378] sm:$0xff] }
 0x1ae   : > { %3747 = vmatprep.subr.bf16.mxu0 %v3746_v40  ;;  %3875 = vmatprep.subr.bf16.mxu1 %v3874_v41  ;;  %v1675_v40 = vld [vmem:[%s7930_s5 + $0x230] sm:$0xff]  ;;  %v1678_v41 = vld [vmem:[%s7930_s5 + $0x248] sm:$0xff]  ;;  %v3768_v46 = vpack.c.bf16 %v1673_v36, %v1669_v34  ;;  %v3914_v34 = vpack.c.bf16 %v1716_v48, %v1712_v28 }
 0x1af   : > { %v3896_v47 = vpack.c.bf16 %v1675_v40, %v1671_v39  ;;  %v1711_v36 = vld [vmem:[%s7930_s5 + $0x350] sm:$0xff]  ;;  %v1722_v39 = vld [vmem:[%s7930_s5 + $0x3a8] sm:$0xff]  ;;  %v1720_v40 = vld [vmem:[%s7930_s5 + $0x398] sm:$0xff] }
 0x1b0   : > { %v1739_v28 = vld [vmem:[%s7930_s5 + $0x430] sm:$0xff]  ;;  %v1742_v48 = vld [vmem:[%s7930_s5 + $0x448] sm:$0xff] }
 0x1b1   : > { %3749 = vmatpush1.bf16.msra.mxu0 %v3748_v50  ;;  %3877 = vmatpush1.bf16.msra.mxu1 %v3876_v52  ;;  %v1681_v50 = vld [vmem:[%s7930_s5 + $0x260] sm:$0xff]  ;;  %v3770_v52 = vpack.c.bf16 %v1682_v42, %v1678_v41  ;;  %v1724_v41 = vld [vmem:[%s7930_s5 + $0x3b8] sm:$0xff] }
 0x1b2   : > { %3751 = vmatprep.subr.bf16.mxu0 %v3750_v55  ;;  %3879 = vmatprep.subr.bf16.mxu1 %v3878_v56  ;;  %v1683_v55 = vld [vmem:[%s7930_s5 + $0x270] sm:$0xff]  ;;  %v1686_v56 = vld [vmem:[%s7930_s5 + $0x288] sm:$0xff]  ;;  %v3772_v60 = vpack.c.bf16 %v1681_v50, %v1677_v49  ;;  %v1721_v49 = vld [vmem:[%s7930_s5 + $0x3a0] sm:$0xff] }
 0x1b3   : > { %v3900_v61 = vpack.c.bf16 %v1683_v55, %v1679_v54  ;;  %v1719_v50 = vld [vmem:[%s7930_s5 + $0x390] sm:$0xff]  ;;  %v1726_v55 = vld [vmem:[%s7930_s5 + $0x3c8] sm:$0xff] }
 0x1b5   : > { %3753 = vmatpush1.bf16.msra.mxu0 %v3752_v63  ;;  %3881 = vmatpush1.bf16.msra.mxu1 %v3880_v1  ;;  %v1689_v63 = vld [vmem:[%s7930_s5 + $0x2a0] sm:$0xff]  ;;  %v3774_v1 = vpack.c.bf16 %v1690_v26, %v1686_v56  ;;  %v1730_v56 = vld [vmem:[%s7930_s5 + $0x3e8] sm:$0xff]  ;;  %v1728_v26 = vld [vmem:[%s7930_s5 + $0x3d8] sm:$0xff] }
 0x1b6   : > { %3755 = vmatprep.subr.bf16.mxu0 %v3754_v6  ;;  %3883 = vmatprep.subr.bf16.mxu1 %v3882_v7  ;;  %v1691_v6 = vld [vmem:[%s7930_s5 + $0x2b0] sm:$0xff]  ;;  %v1694_v7 = vld [vmem:[%s7930_s5 + $0x2c8] sm:$0xff]  ;;  %v3776_v8 = vpack.c.bf16 %v1689_v63, %v1685_v62  ;;  %v3794_v57 = vpack.c.bf16 %v1730_v56, %v1726_v55  ;;  %v3922_v62 = vpack.c.bf16 %v1732_v59, %v1728_v26  ;;  %v1752_v26 = vld [vmem:[%s7930_s5 + $0x498] sm:$0xff] }
 0x1b7   : > { %v3904_v9 = vpack.c.bf16 %v1691_v6, %v1687_v4  ;;  %v1734_v6 = vld [vmem:[%s7930_s5 + $0x408] sm:$0xff] }
 0x1b8   : > { %v1754_v56 = vld [vmem:[%s7930_s5 + $0x4a8] sm:$0xff] }
 0x1b9   : > { %3757 = vmatpush1.bf16.msra.mxu0 %v3756_v11  ;;  %3885 = vmatpush1.bf16.msra.mxu1 %v3884_v12  ;;  %v1697_v11 = vld [vmem:[%s7930_s5 + $0x2e0] sm:$0xff]  ;;  %v3778_v12 = vpack.c.bf16 %v1698_v35, %v1694_v7  ;;  %v1738_v7 = vld [vmem:[%s7930_s5 + $0x428] sm:$0xff]  ;;  %v1736_v35 = vld [vmem:[%s7930_s5 + $0x418] sm:$0xff] }
 0x1ba   : > { %3759 = vmatprep.subr.bf16.mxu0 %v3758_v14  ;;  %3887 = vmatprep.subr.bf16.mxu1 %v3886_v15  ;;  %v1699_v14 = vld [vmem:[%s7930_s5 + $0x2f0] sm:$0xff]  ;;  %v1702_v15 = vld [vmem:[%s7930_s5 + $0x308] sm:$0xff]  ;;  %v3780_v17 = vpack.c.bf16 %v1697_v11, %v1693_v10  ;;  %v3798_v45 = vpack.c.bf16 %v1738_v7, %v1734_v6  ;;  %v6465_v10 = vld [vmem:[%s7929_s4] sm:$0xf]  ;;  %v6468_v11 = vsub.s32 1, %v5663_v24 }
 0x1bb   : > { %v3908_v18 = vpack.c.bf16 %v1699_v14, %v1695_v0  ;;  %v1758_v6 = vld [vmem:[%s7930_s5 + $0x4c8] sm:$0xff] }
 0x1bd   : > { %3761 = vmatpush1.bf16.msra.mxu0 %v3760_v20  ;;  %3889 = vmatpush1.bf16.msra.mxu1 %v3888_v21  ;;  %v1705_v20 = vld [vmem:[%s7930_s5 + $0x320] sm:$0xff]  ;;  %v3782_v21 = vpack.c.bf16 %v1706_v16, %v1702_v15  ;;  %v1268_v15 = vrot.slane %v6465_v10, %v6468_v11  ;;  %v6484_v16 = vsub.s32 3, %v5663_v24 }
 0x1be   : > { %3763 = vmatprep.subr.bf16.mxu0 %v3762_v25  ;;  %3891 = vmatprep.subr.bf16.mxu1 %v3890_v2  ;;  %v1707_v25 = vld [vmem:[%s7930_s5 + $0x330] sm:$0xff]  ;;  %v1710_v2 = vld [vmem:[%s7930_s5 + $0x348] sm:$0xff]  ;;  %v3784_v29 = vpack.c.bf16 %v1705_v20, %v1701_v19 }
 0x1bf   : > { %v3912_v30 = vpack.c.bf16 %v1707_v25, %v1703_v23 }
 0x1c1   : > { %3765 = vmatpush1.bf16.msra.mxu0 %v3764_v32  ;;  %3893 = vmatpush1.bf16.msra.mxu1 %v3892_v33  ;;  %v1713_v32 = vld [vmem:[%s7930_s5 + $0x360] sm:$0xff]  ;;  %v3786_v33 = vpack.c.bf16 %v1714_v27, %v1710_v2  ;;  %v1735_v27 = vld [vmem:[%s7930_s5 + $0x410] sm:$0xff] }
 0x1c2   : > { %3767 = vmatprep.subr.bf16.mxu0 %v3766_v37  ;;  %3895 = vmatprep.subr.bf16.mxu1 %v3894_v38  ;;  %v1715_v37 = vld [vmem:[%s7930_s5 + $0x370] sm:$0xff]  ;;  %v1718_v38 = vld [vmem:[%s7930_s5 + $0x388] sm:$0xff]  ;;  %v3788_v42 = vpack.c.bf16 %v1713_v32, %v1709_v31  ;;  %v1744_v31 = vld [vmem:[%s7930_s5 + $0x458] sm:$0xff] }
 0x1c3   : > { %v3916_v43 = vpack.c.bf16 %v1715_v37, %v1711_v36  ;;  %v1748_v32 = vld [vmem:[%s7930_s5 + $0x478] sm:$0xff] }
 0x1c5   : > { %3769 = vmatpush1.bf16.msra.mxu0 %v3768_v46  ;;  %3897 = vmatpush1.bf16.msra.mxu1 %v3896_v47  ;;  %v3790_v46 = vpack.c.bf16 %v1722_v39, %v1718_v38  ;;  %v3918_v47 = vpack.c.bf16 %v1724_v41, %v1720_v40  ;;  %v3928_v39 = vpack.c.bf16 %v1739_v28, %v1735_v27  ;;  %v1741_v40 = vld [vmem:[%s7930_s5 + $0x440] sm:$0xff] }
 0x1c6   : > { %3771 = vmatprep.subr.bf16.mxu0 %v3770_v52  ;;  %3899 = vmatprep.subr.bf16.mxu1 %v3898_v53  ;;  %v1723_v52 = vld [vmem:[%s7930_s5 + $0x3b0] sm:$0xff]  ;;  %v3792_v53 = vpack.c.bf16 %v1721_v49, %v1717_v44  ;;  %v1745_v49 = vld [vmem:[%s7930_s5 + $0x460] sm:$0xff] }
 0x1c7   : > { %v3920_v54 = vpack.c.bf16 %v1723_v52, %v1719_v50  ;;  %v1743_v50 = vld [vmem:[%s7930_s5 + $0x450] sm:$0xff]  ;;  %v1765_v28 = vld [vmem:[%s7930_s5 + $0x500] sm:$0xff] }
 0x1c8   : > { %v1747_v52 = vld [vmem:[%s7930_s5 + $0x470] sm:$0xff] }
 0x1c9   : > { %3773 = vmatpush1.bf16.msra.mxu0 %v3772_v60  ;;  %3901 = vmatpush1.bf16.msra.mxu1 %v3900_v61  ;;  %v1725_v60 = vld [vmem:[%s7930_s5 + $0x3c0] sm:$0xff] }
 0x1ca   : > { %3775 = vmatprep.subr.bf16.mxu0 %v3774_v1  ;;  %3903 = vmatprep.subr.bf16.mxu1 %v3902_v3  ;;  %v1729_v61 = vld [vmem:[%s7930_s5 + $0x3e0] sm:$0xff]  ;;  %v1727_v1 = vld [vmem:[%s7930_s5 + $0x3d0] sm:$0xff] }
 0x1cb   : > { %v3796_v63 = vpack.c.bf16 %v1729_v61, %v1725_v60  ;;  %v1731_v3 = vld [vmem:[%s7930_s5 + $0x3f0] sm:$0xff]  ;;  %v3804_v60 = vpack.c.bf16 %v1745_v49, %v1741_v40  ;;  %v3932_v61 = vpack.c.bf16 %v1747_v52, %v1743_v50  ;;  %v1780_v40 = vld [vmem:[%s7930_s5 + $0x578] sm:$0xff] }
 0x1cc   : > { %v3924_v4 = vpack.c.bf16 %v1731_v3, %v1727_v1  ;;  %v1751_v3 = vld [vmem:[%s7930_s5 + $0x490] sm:$0xff] }
 0x1cd   : > { %3777 = vmatpush1.bf16.msra.mxu0 %v3776_v8  ;;  %3905 = vmatpush1.bf16.msra.mxu1 %v3904_v9  ;;  %v3926_v8 = vpack.c.bf16 %v1740_v5, %v1736_v35  ;;  %v6460_v9 = vsub.s32 0, %v5663_v24  ;;  %v1760_v5 = vld [vmem:[%s7930_s5 + $0x4d8] sm:$0xff]  ;;  %v1775_v52 = vld [vmem:[%s7930_s5 + $0x550] sm:$0xff] }
 0x1ce   : > { %3779 = vmatprep.subr.bf16.mxu0 %v3778_v12  ;;  %3907 = vmatprep.subr.bf16.mxu1 %v3906_v13  ;;  %v6473_v12 = vld [vmem:[%s7927_s2] sm:$0xff] }
 0x1cf   : > { %v650_v13 = vrot.slane %v6473_v12, %v6460_v9  ;;  %v1264_v0 = vrot.slane %v6465_v10, %v6460_v9  ;;  %v654_v14 = vrot.slane %v6473_v12, %v6468_v11 }
 0x1d1   : > { %3781 = vmatpush1.bf16.msra.mxu0 %v3780_v17  ;;  %3909 = vmatpush1.bf16.msra.mxu1 %v3908_v18  ;;  %v4310_v51 = vadd.f32 %v1264_v0, %v650_v13  ;;  %v4312_v58 = vadd.f32 %v1268_v15, %v654_v14  ;;  %v662_v17 = vrot.slane %v6473_v12, %v6484_v16  ;;  %v1757_v15 = vld [vmem:[%s7930_s5 + $0x4c0] sm:$0xff] }
 0x1d2   : > { %3783 = vmatprep.subr.bf16.mxu0 %v3782_v21  ;;  %3911 = vmatprep.subr.bf16.mxu1 %v3910_v22  ;;  %v1276_v18 = vrot.slane %v6465_v10, %v6484_v16  ;;  %v1733_v21 = vld [vmem:[%s7930_s5 + $0x400] sm:$0xff] }
 0x1d3   : > { %v1737_v22 = vld [vmem:[%s7930_s5 + $0x420] sm:$0xff] }
 0x1d4   : > { %v3800_v38 = vpack.c.bf16 %v1737_v22, %v1733_v21  ;;  %v1766_v21 = vld [vmem:[%s7930_s5 + $0x508] sm:$0xff] }
 0x1d5   : > { %3785 = vmatpush1.bf16.msra.mxu0 %v3784_v29  ;;  %3913 = vmatpush1.bf16.msra.mxu1 %v3912_v30  ;;  %v1746_v30 = vld [vmem:[%s7930_s5 + $0x468] sm:$0xff] }
 0x1d6   : > { %3787 = vmatprep.subr.bf16.mxu0 %v3786_v33  ;;  %3915 = vmatprep.subr.bf16.mxu1 %v3914_v34  ;;  %v6516_v33 = vadd.f32 %v1276_v18, %v662_v17  ;;  %v1759_v18 = vld [vmem:[%s7930_s5 + $0x4d0] sm:$0xff]  ;;  %v1770_v22 = vld [vmem:[%s7930_s5 + $0x528] sm:$0xff] }
 0x1d9   : > { %3789 = vmatpush1.bf16.msra.mxu0 %v3788_v42  ;;  %3917 = vmatpush1.bf16.msra.mxu1 %v3916_v43 }
 0x1da   : > { %3791 = vmatprep.subr.bf16.mxu0 %v3790_v46  ;;  %3919 = vmatprep.subr.bf16.mxu1 %v3918_v47  ;;  %v3802_v46 = vpack.c.bf16 %v1746_v30, %v1742_v48  ;;  %v3930_v47 = vpack.c.bf16 %v1748_v32, %v1744_v31  ;;  %v1769_v48 = vld [vmem:[%s7930_s5 + $0x520] sm:$0xff]  ;;  %v1767_v31 = vld [vmem:[%s7930_s5 + $0x510] sm:$0xff] }
 0x1db   : > { %v1771_v32 = vld [vmem:[%s7930_s5 + $0x530] sm:$0xff] }
 0x1dd   : > { %3793 = vmatpush1.bf16.msra.mxu0 %v3792_v53  ;;  %3921 = vmatpush1.bf16.msra.mxu1 %v3920_v54  ;;  %v1750_v54 = vld [vmem:[%s7930_s5 + $0x488] sm:$0xff] }
 0x1de   : > { %3795 = vmatprep.subr.bf16.mxu0 %v3794_v57  ;;  %3923 = vmatprep.subr.bf16.mxu1 %v3922_v62  ;;  %v1756_v57 = vld [vmem:[%s7930_s5 + $0x4b8] sm:$0xff]  ;;  %v1749_v62 = vld [vmem:[%s7930_s5 + $0x480] sm:$0xff]  ;;  %v3806_v7 = vpack.c.bf16 %v1754_v56, %v1750_v54  ;;  %v1782_v54 = vld [vmem:[%s7930_s5 + $0x588] sm:$0xff] }
 0x1df   : > { %v3934_v35 = vpack.c.bf16 %v1756_v57, %v1752_v26  ;;  %v1784_v56 = vld [vmem:[%s7930_s5 + $0x598] sm:$0xff] }
 0x1e0   : > { %v1788_v26 = vld [vmem:[%s7930_s5 + $0x5b8] sm:$0xff] }
 0x1e1   : > { %3797 = vmatpush1.bf16.msra.mxu0 %v3796_v63  ;;  %3925 = vmatpush1.bf16.msra.mxu1 %v3924_v4  ;;  %v1753_v63 = vld [vmem:[%s7930_s5 + $0x4a0] sm:$0xff]  ;;  %v1755_v4 = vld [vmem:[%s7930_s5 + $0x4b0] sm:$0xff] }
 0x1e2   : > { %3799 = vmatprep.subr.bf16.mxu0 %v3798_v45  ;;  %3927 = vmatprep.subr.bf16.mxu1 %v3926_v8  ;;  %v1762_v45 = vld [vmem:[%s7930_s5 + $0x4e8] sm:$0xff]  ;;  %v1764_v8 = vld [vmem:[%s7930_s5 + $0x4f8] sm:$0xff]  ;;  %v3808_v0 = vpack.c.bf16 %v1753_v63, %v1749_v62  ;;  %v3936_v14 = vpack.c.bf16 %v1755_v4, %v1751_v3  ;;  %v1785_v62 = vld [vmem:[%s7930_s5 + $0x5a0] sm:$0xff]  ;;  %v3950_v3 = vpack.c.bf16 %v1788_v26, %v1784_v56 }
 0x1e3   : > { %v3938_v17 = vpack.c.bf16 %v1764_v8, %v1760_v5  ;;  %v1783_v4 = vld [vmem:[%s7930_s5 + $0x590] sm:$0xff]  ;;  %v1796_v5 = vld [vmem:[%s7930_s5 + $0x5f8] sm:$0xff] }
 0x1e4   : > { %v1820_v56 = vld [vmem:[%s7930_s5 + $0x6b8] sm:$0xff] }
 0x276   : > { %v1424_v19 = vpop.f32.mrb[0].mxu0  ;;  %v6490_v20 = vpop.f32.mrb[0].mxu1 }
 0x277   : > { %v4311_v23 = vadd.f32 %v4310_v51, %v1424_v19  ;;  %v1426_v25 = vpop.f32.mrb[1].mxu0  ;;  %v1580_v2 = vpop.f32.mrb[1].mxu1  ;;  %v1763_v19 = vld [vmem:[%s7930_s5 + $0x4f0] sm:$0xff] }
 0x278   : > { %v4313_v29 = vadd.f32 %v4312_v58, %v1426_v25  ;;  %v4321_v55 = vadd.f32 %v6516_v33, %v1580_v2  ;;  %v1772_v25 = vld [vmem:[%s7930_s5 + $0x538] sm:$0xff]  ;;  %v3940_v27 = vpack.c.bf16 %v1763_v19, %v1759_v18  ;;  %v1795_v18 = vld [vmem:[%s7930_s5 + $0x5f0] sm:$0xff]  ;;  %v1798_v19 = vld [vmem:[%s7930_s5 + $0x608] sm:$0xff] }
 0x279   : > { %v6525_v41 = vmax.f32 %v4311_v23, 0.0  ;;  %v1768_v23 = vld [vmem:[%s7930_s5 + $0x518] sm:$0xff] }
 0x27a   : > { %v6518_v34 = vmax.f32 %v4313_v29, 0.0  ;;  %v1430_v36 = vpop.f32.mrb[2].mxu0  ;;  %v6520_v37 = vpop.f32.mrb[2].mxu1  ;;  %v6585_v13 = vmax.f32 %v4321_v55, 0.0  ;;  %v3814_v29 = vpack.c.bf16 %v1770_v22, %v1766_v21  ;;  %v3942_v30 = vpack.c.bf16 %v1772_v25, %v1768_v23  ;;  %v1786_v55 = vld [vmem:[%s7930_s5 + $0x5a8] sm:$0xff]  ;;  %v1800_v22 = vld [vmem:[%s7930_s5 + $0x618] sm:$0xff] }
 0x27b   : > { %v4315_v42 = vadd.f32 %v4310_v51, %v1430_v36  ;;  %v1432_v43 = vpop.f32.mrb[3].mxu0  ;;  %v6527_v44 = vpop.f32.mrb[3].mxu1  ;;  %v1761_v51 = vld [vmem:[%s7930_s5 + $0x4e0] sm:$0xff]  ;;  %v1774_v36 = vld [vmem:[%s7930_s5 + $0x548] sm:$0xff]  ;;  %v3822_v63 = vpack.c.bf16 %v1786_v55, %v1782_v54  ;;  %v1804_v23 = vld [vmem:[%s7930_s5 + $0x638] sm:$0xff] }
 0x27c   : > { %v4317_v53 = vadd.f32 %v4312_v58, %v1432_v43  ;;  %1947 = vmatprep.mubr.f32.mxu0 %v6518_v34  ;;  %2101 = vmatprep.mubr.f32.mxu1 %v6518_v34  ;;  %v3810_v58 = vpack.c.bf16 %v1762_v45, %v1758_v6  ;;  %v3812_v2 = vpack.c.bf16 %v1761_v51, %v1757_v15  ;;  %v1787_v6 = vld [vmem:[%s7930_s5 + $0x5b0] sm:$0xff]  ;;  %v1792_v45 = vld [vmem:[%s7930_s5 + $0x5d8] sm:$0xff]  ;;  %v1793_v15 = vld [vmem:[%s7930_s5 + $0x5e0] sm:$0xff] }
 0x27d   : > { %1948 = vmatmul.mubr.f32.vlgmr.msra.gmra.mrb[8].mxu0 %v6525_v41  ;;  %2102 = vmatmul.mubr.f32.vlgmr.msra.gmra.mrb[8].mxu1 %v6525_v41  ;;  %v6563_v1 = vmax.f32 %v4315_v42, 0.0  ;;  %v3816_v42 = vpack.c.bf16 %v1769_v48, %v1765_v28  ;;  %v3944_v43 = vpack.c.bf16 %v1771_v32, %v1767_v31  ;;  %v1802_v21 = vld [vmem:[%s7930_s5 + $0x628] sm:$0xff]  ;;  %v1801_v28 = vld [vmem:[%s7930_s5 + $0x620] sm:$0xff]  ;;  %v1803_v31 = vld [vmem:[%s7930_s5 + $0x630] sm:$0xff] }
 0x27e   : > { %v6555_v59 = vmax.f32 %v4317_v53, 0.0  ;;  %3801 = vmatpush1.bf16.msra.mxu0 %v3800_v38  ;;  %3929 = vmatpush1.bf16.msra.mxu1 %v3928_v39  ;;  %v1778_v38 = vld [vmem:[%s7930_s5 + $0x568] sm:$0xff]  ;;  %v1776_v39 = vld [vmem:[%s7930_s5 + $0x558] sm:$0xff]  ;;  %v1779_v53 = vld [vmem:[%s7930_s5 + $0x570] sm:$0xff]  ;;  %v3830_v48 = vpack.c.bf16 %v1802_v21, %v1798_v19 }
 0x27f   : > { %3803 = vmatprep.subr.bf16.mxu0 %v3802_v46  ;;  %3931 = vmatprep.subr.bf16.mxu1 %v3930_v47  ;;  %v1773_v46 = vld [vmem:[%s7930_s5 + $0x540] sm:$0xff]  ;;  %v3818_v49 = vpack.c.bf16 %v1778_v38, %v1774_v36  ;;  %v3946_v50 = vpack.c.bf16 %v1780_v40, %v1776_v39  ;;  %v1806_v32 = vld [vmem:[%s7930_s5 + $0x648] sm:$0xff]  ;;  %v1808_v38 = vld [vmem:[%s7930_s5 + $0x658] sm:$0xff] }
 0x280   : > { %1953 = vmatprep.mubr.f32.mxu0 %v6555_v59  ;;  %2107 = vmatprep.mubr.f32.mxu1 %v6555_v59  ;;  %v1777_v47 = vld [vmem:[%s7930_s5 + $0x560] sm:$0xff]  ;;  %v1810_v36 = vld [vmem:[%s7930_s5 + $0x668] sm:$0xff]  ;;  %v1812_v39 = vld [vmem:[%s7930_s5 + $0x678] sm:$0xff] }
 0x281   : > { %1954 = vmatmul.mubr.f32.gmra.mrb[10].mxu0 %v6563_v1  ;;  %2108 = vmatmul.mubr.f32.gmra.mrb[10].mxu1 %v6563_v1  ;;  %v3820_v57 = vpack.c.bf16 %v1777_v47, %v1773_v46  ;;  %v1809_v46 = vld [vmem:[%s7930_s5 + $0x660] sm:$0xff]  ;;  %v3834_v47 = vpack.c.bf16 %v1810_v36, %v1806_v32  ;;  %v1818_v54 = vld [vmem:[%s7930_s5 + $0x6a8] sm:$0xff]  ;;  %v1816_v55 = vld [vmem:[%s7930_s5 + $0x698] sm:$0xff] }
 0x282   : > { %3805 = vmatpush1.bf16.msra.mxu0 %v3804_v60  ;;  %3933 = vmatpush1.bf16.msra.mxu1 %v3932_v61  ;;  %v3948_v60 = vpack.c.bf16 %v1779_v53, %v1775_v52  ;;  %v1781_v61 = vld [vmem:[%s7930_s5 + $0x580] sm:$0xff]  ;;  %v1811_v52 = vld [vmem:[%s7930_s5 + $0x670] sm:$0xff]  ;;  %v1814_v53 = vld [vmem:[%s7930_s5 + $0x688] sm:$0xff] }
 0x283   : > { %2024 = vmatprep.mubr.f32.mxu0 %v6585_v13  ;;  %2178 = vmatprep.mubr.f32.mxu1 %v6585_v13  ;;  %v3824_v8 = vpack.c.bf16 %v1785_v62, %v1781_v61  ;;  %v1817_v61 = vld [vmem:[%s7930_s5 + $0x6a0] sm:$0xff]  ;;  %v3838_v62 = vpack.c.bf16 %v1818_v54, %v1814_v53  ;;  %v1834_v19 = vld [vmem:[%s7930_s5 + $0x728] sm:$0xff]  ;;  %v1832_v21 = vld [vmem:[%s7930_s5 + $0x718] sm:$0xff] }
 0x284   : > { %3807 = vmatprep.subr.bf16.mxu0 %v3806_v7  ;;  %3935 = vmatprep.subr.bf16.mxu1 %v3934_v35  ;;  %v1790_v7 = vld [vmem:[%s7930_s5 + $0x5c8] sm:$0xff]  ;;  %v1840_v36 = vld [vmem:[%s7930_s5 + $0x758] sm:$0xff] }
 0x285   : > { %v1794_v35 = vld [vmem:[%s7930_s5 + $0x5e8] sm:$0xff]  ;;  %v1848_v54 = vld [vmem:[%s7930_s5 + $0x798] sm:$0xff] }
 0x286   : > { %3809 = vmatpush1.bf16.msra.mxu0 %v3808_v0  ;;  %3937 = vmatpush1.bf16.msra.mxu1 %v3936_v14  ;;  %v3952_v0 = vpack.c.bf16 %v1787_v6, %v1783_v4  ;;  %v1789_v14 = vld [vmem:[%s7930_s5 + $0x5c0] sm:$0xff]  ;;  %v3826_v51 = vpack.c.bf16 %v1794_v35, %v1790_v7  ;;  %v1819_v4 = vld [vmem:[%s7930_s5 + $0x6b0] sm:$0xff]  ;;  %v1822_v6 = vld [vmem:[%s7930_s5 + $0x6c8] sm:$0xff] }
 0x287   : > { %3811 = vmatprep.subr.bf16.mxu0 %v3810_v58  ;;  %3939 = vmatprep.subr.bf16.mxu1 %v3938_v17  ;;  %v3954_v58 = vpack.c.bf16 %v1796_v5, %v1792_v45  ;;  %v1791_v17 = vld [vmem:[%s7930_s5 + $0x5d0] sm:$0xff]  ;;  %v3828_v25 = vpack.c.bf16 %v1793_v15, %v1789_v14  ;;  %v1826_v7 = vld [vmem:[%s7930_s5 + $0x6e8] sm:$0xff]  ;;  %v1824_v35 = vld [vmem:[%s7930_s5 + $0x6d8] sm:$0xff] }
 0x288   : > { %v1828_v45 = vld [vmem:[%s7930_s5 + $0x6f8] sm:$0xff]  ;;  %v1825_v14 = vld [vmem:[%s7930_s5 + $0x6e0] sm:$0xff]  ;;  %v3842_v15 = vpack.c.bf16 %v1826_v7, %v1822_v6  ;;  %v1842_v32 = vld [vmem:[%s7930_s5 + $0x768] sm:$0xff] }
 0x289   : > { %v1850_v53 = vld [vmem:[%s7930_s5 + $0x7a8] sm:$0xff]  ;;  %v1856_v7 = vld [vmem:[%s7930_s5 + $0x7d8] sm:$0xff] }
 0x28a   : > { %3813 = vmatpush1.bf16.msra.mxu0 %v3812_v2  ;;  %3941 = vmatpush1.bf16.msra.mxu1 %v3940_v27  ;;  %v3956_v2 = vpack.c.bf16 %v1795_v18, %v1791_v17  ;;  %v1797_v27 = vld [vmem:[%s7930_s5 + $0x600] sm:$0xff]  ;;  %v1827_v17 = vld [vmem:[%s7930_s5 + $0x6f0] sm:$0xff]  ;;  %v1830_v18 = vld [vmem:[%s7930_s5 + $0x708] sm:$0xff] }
 0x28b   : > { %3815 = vmatprep.subr.bf16.mxu0 %v3814_v29  ;;  %3943 = vmatprep.subr.bf16.mxu1 %v3942_v30  ;;  %v3958_v29 = vpack.c.bf16 %v1804_v23, %v1800_v22  ;;  %v1799_v30 = vld [vmem:[%s7930_s5 + $0x610] sm:$0xff]  ;;  %v3832_v40 = vpack.c.bf16 %v1801_v28, %v1797_v27  ;;  %v1836_v22 = vld [vmem:[%s7930_s5 + $0x738] sm:$0xff]  ;;  %v1833_v27 = vld [vmem:[%s7930_s5 + $0x720] sm:$0xff]  ;;  %v3846_v28 = vpack.c.bf16 %v1834_v19, %v1830_v18 }
 0x28c   : > { %v1854_v6 = vld [vmem:[%s7930_s5 + $0x7c8] sm:$0xff] }
 0x28d   : > { %v2200_v18 = vld [vmem:[%s7932_s7 + $0x8] sm:$0xff] }
 0x28e   : > { %3817 = vmatpush1.bf16.msra.mxu0 %v3816_v42  ;;  %3945 = vmatpush1.bf16.msra.mxu1 %v3944_v43  ;;  %v3960_v42 = vpack.c.bf16 %v1803_v31, %v1799_v30  ;;  %v1805_v43 = vld [vmem:[%s7930_s5 + $0x640] sm:$0xff]  ;;  %v1835_v30 = vld [vmem:[%s7930_s5 + $0x730] sm:$0xff]  ;;  %v1838_v31 = vld [vmem:[%s7930_s5 + $0x748] sm:$0xff] }
 0x28f   : > { %3819 = vmatprep.subr.bf16.mxu0 %v3818_v49  ;;  %3947 = vmatprep.subr.bf16.mxu1 %v3946_v50  ;;  %v3962_v49 = vpack.c.bf16 %v1812_v39, %v1808_v38  ;;  %v1807_v50 = vld [vmem:[%s7930_s5 + $0x650] sm:$0xff]  ;;  %v3836_v26 = vpack.c.bf16 %v1809_v46, %v1805_v43  ;;  %v1844_v38 = vld [vmem:[%s7930_s5 + $0x778] sm:$0xff]  ;;  %v6832_v39 = vsub.s32 2, %v5663_v24  ;;  %v1837_v43 = vld [vmem:[%s7930_s5 + $0x740] sm:$0xff] }
 0x290   : > { %v1841_v46 = vld [vmem:[%s7930_s5 + $0x760] sm:$0xff]  ;;  %v1839_v24 = vld [vmem:[%s7930_s5 + $0x750] sm:$0xff]  ;;  %v2204_v19 = vld [vmem:[%s7932_s7 + $0x28] sm:$0xff] }
 0x292   : > { %3821 = vmatpush1.bf16.msra.mxu0 %v3820_v57  ;;  %3949 = vmatpush1.bf16.msra.mxu1 %v3948_v60  ;;  %v3964_v57 = vpack.c.bf16 %v1811_v52, %v1807_v50  ;;  %v1813_v60 = vld [vmem:[%s7930_s5 + $0x680] sm:$0xff]  ;;  %v1843_v50 = vld [vmem:[%s7930_s5 + $0x770] sm:$0xff]  ;;  %v1846_v52 = vld [vmem:[%s7930_s5 + $0x788] sm:$0xff] }
 0x293   : > { %3823 = vmatprep.subr.bf16.mxu0 %v3822_v63  ;;  %3951 = vmatprep.subr.bf16.mxu1 %v3950_v3  ;;  %v3966_v63 = vpack.c.bf16 %v1820_v56, %v1816_v55  ;;  %v1815_v3 = vld [vmem:[%s7930_s5 + $0x690] sm:$0xff]  ;;  %v3840_v5 = vpack.c.bf16 %v1817_v61, %v1813_v60  ;;  %v1852_v55 = vld [vmem:[%s7930_s5 + $0x7b8] sm:$0xff]  ;;  %v658_v56 = vrot.slane %v6473_v12, %v6832_v39  ;;  %v1845_v60 = vld [vmem:[%s7930_s5 + $0x780] sm:$0xff] }
 0x294   : > { %v1849_v61 = vld [vmem:[%s7930_s5 + $0x7a0] sm:$0xff]  ;;  %v1847_v12 = vld [vmem:[%s7930_s5 + $0x790] sm:$0xff] }
 0x296   : > { %3825 = vmatpush1.bf16.msra.mxu0 %v3824_v8  ;;  %3953 = vmatpush1.bf16.msra.mxu1 %v3952_v0  ;;  %v3968_v8 = vpack.c.bf16 %v1819_v4, %v1815_v3  ;;  %v1821_v0 = vld [vmem:[%s7930_s5 + $0x6c0] sm:$0xff]  ;;  %v3982_v3 = vpack.c.bf16 %v1852_v55, %v1848_v54  ;;  %v1851_v4 = vld [vmem:[%s7930_s5 + $0x7b0] sm:$0xff]  ;;  %v2220_v54 = vld [vmem:[%s7932_s7 + $0xa8] sm:$0xff] }
 0x297   : > { %3827 = vmatprep.subr.bf16.mxu0 %v3826_v51  ;;  %3955 = vmatprep.subr.bf16.mxu1 %v3954_v58  ;;  %v3970_v51 = vpack.c.bf16 %v1828_v45, %v1824_v35  ;;  %v1823_v58 = vld [vmem:[%s7930_s5 + $0x6d0] sm:$0xff]  ;;  %v3844_v23 = vpack.c.bf16 %v1825_v14, %v1821_v0  ;;  %v1860_v35 = vld [vmem:[%s7930_s5 + $0x7f8] sm:$0xff]  ;;  %v3856_v45 = vpack.c.bf16 %v1849_v61, %v1845_v60  ;;  %v1857_v0 = vld [vmem:[%s7930_s5 + $0x7e0] sm:$0xff] }
 0x298   : > { %v2218_v55 = vld [vmem:[%s7932_s7 + $0x98] sm:$0xff]  ;;  %v2215_v61 = vld [vmem:[%s7932_s7 + $0x80] sm:$0xff] }
 0x29a   : > { %3829 = vmatpush1.bf16.msra.mxu0 %v3828_v25  ;;  %3957 = vmatpush1.bf16.msra.mxu1 %v3956_v2  ;;  %v3972_v25 = vpack.c.bf16 %v1827_v17, %v1823_v58  ;;  %v1829_v2 = vld [vmem:[%s7930_s5 + $0x700] sm:$0xff]  ;;  %v1855_v58 = vld [vmem:[%s7930_s5 + $0x7d0] sm:$0xff] }
 0x29b   : > { %3831 = vmatprep.subr.bf16.mxu0 %v3830_v48  ;;  %3959 = vmatprep.subr.bf16.mxu1 %v3958_v29  ;;  %v3974_v48 = vpack.c.bf16 %v1836_v22, %v1832_v21  ;;  %v1831_v29 = vld [vmem:[%s7930_s5 + $0x710] sm:$0xff]  ;;  %v2202_v21 = vld [vmem:[%s7932_s7 + $0x18] sm:$0xff] }
 0x29c   : > { %v1859_v17 = vld [vmem:[%s7930_s5 + $0x7f0] sm:$0xff]  ;;  %v2206_v22 = vld [vmem:[%s7932_s7 + $0x38] sm:$0xff] }
 0x29e   : > { %3833 = vmatpush1.bf16.msra.mxu0 %v3832_v40  ;;  %3961 = vmatpush1.bf16.msra.mxu1 %v3960_v42  ;;  %v3848_v40 = vpack.c.bf16 %v1833_v27, %v1829_v2  ;;  %v3976_v42 = vpack.c.bf16 %v1835_v30, %v1831_v29  ;;  %v3990_v27 = vpack.c.bf16 %v2204_v19, %v2200_v18  ;;  %v2203_v29 = vld [vmem:[%s7932_s7 + $0x20] sm:$0xff]  ;;  %v2236_v18 = vld [vmem:[%s7932_s7 + $0x128] sm:$0xff]  ;;  %v2234_v19 = vld [vmem:[%s7932_s7 + $0x118] sm:$0xff] }
 0x29f   : > { %3835 = vmatprep.subr.bf16.mxu0 %v3834_v47  ;;  %3963 = vmatprep.subr.bf16.mxu1 %v3962_v49  ;;  %v3850_v47 = vpack.c.bf16 %v1842_v32, %v1838_v31  ;;  %v3978_v49 = vpack.c.bf16 %v1844_v38, %v1840_v36  ;;  %v4325_v30 = vadd.f32 %v6516_v33, %v6527_v44  ;;  %v2201_v31 = vld [vmem:[%s7932_s7 + $0x10] sm:$0xff]  ;;  %v2208_v32 = vld [vmem:[%s7932_s7 + $0x48] sm:$0xff]  ;;  %v2210_v33 = vld [vmem:[%s7932_s7 + $0x58] sm:$0xff] }
 0x2a0   : > { %v2212_v36 = vld [vmem:[%s7932_s7 + $0x68] sm:$0xff]  ;;  %v2214_v44 = vld [vmem:[%s7932_s7 + $0x78] sm:$0xff] }
 0x2a2   : > { %3837 = vmatpush1.bf16.msra.mxu0 %v3836_v26  ;;  %3965 = vmatpush1.bf16.msra.mxu1 %v3964_v57  ;;  %v3852_v26 = vpack.c.bf16 %v1841_v46, %v1837_v43  ;;  %v3980_v57 = vpack.c.bf16 %v1843_v50, %v1839_v24  ;;  %v2207_v46 = vld [vmem:[%s7932_s7 + $0x40] sm:$0xff]  ;;  %v3994_v24 = vpack.c.bf16 %v2212_v36, %v2208_v32  ;;  %v2246_v32 = vld [vmem:[%s7932_s7 + $0x178] sm:$0xff] }
 0x2a3   : > { %3839 = vmatprep.subr.bf16.mxu0 %v3838_v62  ;;  %3967 = vmatprep.subr.bf16.mxu1 %v3966_v63  ;;  %v1272_v62 = vrot.slane %v6465_v10, %v6832_v39  ;;  %v3854_v63 = vpack.c.bf16 %v1850_v53, %v1846_v52  ;;  %v1858_v10 = vld [vmem:[%s7930_s5 + $0x7e8] sm:$0xff]  ;;  %v4122_v50 = vpack.c.bf16 %v2214_v44, %v2210_v33  ;;  %v2213_v52 = vld [vmem:[%s7932_s7 + $0x70] sm:$0xff]  ;;  %v2239_v44 = vld [vmem:[%s7932_s7 + $0x140] sm:$0xff] }
 0x2a4   : > { %v2216_v53 = vld [vmem:[%s7932_s7 + $0x88] sm:$0xff] }
 0x2a5   : > { %v4318_v14 = vadd.f32 %v1272_v62, %v658_v56  ;;  %v2222_v56 = vld [vmem:[%s7932_s7 + $0xb8] sm:$0xff]  ;;  %v2219_v62 = vld [vmem:[%s7932_s7 + $0xa0] sm:$0xff] }
 0x2a6   : > { %3841 = vmatpush1.bf16.msra.mxu0 %v3840_v5  ;;  %3969 = vmatpush1.bf16.msra.mxu1 %v3968_v8  ;;  %v3984_v5 = vpack.c.bf16 %v1851_v4, %v1847_v12  ;;  %v1853_v8 = vld [vmem:[%s7930_s5 + $0x7c0] sm:$0xff]  ;;  %v2217_v12 = vld [vmem:[%s7932_s7 + $0x90] sm:$0xff] }
 0x2a7   : > { %3843 = vmatprep.subr.bf16.mxu0 %v3842_v15  ;;  %3971 = vmatprep.subr.bf16.mxu1 %v3970_v51  ;;  %v3858_v15 = vpack.c.bf16 %v1858_v10, %v1854_v6  ;;  %v3986_v51 = vpack.c.bf16 %v1860_v35, %v1856_v7  ;;  %v4319_v2 = vadd.f32 %v4318_v14, %v6490_v20  ;;  %v2205_v20 = vld [vmem:[%s7932_s7 + $0x30] sm:$0xff]  ;;  %v2224_v6 = vld [vmem:[%s7932_s7 + $0xc8] sm:$0xff]  ;;  %v2226_v7 = vld [vmem:[%s7932_s7 + $0xd8] sm:$0xff] }
 0x2a8   : > { %v4120_v43 = vpack.c.bf16 %v2205_v20, %v2201_v31  ;;  %v2221_v4 = vld [vmem:[%s7932_s7 + $0xb0] sm:$0xff]  ;;  %v2228_v10 = vld [vmem:[%s7932_s7 + $0xe8] sm:$0xff]  ;;  %v2230_v35 = vld [vmem:[%s7932_s7 + $0xf8] sm:$0xff] }
 0x2a9   : > { %v6937_v38 = vmax.f32 %v4319_v2, 0.0  ;;  %v2235_v2 = vld [vmem:[%s7932_s7 + $0x120] sm:$0xff]  ;;  %v2244_v31 = vld [vmem:[%s7932_s7 + $0x168] sm:$0xff]  ;;  %v2242_v20 = vld [vmem:[%s7932_s7 + $0x158] sm:$0xff] }
 0x2aa   : > { %3845 = vmatpush1.bf16.msra.mxu0 %v3844_v23  ;;  %3973 = vmatpush1.bf16.msra.mxu1 %v3972_v25  ;;  %v3860_v23 = vpack.c.bf16 %v1857_v0, %v1853_v8  ;;  %v3988_v25 = vpack.c.bf16 %v1859_v17, %v1855_v58  ;;  %v2223_v8 = vld [vmem:[%s7932_s7 + $0xc0] sm:$0xff]  ;;  %v2229_v58 = vld [vmem:[%s7932_s7 + $0xf0] sm:$0xff]  ;;  %v2232_v17 = vld [vmem:[%s7932_s7 + $0x108] sm:$0xff] }
 0x2ab   : > { %3847 = vmatprep.subr.bf16.mxu0 %v3846_v28  ;;  %3975 = vmatprep.subr.bf16.mxu1 %v3974_v48  ;;  %v4118_v28 = vpack.c.bf16 %v2206_v22, %v2202_v21  ;;  %v2199_v48 = vld [vmem:[%s7932_s7] sm:$0xff]  ;;  %v2238_v21 = vld [vmem:[%s7932_s7 + $0x138] sm:$0xff] }
 0x2ac   : > { %v2227_v0 = vld [vmem:[%s7932_s7 + $0xe0] sm:$0xff] }
 0x2ad   : > { %v4004_v22 = vpack.c.bf16 %v2227_v0, %v2223_v8  ;;  %v2257_v8 = vld [vmem:[%s7932_s7 + $0x1d0] sm:$0xff] }
 0x2ae   : > { %3849 = vmatpush1.bf16.msra.mxu0 %v3848_v40  ;;  %3977 = vmatpush1.bf16.msra.mxu1 %v3976_v42  ;;  %v4323_v40 = vadd.f32 %v4318_v14, %v6520_v37  ;;  %v3992_v42 = vpack.c.bf16 %v2203_v29, %v2199_v48  ;;  %v2209_v37 = vld [vmem:[%s7932_s7 + $0x50] sm:$0xff]  ;;  %v4002_v14 = vpack.c.bf16 %v2228_v10, %v2224_v6 }
 0x2af   : > { %3851 = vmatprep.subr.bf16.mxu0 %v3850_v47  ;;  %3979 = vmatprep.subr.bf16.mxu1 %v3978_v49  ;;  %v2211_v47 = vld [vmem:[%s7932_s7 + $0x60] sm:$0xff]  ;;  %v6946_v49 = vmax.f32 %v4325_v30, 0.0  ;;  %v4124_v60 = vpack.c.bf16 %v2213_v52, %v2209_v37  ;;  %v2233_v48 = vld [vmem:[%s7932_s7 + $0x110] sm:$0xff]  ;;  %v2240_v30 = vld [vmem:[%s7932_s7 + $0x148] sm:$0xff] }
 0x2b0   : > { %v2237_v29 = vld [vmem:[%s7932_s7 + $0x130] sm:$0xff]  ;;  %v2250_v37 = vld [vmem:[%s7932_s7 + $0x198] sm:$0xff] }
 0x2b1   : > { %v4136_v33 = vpack.c.bf16 %v2237_v29, %v2233_v48  ;;  %v2254_v52 = vld [vmem:[%s7932_s7 + $0x1b8] sm:$0xff]  ;;  %v2261_v0 = vld [vmem:[%s7932_s7 + $0x1f0] sm:$0xff] }
 0x2b2   : > { %3853 = vmatpush1.bf16.msra.mxu0 %v3852_v26  ;;  %3981 = vmatpush1.bf16.msra.mxu1 %v3980_v57  ;;  %v6970_v26 = vmax.f32 %v4323_v40, 0.0  ;;  %v3996_v57 = vpack.c.bf16 %v2211_v47, %v2207_v46  ;;  %v2243_v40 = vld [vmem:[%s7932_s7 + $0x160] sm:$0xff]  ;;  %v2241_v46 = vld [vmem:[%s7932_s7 + $0x150] sm:$0xff]  ;;  %v2274_v48 = vld [vmem:[%s7932_s7 + $0x258] sm:$0xff] }
 0x2b3   : > { %3855 = vmatprep.subr.bf16.mxu0 %v3854_v63  ;;  %3983 = vmatprep.subr.bf16.mxu1 %v3982_v3  ;;  %v3998_v63 = vpack.c.bf16 %v2220_v54, %v2216_v53  ;;  %v4126_v3 = vpack.c.bf16 %v2222_v56, %v2218_v55  ;;  %v2245_v47 = vld [vmem:[%s7932_s7 + $0x170] sm:$0xff]  ;;  %v4012_v53 = vpack.c.bf16 %v2243_v40, %v2239_v44  ;;  %v2247_v55 = vld [vmem:[%s7932_s7 + $0x180] sm:$0xff]  ;;  %v2278_v29 = vld [vmem:[%s7932_s7 + $0x278] sm:$0xff] }
 0x2b4   : > { %v4140_v54 = vpack.c.bf16 %v2245_v47, %v2241_v46  ;;  %v2251_v56 = vld [vmem:[%s7932_s7 + $0x1a0] sm:$0xff]  ;;  %v2273_v44 = vld [vmem:[%s7932_s7 + $0x250] sm:$0xff]  ;;  %v2282_v46 = vld [vmem:[%s7932_s7 + $0x298] sm:$0xff] }
 0x2b5   : > { %v4016_v6 = vpack.c.bf16 %v2251_v56, %v2247_v55  ;;  %v2277_v40 = vld [vmem:[%s7932_s7 + $0x270] sm:$0xff]  ;;  %v2286_v47 = vld [vmem:[%s7932_s7 + $0x2b8] sm:$0xff] }
 0x2b6   : > { %3857 = vmatpush1.bf16.msra.mxu0 %v3856_v45  ;;  %3985 = vmatpush1.bf16.msra.mxu1 %v3984_v5  ;;  %v4000_v45 = vpack.c.bf16 %v2219_v62, %v2215_v61  ;;  %v4128_v5 = vpack.c.bf16 %v2221_v4, %v2217_v12  ;;  %v2249_v61 = vld [vmem:[%s7932_s7 + $0x190] sm:$0xff]  ;;  %v2258_v12 = vld [vmem:[%s7932_s7 + $0x1d8] sm:$0xff] }
 0x2b7   : > { %3859 = vmatprep.subr.bf16.mxu0 %v3858_v15  ;;  %3987 = vmatprep.subr.bf16.mxu1 %v3986_v51  ;;  %v4130_v15 = vpack.c.bf16 %v2230_v35, %v2226_v7  ;;  %v2225_v51 = vld [vmem:[%s7932_s7 + $0xd0] sm:$0xff]  ;;  %v2262_v4 = vld [vmem:[%s7932_s7 + $0x1f8] sm:$0xff]  ;;  %v2255_v7 = vld [vmem:[%s7932_s7 + $0x1c0] sm:$0xff] }
 0x2b8   : > { %v2253_v62 = vld [vmem:[%s7932_s7 + $0x1b0] sm:$0xff]  ;;  %v2259_v35 = vld [vmem:[%s7932_s7 + $0x1e0] sm:$0xff] }
 0x2b9   : > { %v4144_v10 = vpack.c.bf16 %v2253_v62, %v2249_v61  ;;  %v2281_v55 = vld [vmem:[%s7932_s7 + $0x290] sm:$0xff]  ;;  %v2290_v61 = vld [vmem:[%s7932_s7 + $0x2d8] sm:$0xff] }
 0x2ba   : > { %3861 = vmatpush1.bf16.msra.mxu0 %v3860_v23  ;;  %3989 = vmatpush1.bf16.msra.mxu1 %v3988_v25  ;;  %v4132_v23 = vpack.c.bf16 %v2229_v58, %v2225_v51  ;;  %v2231_v25 = vld [vmem:[%s7932_s7 + $0x100] sm:$0xff]  ;;  %v2266_v51 = vld [vmem:[%s7932_s7 + $0x218] sm:$0xff]  ;;  %v2285_v56 = vld [vmem:[%s7932_s7 + $0x2b0] sm:$0xff] }
 0x2bb   : > { %3991 = vmatprep.subr.bf16.mxu0 %v3990_v27  ;;  %4119 = vmatprep.subr.bf16.mxu1 %v4118_v28  ;;  %v4006_v27 = vpack.c.bf16 %v2236_v18, %v2232_v17  ;;  %v4134_v28 = vpack.c.bf16 %v2238_v21, %v2234_v19  ;;  %v4008_v36 = vpack.c.bf16 %v2235_v2, %v2231_v25  ;;  %v2270_v58 = vld [vmem:[%s7932_s7 + $0x238] sm:$0xff]  ;;  %v2263_v19 = vld [vmem:[%s7932_s7 + $0x200] sm:$0xff]  ;;  %v2265_v25 = vld [vmem:[%s7932_s7 + $0x210] sm:$0xff] }
 0x2bc   : > { %v4020_v17 = vpack.c.bf16 %v2259_v35, %v2255_v7  ;;  %v4148_v18 = vpack.c.bf16 %v2261_v0, %v2257_v8  ;;  %v2267_v21 = vld [vmem:[%s7932_s7 + $0x220] sm:$0xff]  ;;  %v2269_v2 = vld [vmem:[%s7932_s7 + $0x230] sm:$0xff]  ;;  %v2294_v62 = vld [vmem:[%s7932_s7 + $0x2f8] sm:$0xff] }
 0x2bd   : > { %2025 = vmatmul.mubr.f32.vlgmr.msra.gmra.mrb[8].mxu0 %v6937_v38  ;;  %2179 = vmatmul.mubr.f32.vlgmr.msra.gmra.mrb[8].mxu1 %v6937_v38  ;;  %v2289_v7 = vld [vmem:[%s7932_s7 + $0x2d0] sm:$0xff]  ;;  %v2298_v8 = vld [vmem:[%s7932_s7 + $0x318] sm:$0xff] }
 0x2be   : > { %2030 = vmatprep.mubr.f32.mxu0 %v6946_v49  ;;  %2184 = vmatprep.mubr.f32.mxu1 %v6946_v49  ;;  %v2293_v35 = vld [vmem:[%s7932_s7 + $0x2f0] sm:$0xff]  ;;  %v2302_v0 = vld [vmem:[%s7932_s7 + $0x338] sm:$0xff] }
 0x2bf   : > { %3993 = vmatpush1.bf16.msra.mxu0 %v3992_v42  ;;  %4121 = vmatpush1.bf16.msra.mxu1 %v4120_v43  ;;  %v4010_v42 = vpack.c.bf16 %v2244_v31, %v2240_v30  ;;  %v4138_v43 = vpack.c.bf16 %v2246_v32, %v2242_v20  ;;  %v4024_v30 = vpack.c.bf16 %v2267_v21, %v2263_v19  ;;  %v2271_v20 = vld [vmem:[%s7932_s7 + $0x240] sm:$0xff]  ;;  %v2297_v19 = vld [vmem:[%s7932_s7 + $0x310] sm:$0xff] }
 0x2c0   : > { %3995 = vmatprep.subr.bf16.mxu0 %v3994_v24  ;;  %4123 = vmatprep.subr.bf16.mxu1 %v4122_v50  ;;  %v2248_v24 = vld [vmem:[%s7932_s7 + $0x188] sm:$0xff]  ;;  %v4152_v31 = vpack.c.bf16 %v2269_v2, %v2265_v25  ;;  %v2275_v32 = vld [vmem:[%s7932_s7 + $0x260] sm:$0xff]  ;;  %v2301_v21 = vld [vmem:[%s7932_s7 + $0x330] sm:$0xff] }
 0x2c1   : > { %2031 = vmatmul.mubr.f32.gmra.mrb[10].mxu0 %v6970_v26  ;;  %2185 = vmatmul.mubr.f32.gmra.mrb[10].mxu1 %v6970_v26  ;;  %v2252_v50 = vld [vmem:[%s7932_s7 + $0x1a8] sm:$0xff]  ;;  %v2306_v25 = vld [vmem:[%s7932_s7 + $0x358] sm:$0xff] }
 0x2c2   : > { %v2310_v2 = vld [vmem:[%s7932_s7 + $0x378] sm:$0xff] }
 0x2c3   : > { %3997 = vmatpush1.bf16.msra.mxu0 %v3996_v57  ;;  %4125 = vmatpush1.bf16.msra.mxu1 %v4124_v60  ;;  %v4014_v57 = vpack.c.bf16 %v2252_v50, %v2248_v24  ;;  %v4142_v60 = vpack.c.bf16 %v2254_v52, %v2250_v37  ;;  %v4028_v24 = vpack.c.bf16 %v2275_v32, %v2271_v20  ;;  %v2279_v37 = vld [vmem:[%s7932_s7 + $0x280] sm:$0xff]  ;;  %v2305_v20 = vld [vmem:[%s7932_s7 + $0x350] sm:$0xff] }
 0x2c4   : > { %3999 = vmatprep.subr.bf16.mxu0 %v3998_v63  ;;  %4127 = vmatprep.subr.bf16.mxu1 %v4126_v3  ;;  %v2256_v63 = vld [vmem:[%s7932_s7 + $0x1c8] sm:$0xff]  ;;  %v4156_v50 = vpack.c.bf16 %v2277_v40, %v2273_v44  ;;  %v2283_v52 = vld [vmem:[%s7932_s7 + $0x2a0] sm:$0xff]  ;;  %v2309_v32 = vld [vmem:[%s7932_s7 + $0x370] sm:$0xff] }
 0x2c5   : > { %v2260_v3 = vld [vmem:[%s7932_s7 + $0x1e8] sm:$0xff]  ;;  %v2314_v44 = vld [vmem:[%s7932_s7 + $0x398] sm:$0xff] }
 0x2c6   : > { %v2318_v40 = vld [vmem:[%s7932_s7 + $0x3b8] sm:$0xff] }
 0x2c7   : > { %4001 = vmatpush1.bf16.msra.mxu0 %v4000_v45  ;;  %4129 = vmatpush1.bf16.msra.mxu1 %v4128_v5  ;;  %v4018_v45 = vpack.c.bf16 %v2260_v3, %v2256_v63  ;;  %v4146_v5 = vpack.c.bf16 %v2262_v4, %v2258_v12  ;;  %v4032_v63 = vpack.c.bf16 %v2283_v52, %v2279_v37  ;;  %v2287_v12 = vld [vmem:[%s7932_s7 + $0x2c0] sm:$0xff]  ;;  %v2313_v37 = vld [vmem:[%s7932_s7 + $0x390] sm:$0xff] }
 0x2c8   : > { %4003 = vmatprep.subr.bf16.mxu0 %v4002_v14  ;;  %4131 = vmatprep.subr.bf16.mxu1 %v4130_v15  ;;  %v2264_v14 = vld [vmem:[%s7932_s7 + $0x208] sm:$0xff]  ;;  %v4160_v3 = vpack.c.bf16 %v2285_v56, %v2281_v55  ;;  %v2291_v4 = vld [vmem:[%s7932_s7 + $0x2e0] sm:$0xff]  ;;  %v2317_v52 = vld [vmem:[%s7932_s7 + $0x3b0] sm:$0xff] }
 0x2c9   : > { %v2268_v15 = vld [vmem:[%s7932_s7 + $0x228] sm:$0xff] }
 0x2ca   : > { %v2320_v55 = vld [vmem:[%s7932_s7 + $0x3c8] sm:$0xff] }
 0x2cb   : > { %4005 = vmatpush1.bf16.msra.mxu0 %v4004_v22  ;;  %4133 = vmatpush1.bf16.msra.mxu1 %v4132_v23  ;;  %v4022_v22 = vpack.c.bf16 %v2268_v15, %v2264_v14  ;;  %v4150_v23 = vpack.c.bf16 %v2270_v58, %v2266_v51  ;;  %v4036_v14 = vpack.c.bf16 %v2291_v4, %v2287_v12  ;;  %v2295_v51 = vld [vmem:[%s7932_s7 + $0x300] sm:$0xff]  ;;  %v2324_v56 = vld [vmem:[%s7932_s7 + $0x3e8] sm:$0xff]  ;;  %v2321_v4 = vld [vmem:[%s7932_s7 + $0x3d0] sm:$0xff] }
 0x2cc   : > { %4007 = vmatprep.subr.bf16.mxu0 %v4006_v27  ;;  %4135 = vmatprep.subr.bf16.mxu1 %v4134_v28  ;;  %v2272_v27 = vld [vmem:[%s7932_s7 + $0x248] sm:$0xff]  ;;  %v4164_v15 = vpack.c.bf16 %v2293_v35, %v2289_v7  ;;  %v2299_v58 = vld [vmem:[%s7932_s7 + $0x320] sm:$0xff] }
 0x2cd   : > { %v2276_v28 = vld [vmem:[%s7932_s7 + $0x268] sm:$0xff] }
 0x2ce   : > { %v2328_v7 = vld [vmem:[%s7932_s7 + $0x408] sm:$0xff] }
 0x2cf   : > { %4009 = vmatpush1.bf16.msra.mxu0 %v4008_v36  ;;  %4137 = vmatpush1.bf16.msra.mxu1 %v4136_v33  ;;  %v4026_v36 = vpack.c.bf16 %v2276_v28, %v2272_v27  ;;  %v4154_v33 = vpack.c.bf16 %v2278_v29, %v2274_v48  ;;  %v4040_v27 = vpack.c.bf16 %v2299_v58, %v2295_v51  ;;  %v2303_v48 = vld [vmem:[%s7932_s7 + $0x340] sm:$0xff]  ;;  %v2332_v35 = vld [vmem:[%s7932_s7 + $0x428] sm:$0xff] }
 0x2d0   : > { %4011 = vmatprep.subr.bf16.mxu0 %v4010_v42  ;;  %4139 = vmatprep.subr.bf16.mxu1 %v4138_v43  ;;  %v2280_v42 = vld [vmem:[%s7932_s7 + $0x288] sm:$0xff]  ;;  %v4168_v28 = vpack.c.bf16 %v2301_v21, %v2297_v19  ;;  %v2307_v29 = vld [vmem:[%s7932_s7 + $0x360] sm:$0xff] }
 0x2d1   : > { %v2284_v43 = vld [vmem:[%s7932_s7 + $0x2a8] sm:$0xff]  ;;  %v2331_v19 = vld [vmem:[%s7932_s7 + $0x420] sm:$0xff] }
 0x2d3   : > { %4013 = vmatpush1.bf16.msra.mxu0 %v4012_v53  ;;  %4141 = vmatpush1.bf16.msra.mxu1 %v4140_v54  ;;  %v4030_v53 = vpack.c.bf16 %v2284_v43, %v2280_v42  ;;  %v4158_v54 = vpack.c.bf16 %v2286_v47, %v2282_v46  ;;  %v4044_v42 = vpack.c.bf16 %v2307_v29, %v2303_v48  ;;  %v2311_v46 = vld [vmem:[%s7932_s7 + $0x380] sm:$0xff]  ;;  %v2340_v48 = vld [vmem:[%s7932_s7 + $0x468] sm:$0xff]  ;;  %v2338_v29 = vld [vmem:[%s7932_s7 + $0x458] sm:$0xff] }
 0x2d4   : > { %4015 = vmatprep.subr.bf16.mxu0 %v4014_v57  ;;  %4143 = vmatprep.subr.bf16.mxu1 %v4142_v60  ;;  %v2288_v57 = vld [vmem:[%s7932_s7 + $0x2c8] sm:$0xff]  ;;  %v4172_v43 = vpack.c.bf16 %v2309_v32, %v2305_v20 }
 0x2d5   : > { %v2292_v60 = vld [vmem:[%s7932_s7 + $0x2e8] sm:$0xff] }
 0x2d7   : > { %4017 = vmatpush1.bf16.msra.mxu0 %v4016_v6  ;;  %4145 = vmatpush1.bf16.msra.mxu1 %v4144_v10  ;;  %v4034_v6 = vpack.c.bf16 %v2292_v60, %v2288_v57  ;;  %v4162_v10 = vpack.c.bf16 %v2294_v62, %v2290_v61  ;;  %v2322_v57 = vld [vmem:[%s7932_s7 + $0x3d8] sm:$0xff]  ;;  %v4050_v60 = vpack.c.bf16 %v2324_v56, %v2320_v55  ;;  %v2319_v62 = vld [vmem:[%s7932_s7 + $0x3c0] sm:$0xff]  ;;  %v2344_v55 = vld [vmem:[%s7932_s7 + $0x488] sm:$0xff] }
 0x2d8   : > { %4019 = vmatprep.subr.bf16.mxu0 %v4018_v45  ;;  %4147 = vmatprep.subr.bf16.mxu1 %v4146_v5  ;;  %v2296_v45 = vld [vmem:[%s7932_s7 + $0x308] sm:$0xff]  ;;  %v2326_v61 = vld [vmem:[%s7932_s7 + $0x3f8] sm:$0xff] }
 0x2d9   : > { %v2300_v5 = vld [vmem:[%s7932_s7 + $0x328] sm:$0xff] }
 0x2db   : > { %4021 = vmatpush1.bf16.msra.mxu0 %v4020_v17  ;;  %4149 = vmatpush1.bf16.msra.mxu1 %v4148_v18  ;;  %v4038_v17 = vpack.c.bf16 %v2300_v5, %v2296_v45  ;;  %v4166_v18 = vpack.c.bf16 %v2302_v0, %v2298_v8  ;;  %v2330_v45 = vld [vmem:[%s7932_s7 + $0x418] sm:$0xff]  ;;  %v4054_v5 = vpack.c.bf16 %v2332_v35, %v2328_v7  ;;  %v2349_v7 = vld [vmem:[%s7932_s7 + $0x4b0] sm:$0xff]  ;;  %v2352_v35 = vld [vmem:[%s7932_s7 + $0x4c8] sm:$0xff] }
 0x2dc   : > { %4023 = vmatprep.subr.bf16.mxu0 %v4022_v22  ;;  %4151 = vmatprep.subr.bf16.mxu1 %v4150_v23  ;;  %v2304_v22 = vld [vmem:[%s7932_s7 + $0x348] sm:$0xff]  ;;  %v2334_v8 = vld [vmem:[%s7932_s7 + $0x438] sm:$0xff] }
 0x2dd   : > { %v2308_v23 = vld [vmem:[%s7932_s7 + $0x368] sm:$0xff]  ;;  %v4182_v0 = vpack.c.bf16 %v2334_v8, %v2330_v45 }
 0x2de   : > { %v2356_v8 = vld [vmem:[%s7932_s7 + $0x4e8] sm:$0xff] }
 0x2df   : > { %4025 = vmatpush1.bf16.msra.mxu0 %v4024_v30  ;;  %4153 = vmatpush1.bf16.msra.mxu1 %v4152_v31  ;;  %v4042_v30 = vpack.c.bf16 %v2308_v23, %v2304_v22  ;;  %v4170_v31 = vpack.c.bf16 %v2310_v2, %v2306_v25  ;;  %v2329_v25 = vld [vmem:[%s7932_s7 + $0x410] sm:$0xff] }
 0x2e0   : > { %4027 = vmatprep.subr.bf16.mxu0 %v4026_v36  ;;  %4155 = vmatprep.subr.bf16.mxu1 %v4154_v33  ;;  %v2312_v36 = vld [vmem:[%s7932_s7 + $0x388] sm:$0xff]  ;;  %v2333_v2 = vld [vmem:[%s7932_s7 + $0x430] sm:$0xff] }
 0x2e1   : > { %v2316_v33 = vld [vmem:[%s7932_s7 + $0x3a8] sm:$0xff] }
 0x2e2   : > { %v4046_v47 = vpack.c.bf16 %v2316_v33, %v2312_v36 }
 0x2e3   : > { %4029 = vmatpush1.bf16.msra.mxu0 %v4028_v24  ;;  %4157 = vmatpush1.bf16.msra.mxu1 %v4156_v50  ;;  %v4174_v24 = vpack.c.bf16 %v2318_v40, %v2314_v44  ;;  %v2315_v50 = vld [vmem:[%s7932_s7 + $0x3a0] sm:$0xff]  ;;  %v4184_v44 = vpack.c.bf16 %v2333_v2, %v2329_v25  ;;  %v2353_v25 = vld [vmem:[%s7932_s7 + $0x4d0] sm:$0xff] }
 0x2e4   : > { %4031 = vmatprep.subr.bf16.mxu0 %v4030_v53  ;;  %4159 = vmatprep.subr.bf16.mxu1 %v4158_v54  ;;  %v4048_v53 = vpack.c.bf16 %v2315_v50, %v2311_v46  ;;  %v4176_v54 = vpack.c.bf16 %v2317_v52, %v2313_v37  ;;  %v2335_v40 = vld [vmem:[%s7932_s7 + $0x440] sm:$0xff]  ;;  %v2337_v52 = vld [vmem:[%s7932_s7 + $0x450] sm:$0xff] }
 0x2e5   : > { %v2339_v37 = vld [vmem:[%s7932_s7 + $0x460] sm:$0xff]  ;;  %v2357_v2 = vld [vmem:[%s7932_s7 + $0x4f0] sm:$0xff] }
 0x2e7   : > { %4033 = vmatpush1.bf16.msra.mxu0 %v4032_v63  ;;  %4161 = vmatpush1.bf16.msra.mxu1 %v4160_v3  ;;  %v2323_v63 = vld [vmem:[%s7932_s7 + $0x3e0] sm:$0xff]  ;;  %v4178_v3 = vpack.c.bf16 %v2326_v61, %v2322_v57  ;;  %v2348_v57 = vld [vmem:[%s7932_s7 + $0x4a8] sm:$0xff]  ;;  %v2350_v61 = vld [vmem:[%s7932_s7 + $0x4b8] sm:$0xff] }
 0x2e8   : > { %4035 = vmatprep.subr.bf16.mxu0 %v4034_v6  ;;  %4163 = vmatprep.subr.bf16.mxu1 %v4162_v10  ;;  %v4052_v12 = vpack.c.bf16 %v2323_v63, %v2319_v62  ;;  %v2325_v6 = vld [vmem:[%s7932_s7 + $0x3f0] sm:$0xff]  ;;  %v4060_v63 = vpack.c.bf16 %v2339_v37, %v2335_v40  ;;  %v4062_v45 = vpack.c.bf16 %v2348_v57, %v2344_v55  ;;  %v2374_v37 = vld [vmem:[%s7932_s7 + $0x578] sm:$0xff]  ;;  %v2371_v55 = vld [vmem:[%s7932_s7 + $0x560] sm:$0xff] }
 0x2e9   : > { %v4180_v10 = vpack.c.bf16 %v2325_v6, %v2321_v4  ;;  %v2347_v4 = vld [vmem:[%s7932_s7 + $0x4a0] sm:$0xff] }
 0x2eb   : > { %4037 = vmatpush1.bf16.msra.mxu0 %v4036_v14  ;;  %4165 = vmatpush1.bf16.msra.mxu1 %v4164_v15  ;;  %v7313_v14 = vld [vmem:[%s7931_s6] sm:$0xf] }
 0x2ec   : > { %4039 = vmatprep.subr.bf16.mxu0 %v4038_v17  ;;  %4167 = vmatprep.subr.bf16.mxu1 %v4166_v18  ;;  %v1866_v15 = vrot.slane %v7313_v14, %v6460_v9  ;;  %v1870_v51 = vrot.slane %v7313_v14, %v6468_v11  ;;  %v2327_v18 = vld [vmem:[%s7932_s7 + $0x400] sm:$0xff] }
 0x2ed   : > { %v4056_v33 = vpack.c.bf16 %v2331_v19, %v2327_v18  ;;  %v2351_v19 = vld [vmem:[%s7932_s7 + $0x4c0] sm:$0xff] }
 0x2ef   : > { %4041 = vmatpush1.bf16.msra.mxu0 %v4040_v27  ;;  %4169 = vmatpush1.bf16.msra.mxu1 %v4168_v28  ;;  %v2336_v27 = vld [vmem:[%s7932_s7 + $0x448] sm:$0xff] }
 0x2f0   : > { %4043 = vmatprep.subr.bf16.mxu0 %v4042_v30  ;;  %4171 = vmatprep.subr.bf16.mxu1 %v4170_v31  ;;  %v2342_v30 = vld [vmem:[%s7932_s7 + $0x478] sm:$0xff]  ;;  %v7347_v31 = vrot.slane %v7313_v14, %v6484_v16 }
 0x2f1   : > { %v4186_v50 = vpack.c.bf16 %v2342_v30, %v2338_v29  ;;  %v2366_v29 = vld [vmem:[%s7932_s7 + $0x538] sm:$0xff] }
 0x2f3   : > { %4045 = vmatpush1.bf16.msra.mxu0 %v4044_v42  ;;  %4173 = vmatpush1.bf16.msra.mxu1 %v4172_v43 }
 0x2f4   : > { %4047 = vmatprep.subr.bf16.mxu0 %v4046_v47  ;;  %4175 = vmatprep.subr.bf16.mxu1 %v4174_v24  ;;  %v4058_v24 = vpack.c.bf16 %v2340_v48, %v2336_v27  ;;  %v2360_v27 = vld [vmem:[%s7932_s7 + $0x508] sm:$0xff]  ;;  %v2362_v48 = vld [vmem:[%s7932_s7 + $0x518] sm:$0xff] }
 0x2f5   : > { %v4198_v40 = vpack.c.bf16 %v2366_v29, %v2362_v48  ;;  %v2396_v48 = vld [vmem:[%s7932_s7 + $0x628] sm:$0xff]  ;;  %v2394_v29 = vld [vmem:[%s7932_s7 + $0x618] sm:$0xff] }
 0x2f7   : > { %4049 = vmatpush1.bf16.msra.mxu0 %v4048_v53  ;;  %4177 = vmatpush1.bf16.msra.mxu1 %v4176_v54  ;;  %v2341_v53 = vld [vmem:[%s7932_s7 + $0x470] sm:$0xff] }
 0x2f8   : > { %4051 = vmatprep.subr.bf16.mxu0 %v4050_v60  ;;  %4179 = vmatprep.subr.bf16.mxu1 %v4178_v3  ;;  %v2346_v60 = vld [vmem:[%s7932_s7 + $0x498] sm:$0xff]  ;;  %v4188_v3 = vpack.c.bf16 %v2341_v53, %v2337_v52 }
 0x2fb   : > { %4053 = vmatpush1.bf16.msra.mxu0 %v4052_v12  ;;  %4181 = vmatpush1.bf16.msra.mxu1 %v4180_v10  ;;  %v2343_v12 = vld [vmem:[%s7932_s7 + $0x480] sm:$0xff]  ;;  %v2345_v10 = vld [vmem:[%s7932_s7 + $0x490] sm:$0xff] }
 0x2fc   : > { %4055 = vmatprep.subr.bf16.mxu0 %v4054_v5  ;;  %4183 = vmatprep.subr.bf16.mxu1 %v4182_v0  ;;  %v4190_v5 = vpack.c.bf16 %v2350_v61, %v2346_v60  ;;  %v2354_v0 = vld [vmem:[%s7932_s7 + $0x4d8] sm:$0xff]  ;;  %v4192_v18 = vpack.c.bf16 %v2349_v7, %v2345_v10  ;;  %v2369_v60 = vld [vmem:[%s7932_s7 + $0x550] sm:$0xff]  ;;  %v2375_v10 = vld [vmem:[%s7932_s7 + $0x580] sm:$0xff] }
 0x2fd   : > { %v2373_v61 = vld [vmem:[%s7932_s7 + $0x570] sm:$0xff]  ;;  %v2379_v7 = vld [vmem:[%s7932_s7 + $0x5a0] sm:$0xff] }
 0x390   : > { %v2026_v58 = vpop.f32.mrb[8].mxu0  ;;  %v7319_v17 = vpop.f32.mrb[8].mxu1 }
 0x391   : > { %v4326_v21 = vadd.f32 %v2026_v58, %v1866_v15  ;;  %v2028_v22 = vpop.f32.mrb[9].mxu0  ;;  %v2182_v23 = vpop.f32.mrb[9].mxu1  ;;  %v4064_v58 = vpack.c.bf16 %v2347_v4, %v2343_v12  ;;  %v2382_v12 = vld [vmem:[%s7932_s7 + $0x5b8] sm:$0xff] }
 0x392   : > { %v4327_v28 = vadd.f32 %v2028_v22, %v1870_v51  ;;  %v4331_v56 = vadd.f32 %v2182_v23, %v7347_v31  ;;  %v4066_v22 = vpack.c.bf16 %v2356_v8, %v2352_v35  ;;  %v2381_v8 = vld [vmem:[%s7932_s7 + $0x5b0] sm:$0xff] }
 0x393   : > { %v2191_v42 = vmax.f32 %v4326_v21, 0.0  ;;  %v2355_v21 = vld [vmem:[%s7932_s7 + $0x4e0] sm:$0xff] }
 0x394   : > { %v2192_v20 = vmax.f32 %v4327_v28, 0.0  ;;  %v2032_v32 = vpop.f32.mrb[10].mxu0  ;;  %v7349_v36 = vpop.f32.mrb[10].mxu1  ;;  %v2364_v28 = vld [vmem:[%s7932_s7 + $0x528] sm:$0xff]  ;;  %v4068_v30 = vpack.c.bf16 %v2355_v21, %v2351_v19  ;;  %v2383_v21 = vld [vmem:[%s7932_s7 + $0x5c0] sm:$0xff] }
 0x395   : > { %v4328_v43 = vadd.f32 %v2032_v32, %v1866_v15  ;;  %v2034_v46 = vpop.f32.mrb[11].mxu0  ;;  %v7354_v47 = vpop.f32.mrb[11].mxu1  ;;  %v2358_v15 = vld [vmem:[%s7932_s7 + $0x4f8] sm:$0xff]  ;;  %v2359_v32 = vld [vmem:[%s7932_s7 + $0x500] sm:$0xff] }
 0x396   : > { %v4329_v54 = vadd.f32 %v2034_v46, %v1870_v51  ;;  %2541 = vmatprep.mubr.f32.mxu0 %v2192_v20  ;;  %2695 = vmatprep.mubr.f32.mxu1 %v2192_v20  ;;  %v2194_v51 = vmax.f32 %v4331_v56, 0.0  ;;  %v4194_v23 = vpack.c.bf16 %v2358_v15, %v2354_v0  ;;  %v4196_v20 = vpack.c.bf16 %v2357_v2, %v2353_v25  ;;  %v2368_v46 = vld [vmem:[%s7932_s7 + $0x548] sm:$0xff]  ;;  %v2385_v2 = vld [vmem:[%s7932_s7 + $0x5d0] sm:$0xff] }
 0x397   : > { %2542 = vmatmul.mubr.f32.vlgmr.msra.gmra.mrb[12].mxu0 %v2191_v42  ;;  %2696 = vmatmul.mubr.f32.vlgmr.msra.gmra.mrb[12].mxu1 %v2191_v42  ;;  %v2195_v6 = vmax.f32 %v4328_v43, 0.0  ;;  %v2361_v42 = vld [vmem:[%s7932_s7 + $0x510] sm:$0xff]  ;;  %v2384_v0 = vld [vmem:[%s7932_s7 + $0x5c8] sm:$0xff] }
 0x398   : > { %v2196_v62 = vmax.f32 %v4329_v54, 0.0  ;;  %4057 = vmatpush1.bf16.msra.mxu0 %v4056_v33  ;;  %4185 = vmatpush1.bf16.msra.mxu1 %v4184_v44  ;;  %v2363_v33 = vld [vmem:[%s7932_s7 + $0x520] sm:$0xff]  ;;  %v4070_v44 = vpack.c.bf16 %v2364_v28, %v2360_v27  ;;  %v2365_v43 = vld [vmem:[%s7932_s7 + $0x530] sm:$0xff]  ;;  %v2388_v15 = vld [vmem:[%s7932_s7 + $0x5e8] sm:$0xff] }
 0x399   : > { %4059 = vmatprep.subr.bf16.mxu0 %v4058_v24  ;;  %4187 = vmatprep.subr.bf16.mxu1 %v4186_v50  ;;  %v2372_v24 = vld [vmem:[%s7932_s7 + $0x568] sm:$0xff]  ;;  %v2370_v50 = vld [vmem:[%s7932_s7 + $0x558] sm:$0xff]  ;;  %v4072_v52 = vpack.c.bf16 %v2363_v33, %v2359_v32  ;;  %v4200_v53 = vpack.c.bf16 %v2365_v43, %v2361_v42  ;;  %v2367_v54 = vld [vmem:[%s7932_s7 + $0x540] sm:$0xff] }
 0x39a   : > { %2547 = vmatprep.mubr.f32.mxu0 %v2196_v62  ;;  %2701 = vmatprep.mubr.f32.mxu1 %v2196_v62  ;;  %v4074_v56 = vpack.c.bf16 %v2372_v24, %v2368_v46  ;;  %v4202_v57 = vpack.c.bf16 %v2374_v37, %v2370_v50  ;;  %v2376_v62 = vld [vmem:[%s7932_s7 + $0x588] sm:$0xff]  ;;  %v4076_v4 = vpack.c.bf16 %v2371_v55, %v2367_v54  ;;  %v2389_v27 = vld [vmem:[%s7932_s7 + $0x5f0] sm:$0xff]  ;;  %v2391_v33 = vld [vmem:[%s7932_s7 + $0x600] sm:$0xff] }
 0x39b   : > { %2548 = vmatmul.mubr.f32.gmra.mrb[14].mxu0 %v2195_v6  ;;  %2702 = vmatmul.mubr.f32.gmra.mrb[14].mxu1 %v2195_v6  ;;  %v4204_v6 = vpack.c.bf16 %v2373_v61, %v2369_v60  ;;  %v2392_v28 = vld [vmem:[%s7932_s7 + $0x608] sm:$0xff]  ;;  %v4212_v32 = vpack.c.bf16 %v2389_v27, %v2385_v2  ;;  %v2393_v43 = vld [vmem:[%s7932_s7 + $0x610] sm:$0xff]  ;;  %v2402_v37 = vld [vmem:[%s7932_s7 + $0x658] sm:$0xff] }
 0x39c   : > { %4061 = vmatpush1.bf16.msra.mxu0 %v4060_v63  ;;  %4189 = vmatpush1.bf16.msra.mxu1 %v4188_v3  ;;  %v2380_v63 = vld [vmem:[%s7932_s7 + $0x5a8] sm:$0xff]  ;;  %v2378_v3 = vld [vmem:[%s7932_s7 + $0x598] sm:$0xff]  ;;  %v2397_v46 = vld [vmem:[%s7932_s7 + $0x630] sm:$0xff] }
 0x39d   : > { %2618 = vmatprep.mubr.f32.mxu0 %v2194_v51  ;;  %2772 = vmatprep.mubr.f32.mxu1 %v2194_v51  ;;  %v4078_v35 = vpack.c.bf16 %v2380_v63, %v2376_v62  ;;  %v2386_v51 = vld [vmem:[%s7932_s7 + $0x5d8] sm:$0xff]  ;;  %v2400_v24 = vld [vmem:[%s7932_s7 + $0x648] sm:$0xff]  ;;  %v4216_v54 = vpack.c.bf16 %v2397_v46, %v2393_v43  ;;  %v2399_v55 = vld [vmem:[%s7932_s7 + $0x640] sm:$0xff] }
 0x39e   : > { %4063 = vmatprep.subr.bf16.mxu0 %v4062_v45  ;;  %4191 = vmatprep.subr.bf16.mxu1 %v4190_v5  ;;  %v4206_v45 = vpack.c.bf16 %v2382_v12, %v2378_v3  ;;  %v2377_v5 = vld [vmem:[%s7932_s7 + $0x590] sm:$0xff]  ;;  %v2404_v50 = vld [vmem:[%s7932_s7 + $0x668] sm:$0xff]  ;;  %v2410_v12 = vld [vmem:[%s7932_s7 + $0x698] sm:$0xff] }
 0x39f   : > { %v4208_v19 = vpack.c.bf16 %v2381_v8, %v2377_v5  ;;  %v2401_v61 = vld [vmem:[%s7932_s7 + $0x650] sm:$0xff]  ;;  %v2408_v63 = vld [vmem:[%s7932_s7 + $0x688] sm:$0xff] }
 0x3a0   : > { %4065 = vmatpush1.bf16.msra.mxu0 %v4064_v58  ;;  %4193 = vmatpush1.bf16.msra.mxu1 %v4192_v18  ;;  %v2390_v58 = vld [vmem:[%s7932_s7 + $0x5f8] sm:$0xff]  ;;  %v4080_v18 = vpack.c.bf16 %v2379_v7, %v2375_v10  ;;  %v2405_v62 = vld [vmem:[%s7932_s7 + $0x670] sm:$0xff]  ;;  %v2412_v3 = vld [vmem:[%s7932_s7 + $0x6a8] sm:$0xff] }
 0x3a1   : > { %4067 = vmatprep.subr.bf16.mxu0 %v4066_v22  ;;  %4195 = vmatprep.subr.bf16.mxu1 %v4194_v23  ;;  %v2387_v22 = vld [vmem:[%s7932_s7 + $0x5e0] sm:$0xff]  ;;  %v4082_v23 = vpack.c.bf16 %v2388_v15, %v2384_v0  ;;  %v4210_v25 = vpack.c.bf16 %v2390_v58, %v2386_v51  ;;  %v4220_v10 = vpack.c.bf16 %v2405_v62, %v2401_v61  ;;  %v2409_v8 = vld [vmem:[%s7932_s7 + $0x690] sm:$0xff]  ;;  %v2416_v15 = vld [vmem:[%s7932_s7 + $0x6c8] sm:$0xff] }
 0x3a2   : > { %v2407_v7 = vld [vmem:[%s7932_s7 + $0x680] sm:$0xff]  ;;  %v2413_v0 = vld [vmem:[%s7932_s7 + $0x6b0] sm:$0xff]  ;;  %v2420_v51 = vld [vmem:[%s7932_s7 + $0x6e8] sm:$0xff] }
 0x3a3   : > { %v2418_v58 = vld [vmem:[%s7932_s7 + $0x6d8] sm:$0xff]  ;;  %v2417_v27 = vld [vmem:[%s7932_s7 + $0x6d0] sm:$0xff] }
 0x3a4   : > { %4069 = vmatpush1.bf16.msra.mxu0 %v4068_v30  ;;  %4197 = vmatpush1.bf16.msra.mxu1 %v4196_v20  ;;  %v2398_v30 = vld [vmem:[%s7932_s7 + $0x638] sm:$0xff]  ;;  %v4084_v20 = vpack.c.bf16 %v2387_v22, %v2383_v21  ;;  %v4224_v21 = vpack.c.bf16 %v2413_v0, %v2409_v8  ;;  %v2415_v22 = vld [vmem:[%s7932_s7 + $0x6c0] sm:$0xff]  ;;  %v2425_v46 = vld [vmem:[%s7932_s7 + $0x710] sm:$0xff] }
 0x3a5   : > { %4071 = vmatprep.subr.bf16.mxu0 %v4070_v44  ;;  %4199 = vmatprep.subr.bf16.mxu1 %v4198_v40  ;;  %v2395_v44 = vld [vmem:[%s7932_s7 + $0x620] sm:$0xff]  ;;  %v4086_v40 = vpack.c.bf16 %v2396_v48, %v2392_v28  ;;  %v4214_v42 = vpack.c.bf16 %v2398_v30, %v2394_v29  ;;  %v2421_v28 = vld [vmem:[%s7932_s7 + $0x6f0] sm:$0xff]  ;;  %v2424_v48 = vld [vmem:[%s7932_s7 + $0x708] sm:$0xff] }
 0x3a6   : > { %v2428_v29 = vld [vmem:[%s7932_s7 + $0x728] sm:$0xff]  ;;  %v2426_v30 = vld [vmem:[%s7932_s7 + $0x718] sm:$0xff]  ;;  %v2433_v62 = vld [vmem:[%s7932_s7 + $0x750] sm:$0xff] }
 0x3a7   : > { %v2441_v0 = vld [vmem:[%s7932_s7 + $0x790] sm:$0xff] }
 0x3a8   : > { %4073 = vmatpush1.bf16.msra.mxu0 %v4072_v52  ;;  %4201 = vmatpush1.bf16.msra.mxu1 %v4200_v53  ;;  %v2406_v52 = vld [vmem:[%s7932_s7 + $0x678] sm:$0xff]  ;;  %v4088_v53 = vpack.c.bf16 %v2395_v44, %v2391_v33  ;;  %v4228_v33 = vpack.c.bf16 %v2421_v28, %v2417_v27  ;;  %v2423_v44 = vld [vmem:[%s7932_s7 + $0x700] sm:$0xff] }
 0x3a9   : > { %4075 = vmatprep.subr.bf16.mxu0 %v4074_v56  ;;  %4203 = vmatprep.subr.bf16.mxu1 %v4202_v57  ;;  %v2403_v56 = vld [vmem:[%s7932_s7 + $0x660] sm:$0xff]  ;;  %v4090_v57 = vpack.c.bf16 %v2404_v50, %v2400_v24  ;;  %v4218_v60 = vpack.c.bf16 %v2406_v52, %v2402_v37  ;;  %v2429_v24 = vld [vmem:[%s7932_s7 + $0x730] sm:$0xff]  ;;  %v2432_v50 = vld [vmem:[%s7932_s7 + $0x748] sm:$0xff] }
 0x3aa   : > { %v2436_v37 = vld [vmem:[%s7932_s7 + $0x768] sm:$0xff]  ;;  %v2434_v52 = vld [vmem:[%s7932_s7 + $0x758] sm:$0xff] }
 0x3ac   : > { %4077 = vmatpush1.bf16.msra.mxu0 %v4076_v4  ;;  %4205 = vmatpush1.bf16.msra.mxu1 %v4204_v6  ;;  %v2414_v4 = vld [vmem:[%s7932_s7 + $0x6b8] sm:$0xff]  ;;  %v4092_v6 = vpack.c.bf16 %v2403_v56, %v2399_v55  ;;  %v4232_v55 = vpack.c.bf16 %v2429_v24, %v2425_v46  ;;  %v2431_v56 = vld [vmem:[%s7932_s7 + $0x740] sm:$0xff]  ;;  %v4333_v24 = vadd.f32 %v7354_v47, %v7347_v31 }
 0x3ad   : > { %4079 = vmatprep.subr.bf16.mxu0 %v4078_v35  ;;  %4207 = vmatprep.subr.bf16.mxu1 %v4206_v45  ;;  %v2411_v35 = vld [vmem:[%s7932_s7 + $0x6a0] sm:$0xff]  ;;  %v4094_v45 = vpack.c.bf16 %v2412_v3, %v2408_v63  ;;  %v4222_v5 = vpack.c.bf16 %v2414_v4, %v2410_v12  ;;  %v2437_v63 = vld [vmem:[%s7932_s7 + $0x770] sm:$0xff]  ;;  %v2440_v3 = vld [vmem:[%s7932_s7 + $0x788] sm:$0xff] }
 0x3ae   : > { %v2444_v12 = vld [vmem:[%s7932_s7 + $0x7a8] sm:$0xff]  ;;  %v2442_v4 = vld [vmem:[%s7932_s7 + $0x798] sm:$0xff]  ;;  %v2858_v46 = vld [vmem:[%s7934_s9] sm:$0xff] }
 0x3b0   : > { %4081 = vmatpush1.bf16.msra.mxu0 %v4080_v18  ;;  %4209 = vmatpush1.bf16.msra.mxu1 %v4208_v19  ;;  %v2422_v18 = vld [vmem:[%s7932_s7 + $0x6f8] sm:$0xff]  ;;  %v4096_v19 = vpack.c.bf16 %v2411_v35, %v2407_v7  ;;  %v4236_v7 = vpack.c.bf16 %v2437_v63, %v2433_v62  ;;  %v2439_v35 = vld [vmem:[%s7932_s7 + $0x780] sm:$0xff]  ;;  %v2860_v62 = vld [vmem:[%s7934_s9 + $0x10] sm:$0xff] }
 0x3b1   : > { %4083 = vmatprep.subr.bf16.mxu0 %v4082_v23  ;;  %4211 = vmatprep.subr.bf16.mxu1 %v4210_v25  ;;  %v2419_v23 = vld [vmem:[%s7932_s7 + $0x6e0] sm:$0xff]  ;;  %v4098_v25 = vpack.c.bf16 %v2420_v51, %v2416_v15  ;;  %v4226_v2 = vpack.c.bf16 %v2422_v18, %v2418_v58  ;;  %v2445_v15 = vld [vmem:[%s7932_s7 + $0x7b0] sm:$0xff]  ;;  %v2448_v51 = vld [vmem:[%s7932_s7 + $0x7c8] sm:$0xff] }
 0x3b2   : > { %v2452_v58 = vld [vmem:[%s7932_s7 + $0x7e8] sm:$0xff]  ;;  %v2450_v18 = vld [vmem:[%s7932_s7 + $0x7d8] sm:$0xff] }
 0x3b3   : > { %v4114_v27 = vpack.c.bf16 %v2452_v58, %v2448_v51  ;;  %v2861_v63 = vld [vmem:[%s7934_s9 + $0x18] sm:$0xff] }
 0x3b4   : > { %4085 = vmatpush1.bf16.msra.mxu0 %v4084_v20  ;;  %4213 = vmatpush1.bf16.msra.mxu1 %v4212_v32  ;;  %v2430_v20 = vld [vmem:[%s7932_s7 + $0x738] sm:$0xff]  ;;  %v4100_v32 = vpack.c.bf16 %v2419_v23, %v2415_v22  ;;  %v4240_v22 = vpack.c.bf16 %v2445_v15, %v2441_v0  ;;  %v2447_v23 = vld [vmem:[%s7932_s7 + $0x7c0] sm:$0xff]  ;;  %v2863_v15 = vld [vmem:[%s7934_s9 + $0x28] sm:$0xff] }
 0x3b5   : > { %4087 = vmatprep.subr.bf16.mxu0 %v4086_v40  ;;  %4215 = vmatprep.subr.bf16.mxu1 %v4214_v42  ;;  %v2427_v40 = vld [vmem:[%s7932_s7 + $0x720] sm:$0xff]  ;;  %v4102_v42 = vpack.c.bf16 %v2428_v29, %v2424_v48  ;;  %v4230_v43 = vpack.c.bf16 %v2430_v20, %v2426_v30  ;;  %v2449_v48 = vld [vmem:[%s7932_s7 + $0x7d0] sm:$0xff] }
 0x3b6   : > { %v2453_v29 = vld [vmem:[%s7932_s7 + $0x7f0] sm:$0xff]  ;;  %v2874_v30 = vld [vmem:[%s7934_s9 + $0x80] sm:$0xff] }
 0x3b7   : > { %v2906_v20 = vld [vmem:[%s7934_s9 + $0x180] sm:$0xff] }
 0x3b8   : > { %4089 = vmatpush1.bf16.msra.mxu0 %v4088_v53  ;;  %4217 = vmatpush1.bf16.msra.mxu1 %v4216_v54  ;;  %v2438_v53 = vld [vmem:[%s7932_s7 + $0x778] sm:$0xff]  ;;  %v4104_v54 = vpack.c.bf16 %v2427_v40, %v2423_v44  ;;  %v4244_v44 = vpack.c.bf16 %v2453_v29, %v2449_v48  ;;  %v2862_v0 = vld [vmem:[%s7934_s9 + $0x20] sm:$0xff] }
 0x3b9   : > { %4091 = vmatprep.subr.bf16.mxu0 %v4090_v57  ;;  %4219 = vmatprep.subr.bf16.mxu1 %v4218_v60  ;;  %v2435_v57 = vld [vmem:[%s7932_s7 + $0x760] sm:$0xff]  ;;  %v4106_v60 = vpack.c.bf16 %v2436_v37, %v2432_v50  ;;  %v4234_v61 = vpack.c.bf16 %v2438_v53, %v2434_v52  ;;  %v2859_v50 = vld [vmem:[%s7934_s9 + $0x8] sm:$0xff]  ;;  %v4256_v58 = vpack.c.bf16 %v2863_v15, %v2862_v0  ;;  %v2865_v48 = vld [vmem:[%s7934_s9 + $0x38] sm:$0xff] }
 0x3ba   : > { %v2890_v37 = vld [vmem:[%s7934_s9 + $0x100] sm:$0xff]  ;;  %v4248_v31 = vpack.c.bf16 %v2859_v50, %v2858_v46  ;;  %v2903_v15 = vld [vmem:[%s7934_s9 + $0x168] sm:$0xff] }
 0x3bb   : > { %v2866_v46 = vld [vmem:[%s7934_s9 + $0x40] sm:$0xff] }
 0x3bc   : > { %4093 = vmatpush1.bf16.msra.mxu0 %v4092_v6  ;;  %4221 = vmatpush1.bf16.msra.mxu1 %v4220_v10  ;;  %v2446_v6 = vld [vmem:[%s7932_s7 + $0x7b8] sm:$0xff]  ;;  %v4108_v10 = vpack.c.bf16 %v2435_v57, %v2431_v56  ;;  %v2876_v56 = vld [vmem:[%s7934_s9 + $0x90] sm:$0xff]  ;;  %v2902_v0 = vld [vmem:[%s7934_s9 + $0x160] sm:$0xff] }
 0x3bd   : > { %4095 = vmatprep.subr.bf16.mxu0 %v4094_v45  ;;  %4223 = vmatprep.subr.bf16.mxu1 %v4222_v5  ;;  %v2443_v45 = vld [vmem:[%s7932_s7 + $0x7a0] sm:$0xff]  ;;  %v4110_v5 = vpack.c.bf16 %v2444_v12, %v2440_v3  ;;  %v4238_v8 = vpack.c.bf16 %v2446_v6, %v2442_v4  ;;  %v2908_v57 = vld [vmem:[%s7934_s9 + $0x190] sm:$0xff]  ;;  %v4252_v12 = vpack.c.bf16 %v2861_v63, %v2860_v62  ;;  %v2893_v6 = vld [vmem:[%s7934_s9 + $0x118] sm:$0xff] }
 0x3be   : > { %v2892_v4 = vld [vmem:[%s7934_s9 + $0x110] sm:$0xff]  ;;  %v2901_v63 = vld [vmem:[%s7934_s9 + $0x158] sm:$0xff] }
 0x3bf   : > { %v2900_v62 = vld [vmem:[%s7934_s9 + $0x150] sm:$0xff] }
 0x3c0   : > { %4097 = vmatpush1.bf16.msra.mxu0 %v4096_v19  ;;  %4225 = vmatpush1.bf16.msra.mxu1 %v4224_v21  ;;  %v2454_v19 = vld [vmem:[%s7932_s7 + $0x7f8] sm:$0xff]  ;;  %v4112_v21 = vpack.c.bf16 %v2443_v45, %v2439_v35  ;;  %v2879_v35 = vld [vmem:[%s7934_s9 + $0xa8] sm:$0xff]  ;;  %v2910_v45 = vld [vmem:[%s7934_s9 + $0x1a0] sm:$0xff] }
 0x3c1   : > { %4099 = vmatprep.subr.bf16.mxu0 %v4098_v25  ;;  %4227 = vmatprep.subr.bf16.mxu1 %v4226_v2  ;;  %v2451_v25 = vld [vmem:[%s7932_s7 + $0x7e0] sm:$0xff]  ;;  %v1874_v2 = vrot.slane %v7313_v14, %v6832_v39  ;;  %v4242_v28 = vpack.c.bf16 %v2454_v19, %v2450_v18  ;;  %v2875_v14 = vld [vmem:[%s7934_s9 + $0x88] sm:$0xff] }
 0x3c2   : > { %v2894_v18 = vld [vmem:[%s7934_s9 + $0x120] sm:$0xff]  ;;  %v2895_v19 = vld [vmem:[%s7934_s9 + $0x128] sm:$0xff] }
 0x3c3   : > { %v4330_v40 = vadd.f32 %v7319_v17, %v1874_v2  ;;  %v2891_v17 = vld [vmem:[%s7934_s9 + $0x108] sm:$0xff]  ;;  %v4332_v53 = vadd.f32 %v7349_v36, %v1874_v2  ;;  %v2877_v36 = vld [vmem:[%s7934_s9 + $0x98] sm:$0xff] }
 0x3c4   : > { %4101 = vmatpush1.bf16.msra.mxu0 %v4100_v32  ;;  %4229 = vmatpush1.bf16.msra.mxu1 %v4228_v33  ;;  %v2907_v32 = vld [vmem:[%s7934_s9 + $0x188] sm:$0xff]  ;;  %v4116_v33 = vpack.c.bf16 %v2451_v25, %v2447_v23  ;;  %v4280_v47 = vpack.c.bf16 %v2891_v17, %v2890_v37  ;;  %v2881_v23 = vld [vmem:[%s7934_s9 + $0xb8] sm:$0xff]  ;;  %v2912_v25 = vld [vmem:[%s7934_s9 + $0x1b0] sm:$0xff] }
 0x3c5   : > { %4103 = vmatprep.subr.bf16.mxu0 %v4102_v42  ;;  %4231 = vmatprep.subr.bf16.mxu1 %v4230_v43  ;;  %v4246_v42 = vpack.c.bf16 %v2875_v14, %v2874_v30  ;;  %v4278_v43 = vpack.c.bf16 %v2907_v32, %v2906_v20  ;;  %v2193_v52 = vmax.f32 %v4330_v40, 0.0  ;;  %v2896_v14 = vld [vmem:[%s7934_s9 + $0x130] sm:$0xff]  ;;  %v2897_v20 = vld [vmem:[%s7934_s9 + $0x138] sm:$0xff]  ;;  %v2914_v40 = vld [vmem:[%s7934_s9 + $0x1c0] sm:$0xff] }
 0x3c6   : > { %v4292_v32 = vpack.c.bf16 %v2897_v20, %v2896_v14  ;;  %v2898_v17 = vld [vmem:[%s7934_s9 + $0x140] sm:$0xff] }
 0x3c8   : > { %4105 = vmatpush1.bf16.msra.mxu0 %v4104_v54  ;;  %4233 = vmatpush1.bf16.msra.mxu1 %v4232_v55  ;;  %v2198_v54 = vmax.f32 %v4333_v24, 0.0  ;;  %v2197_v55 = vmax.f32 %v4332_v53, 0.0  ;;  %v2867_v24 = vld [vmem:[%s7934_s9 + $0x48] sm:$0xff] }
 0x3c9   : > { %4107 = vmatprep.subr.bf16.mxu0 %v4106_v60  ;;  %4235 = vmatprep.subr.bf16.mxu1 %v4234_v61  ;;  %v4250_v60 = vpack.c.bf16 %v2877_v36, %v2876_v56  ;;  %v2909_v61 = vld [vmem:[%s7934_s9 + $0x198] sm:$0xff]  ;;  %v4264_v37 = vpack.c.bf16 %v2867_v24, %v2866_v46  ;;  %v2868_v36 = vld [vmem:[%s7934_s9 + $0x50] sm:$0xff] }
 0x3ca   : > { %v4282_v3 = vpack.c.bf16 %v2909_v61, %v2908_v57  ;;  %v2917_v56 = vld [vmem:[%s7934_s9 + $0x1d8] sm:$0xff] }
 0x3cb   : > { %v2869_v57 = vld [vmem:[%s7934_s9 + $0x58] sm:$0xff] }
 0x3cc   : > { %4109 = vmatpush1.bf16.msra.mxu0 %v4108_v10  ;;  %4237 = vmatpush1.bf16.msra.mxu1 %v4236_v7  ;;  %v4284_v10 = vpack.c.bf16 %v2893_v6, %v2892_v4  ;;  %v2878_v7 = vld [vmem:[%s7934_s9 + $0xa0] sm:$0xff]  ;;  %v4268_v61 = vpack.c.bf16 %v2869_v57, %v2868_v36  ;;  %v2887_v4 = vld [vmem:[%s7934_s9 + $0xe8] sm:$0xff] }
 0x3cd   : > { %4111 = vmatprep.subr.bf16.mxu0 %v4110_v5  ;;  %4239 = vmatprep.subr.bf16.mxu1 %v4238_v8  ;;  %v4254_v5 = vpack.c.bf16 %v2879_v35, %v2878_v7  ;;  %v2911_v8 = vld [vmem:[%s7934_s9 + $0x1a8] sm:$0xff]  ;;  %v2918_v6 = vld [vmem:[%s7934_s9 + $0x1e0] sm:$0xff] }
 0x3ce   : > { %v4286_v51 = vpack.c.bf16 %v2911_v8, %v2910_v45  ;;  %v2919_v7 = vld [vmem:[%s7934_s9 + $0x1e8] sm:$0xff]  ;;  %v2870_v35 = vld [vmem:[%s7934_s9 + $0x60] sm:$0xff] }
 0x3cf   : > { %v2871_v45 = vld [vmem:[%s7934_s9 + $0x68] sm:$0xff] }
 0x3d0   : > { %4113 = vmatpush1.bf16.msra.mxu0 %v4112_v21  ;;  %4241 = vmatpush1.bf16.msra.mxu1 %v4240_v22  ;;  %v4288_v21 = vpack.c.bf16 %v2895_v19, %v2894_v18  ;;  %v2880_v22 = vld [vmem:[%s7934_s9 + $0xb0] sm:$0xff]  ;;  %v4272_v8 = vpack.c.bf16 %v2871_v45, %v2870_v35  ;;  %v2889_v18 = vld [vmem:[%s7934_s9 + $0xf8] sm:$0xff] }
 0x3d1   : > { %4115 = vmatprep.subr.bf16.mxu0 %v4114_v27  ;;  %4243 = vmatprep.subr.bf16.mxu1 %v4242_v28  ;;  %v4258_v2 = vpack.c.bf16 %v2881_v23, %v2880_v22  ;;  %v2913_v27 = vld [vmem:[%s7934_s9 + $0x1b8] sm:$0xff]  ;;  %v2864_v28 = vld [vmem:[%s7934_s9 + $0x30] sm:$0xff] }
 0x3d2   : > { %v4290_v29 = vpack.c.bf16 %v2913_v27, %v2912_v25  ;;  %v4260_v30 = vpack.c.bf16 %v2865_v48, %v2864_v28  ;;  %v2920_v19 = vld [vmem:[%s7934_s9 + $0x1f0] sm:$0xff]  ;;  %v2921_v22 = vld [vmem:[%s7934_s9 + $0x1f8] sm:$0xff] }
 0x3d3   : > { %v2872_v23 = vld [vmem:[%s7934_s9 + $0x70] sm:$0xff]  ;;  %v2873_v25 = vld [vmem:[%s7934_s9 + $0x78] sm:$0xff] }
 0x3d4   : > { %4117 = vmatpush1.bf16.msra.mxu0 %v4116_v33  ;;  %4245 = vmatpush1.bf16.msra.mxu1 %v4244_v44  ;;  %v2882_v33 = vld [vmem:[%s7934_s9 + $0xc0] sm:$0xff]  ;;  %v2883_v44 = vld [vmem:[%s7934_s9 + $0xc8] sm:$0xff]  ;;  %v4276_v27 = vpack.c.bf16 %v2873_v25, %v2872_v23  ;;  %v2904_v28 = vld [vmem:[%s7934_s9 + $0x170] sm:$0xff] }
 0x3d5   : > { %4247 = vmatprep.subr.bf16.mxu0 %v4246_v42  ;;  %4279 = vmatprep.subr.bf16.mxu1 %v4278_v43  ;;  %v4262_v42 = vpack.c.bf16 %v2883_v44, %v2882_v33  ;;  %v2915_v43 = vld [vmem:[%s7934_s9 + $0x1c8] sm:$0xff]  ;;  %v2905_v48 = vld [vmem:[%s7934_s9 + $0x178] sm:$0xff] }
 0x3d6   : > { %v4294_v50 = vpack.c.bf16 %v2915_v43, %v2914_v40 }
 0x3d7   : > { %2619 = vmatmul.mubr.f32.vlgmr.msra.gmra.mrb[12].mxu0 %v2193_v52  ;;  %2773 = vmatmul.mubr.f32.vlgmr.msra.gmra.mrb[12].mxu1 %v2193_v52  ;;  %v2899_v52 = vld [vmem:[%s7934_s9 + $0x148] sm:$0xff] }
 0x3d8   : > { %2624 = vmatprep.mubr.f32.mxu0 %v2198_v54  ;;  %2778 = vmatprep.mubr.f32.mxu1 %v2198_v54  ;;  %v4296_v53 = vpack.c.bf16 %v2899_v52, %v2898_v17  ;;  %v2916_v54 = vld [vmem:[%s7934_s9 + $0x1d0] sm:$0xff] }
 0x3d9   : > { %4249 = vmatpush3.bf16.msra.mxu0 %v4248_v31  ;;  %4281 = vmatpush3.bf16.msra.mxu1 %v4280_v47  ;;  %v2884_v31 = vld [vmem:[%s7934_s9 + $0xd0] sm:$0xff]  ;;  %v2885_v47 = vld [vmem:[%s7934_s9 + $0xd8] sm:$0xff] }
 0x3da   : > { %4251 = vmatprep.subr.bf16.mxu0 %v4250_v60  ;;  %4283 = vmatprep.subr.bf16.mxu1 %v4282_v3  ;;  %v4298_v60 = vpack.c.bf16 %v2917_v56, %v2916_v54  ;;  %v4300_v3 = vpack.c.bf16 %v2901_v63, %v2900_v62 }
 0x3db   : > { %2625 = vmatmul.mubr.f32.gmra.mrb[14].mxu0 %v2197_v55  ;;  %2779 = vmatmul.mubr.f32.gmra.mrb[14].mxu1 %v2197_v55  ;;  %v4266_v55 = vpack.c.bf16 %v2885_v47, %v2884_v31 }
 0x3dd   : > { %4253 = vmatpush3.bf16.msra.mxu0 %v4252_v12  ;;  %4285 = vmatpush3.bf16.msra.mxu1 %v4284_v10  ;;  %v2886_v12 = vld [vmem:[%s7934_s9 + $0xe0] sm:$0xff] }
 0x3de   : > { %4255 = vmatprep.subr.bf16.mxu0 %v4254_v5  ;;  %4287 = vmatprep.subr.bf16.mxu1 %v4286_v51  ;;  %v4270_v10 = vpack.c.bf16 %v2887_v4, %v2886_v12  ;;  %v4302_v5 = vpack.c.bf16 %v2919_v7, %v2918_v6  ;;  %v4304_v51 = vpack.c.bf16 %v2903_v15, %v2902_v0 }
 0x3e1   : > { %4257 = vmatpush3.bf16.msra.mxu0 %v4256_v58  ;;  %4289 = vmatpush3.bf16.msra.mxu1 %v4288_v21  ;;  %v2888_v58 = vld [vmem:[%s7934_s9 + $0xf0] sm:$0xff] }
 0x3e2   : > { %4259 = vmatprep.subr.bf16.mxu0 %v4258_v2  ;;  %4291 = vmatprep.subr.bf16.mxu1 %v4290_v29  ;;  %v4274_v21 = vpack.c.bf16 %v2889_v18, %v2888_v58  ;;  %v4306_v2 = vpack.c.bf16 %v2921_v22, %v2920_v19  ;;  %v4308_v29 = vpack.c.bf16 %v2905_v48, %v2904_v28 }
 0x3e5   : > { %4261 = vmatpush3.bf16.msra.mxu0 %v4260_v30  ;;  %4293 = vmatpush3.bf16.msra.mxu1 %v4292_v32  ;;  %v2455_v30 = vld [vmem:[%s7933_s8] sm:$0xf] }
 0x3e6   : > { %4263 = vmatprep.subr.bf16.mxu0 %v4262_v42  ;;  %4295 = vmatprep.subr.bf16.mxu1 %v4294_v50  ;;  %v2460_v14 = vrot.slane %v2455_v30, %v6460_v9  ;;  %v2468_v20 = vrot.slane %v2455_v30, %v6832_v39  ;;  %v2464_v32 = vrot.slane %v2455_v30, %v6468_v11 }
 0x3e7   : > { %v2472_v33 = vrot.slane %v2455_v30, %v6484_v16 }
 0x3e9   : > { %4265 = vmatpush3.bf16.msra.mxu0 %v4264_v37  ;;  %4297 = vmatpush3.bf16.msra.mxu1 %v4296_v53 }
 0x3ea   : > { %4267 = vmatprep.subr.bf16.mxu0 %v4266_v55  ;;  %4299 = vmatprep.subr.bf16.mxu1 %v4298_v60 }
 0x3ed   : > { %4269 = vmatpush3.bf16.msra.mxu0 %v4268_v61  ;;  %4301 = vmatpush3.bf16.msra.mxu1 %v4300_v3 }
 0x3ee   : > { %4271 = vmatprep.subr.bf16.mxu0 %v4270_v10  ;;  %4303 = vmatprep.subr.bf16.mxu1 %v4302_v5 }
 0x3f1   : > { %4273 = vmatpush3.bf16.msra.mxu0 %v4272_v8  ;;  %4305 = vmatpush3.bf16.msra.mxu1 %v4304_v51 }
 0x3f2   : > { %4275 = vmatprep.subr.bf16.mxu0 %v4274_v21  ;;  %4307 = vmatprep.subr.bf16.mxu1 %v4306_v2 }
 0x3f5   : > { %4277 = vmatpush3.bf16.msra.mxu0 %v4276_v27  ;;  %4309 = vmatpush3.bf16.msra.mxu1 %v4308_v29 }
 0x4aa   : > { %v2620_v44 = vpop.f32.mrb[12].mxu0  ;;  %v2774_v40 = vpop.f32.mrb[12].mxu1 }
 0x4ab   : > { %v4334_v42 = vadd.f32 %v2620_v44, %v2460_v14  ;;  %v4338_v43 = vadd.f32 %v2774_v40, %v2468_v20  ;;  %v2622_v46 = vpop.f32.mrb[13].mxu0  ;;  %v2776_v24 = vpop.f32.mrb[13].mxu1 }
 0x4ac   : > { %v4335_v50 = vadd.f32 %v2622_v46, %v2464_v32  ;;  %v4339_v37 = vadd.f32 %v2776_v24, %v2472_v33 }
 0x4ad   : > { %v2785_v17 = vadd.f32 %v4334_v42, %v6525_v41  ;;  %v2787_v52 = vadd.f32 %v4338_v43, %v6937_v38 }
 0x4ae   : > { %v2786_v9 = vadd.f32 %v4335_v50, %v6518_v34  ;;  %v2788_v39 = vadd.f32 %v4339_v37, %v6585_v13  ;;  %v2626_v53 = vpop.f32.mrb[14].mxu0  ;;  %v2780_v11 = vpop.f32.mrb[14].mxu1 }
 0x4af   : > { %v2793_v31 = vmax.f32 %v2785_v17, 0.0  ;;  %v2795_v16 = vmax.f32 %v2787_v52, 0.0  ;;  %v4336_v47 = vadd.f32 %v2626_v53, %v2460_v14  ;;  %v4340_v54 = vadd.f32 %v2780_v11, %v2468_v20  ;;  %v2628_v55 = vpop.f32.mrb[15].mxu0  ;;  %v2782_v56 = vpop.f32.mrb[15].mxu1 }
 0x4b0   : > { %v2794_v36 = vmax.f32 %v2786_v9, 0.0  ;;  %v2796_v57 = vmax.f32 %v2788_v39, 0.0  ;;  %v4337_v60 = vadd.f32 %v2628_v55, %v2464_v32  ;;  %v4341_v61 = vadd.f32 %v2782_v56, %v2472_v33 }
 0x4b1   : > { %v2801_v62 = vrot.slane %v2793_v31, 4  ;;  %v2813_v41 = vrot.slane %v2795_v16, 4  ;;  %v2789_v38 = vadd.f32 %v4336_v47, %v6563_v1  ;;  %v2791_v34 = vadd.f32 %v4340_v54, %v6970_v26 }
 0x4b2   : > { %v2807_v63 = vrot.slane %v2794_v36, 4  ;;  %v2819_v13 = vrot.slane %v2796_v57, 4  ;;  %v2790_v3 = vadd.f32 %v4337_v60, %v6555_v59  ;;  %v2792_v12 = vadd.f32 %v4341_v61, %v6946_v49 }
 0x4b3   : > { %v2802_v4 = vadd.f32 %v2801_v62, %v2793_v31  ;;  %v2814_v6 = vadd.f32 %v2813_v41, %v2795_v16  ;;  %v2797_v10 = vmax.f32 %v2789_v38, 0.0  ;;  %v2799_v7 = vmax.f32 %v2791_v34, 0.0 }
 0x4b4   : > { %v2808_v35 = vadd.f32 %v2807_v63, %v2794_v36  ;;  %v2820_v45 = vadd.f32 %v2819_v13, %v2796_v57  ;;  %v2798_v5 = vmax.f32 %v2790_v3, 0.0  ;;  %v2800_v8 = vmax.f32 %v2792_v12, 0.0  ;;  %v3148_v3 = vld [vmem:[%s7935_s10] ss:$0 sm:$0xff] }
 0x4b5   : > { %v2803_v0 = vrot.slane %v2802_v4, 2  ;;  %v2815_v15 = vrot.slane %v2814_v6, 2  ;;  %v2825_v51 = vrot.slane %v2797_v10, 4  ;;  %v2837_v1 = vrot.slane %v2799_v7, 4 }
 0x4b6   : > { %v2809_v58 = vrot.slane %v2808_v35, 2  ;;  %v2821_v26 = vrot.slane %v2820_v45, 2  ;;  %v2831_v18 = vrot.slane %v2798_v5, 4  ;;  %v2843_v19 = vrot.slane %v2800_v8, 4 }
 0x4b7   : > { %v2804_v21 = vadd.f32 %v2803_v0, %v2802_v4  ;;  %v2816_v59 = vadd.f32 %v2815_v15, %v2814_v6  ;;  %v2826_v22 = vadd.f32 %v2825_v51, %v2797_v10  ;;  %v2838_v49 = vadd.f32 %v2837_v1, %v2799_v7 }
 0x4b8   : > { %v2810_v23 = vadd.f32 %v2809_v58, %v2808_v35  ;;  %v2822_v25 = vadd.f32 %v2821_v26, %v2820_v45  ;;  %v2832_v2 = vadd.f32 %v2831_v18, %v2798_v5  ;;  %v2844_v27 = vadd.f32 %v2843_v19, %v2800_v8 }
 0x4b9   : > { %v2805_v28 = vrot.slane %v2804_v21, 1  ;;  %v2817_v48 = vrot.slane %v2816_v59, 1  ;;  %v2827_v29 = vrot.slane %v2826_v22, 2  ;;  %v2839_v30 = vrot.slane %v2838_v49, 2 }
 0x4ba   : > { %v2833_v14 = vrot.slane %v2832_v2, 2  ;;  %v2845_v20 = vrot.slane %v2844_v27, 2  ;;  %v2811_v32 = vrot.slane %v2810_v23, 1  ;;  %v2823_v33 = vrot.slane %v2822_v25, 1 }
 0x4bb   : > { %v2828_v44 = vadd.f32 %v2827_v29, %v2826_v22  ;;  %v2840_v40 = vadd.f32 %v2839_v30, %v2838_v49  ;;  %v2806_v46 = vadd.f32 %v2805_v28, %v2804_v21  ;;  %v2818_v24 = vadd.f32 %v2817_v48, %v2816_v59 }
 0x4bc   : > { %v2834_v42 = vadd.f32 %v2833_v14, %v2832_v2  ;;  %v2846_v43 = vadd.f32 %v2845_v20, %v2844_v27  ;;  %v2812_v17 = vadd.f32 %v2811_v32, %v2810_v23  ;;  %v2824_v9 = vadd.f32 %v2823_v33, %v2822_v25 }
 0x4bd   : > { %v2829_v50 = vrot.slane %v2828_v44, 1  ;;  %v2841_v37 = vrot.slane %v2840_v40, 1  ;;  %v2850_v47 = vmul.f32 0.125, %v2806_v46  ;;  %v2852_v54 = vmul.f32 0.125, %v2818_v24 }
 0x4be   : > { %v2835_v52 = vrot.slane %v2834_v42, 1  ;;  %v2847_v39 = vrot.slane %v2846_v43, 1  ;;  %v2851_v36 = vmul.f32 0.125, %v2812_v17  ;;  %v2853_v60 = vmul.f32 0.125, %v2824_v9 }
 0x4bf   : > { %v2830_v53 = vadd.f32 %v2829_v50, %v2828_v44  ;;  %v2842_v11 = vadd.f32 %v2841_v37, %v2840_v40 }
 0x4c0   : > { %v2836_v31 = vadd.f32 %v2835_v52, %v2834_v42  ;;  %v2848_v16 = vadd.f32 %v2847_v39, %v2846_v43 }
 0x4c1   : > { %v2854_v55 = vmul.f32 0.125, %v2830_v53  ;;  %v2856_v56 = vmul.f32 0.125, %v2842_v11 }
 0x4c2   : > { %v2855_v57 = vmul.f32 0.125, %v2836_v31  ;;  %v2857_v61 = vmul.f32 0.125, %v2848_v16 }
 0x4c3   : > { %v2938_v62 = vsel %vm2937_vm0, %v2854_v55, %v2850_v47  ;;  %v2940_v41 = vsel %vm2937_vm0, %v2856_v56, %v2852_v54 }
 0x4c4   : > { %v2939_v38 = vsel %vm2937_vm0, %v2855_v57, %v2851_v36  ;;  %v2941_v34 = vsel %vm2937_vm0, %v2857_v61, %v2853_v60 }
 0x4c5   : > { %3010 = vmatprep.mubr.f32.mxu0 %v2939_v38  ;;  %3080 = vmatprep.mubr.f32.mxu1 %v2941_v34 }
 0x4c6   : > { %3011 = vmatmul.mubr.f32.vlgmr.msra.gmra.mrb[16].mxu0 %v2938_v62  ;;  %3081 = vmatmul.mubr.f32.vlgmr.msra.gmra.mrb[16].mxu1 %v2940_v41 }
 0x599   : > { %v3184_v63 = vpop.f32.mrb[16].mxu0  ;;  %v3219_v13 = vpop.f32.mrb[16].mxu1 }
 0x59a   : > { %v3185_v12 = vpop.f32.mrb[17].mxu0  ;;  %v3220_v4 = vpop.f32.mrb[17].mxu1 }
 0x59b   : > { %v3186_v6 = vadd.f32 %v3185_v12, %v3184_v63  ;;  %v3221_v10 = vadd.f32 %v3220_v4, %v3219_v13 }
 0x59d   : > { %v3013_v7 = vadd.f32 %v3186_v6, %v3148_v3 }
 0x59f   : > { %v3083_v35 = vadd.f32 %v3221_v10, %v3013_v7 }
 0x5a1   : > { %3086 = vst [vmem:[%s384_s14] sm:$0x3] %v3083_v35 }
 0x5a2 PF: > { %s21_s17 = sadd.s32 1, %s4389_s17  }
 0x5a3   : > { %p18_p4 = scmp.ge.s32.totalorder %s21_s17, 4  }
 0x5a5   :  { %20 = sbr.rel (!%p18_p4) target bundleno = 1 (0x1), region = 94 }

</bundles_post_ra>
